<compile_context>
chip_gen: v7x
topology: tpu7x:2x2x1
jax: 0.10.0
libtpu: 0.0.40
codegen_flags: <defaults>
</compile_context>

<pallas_src>
import functools

import jax
import jax.numpy as jnp
from jax.experimental import pallas as pl
from jax.experimental.pallas import tpu as pltpu


# ----------------------------------------------------------------------------
# Small helpers
# ----------------------------------------------------------------------------
def _round_up(x, m):
    return (x + m - 1) // m * m


def _largest_tile(n, cands=(512, 256, 128)):
    for c in cands:
        if n % c == 0:
            return c
    return cands[-1]


def _row_tile(rows):
    for c in (256, 128, 64, 32, 16, 8, 4, 2, 1):
        if rows % c == 0:
            return c
    return 1


# ----------------------------------------------------------------------------
# Pallas kernels
# ----------------------------------------------------------------------------
def _mm_kernel(a_ref, w_ref, s_ref, t_ref, o_ref, acc_ref, *, relu):
    """Tiled matmul with fused epilogue: (A@W) * scale + shift [, ReLU]."""
    k = pl.program_id(2)

    @pl.when(k == 0)
    def _init():
        acc_ref[...] = jnp.zeros_like(acc_ref)

    acc_ref[...] += jnp.dot(a_ref[...], w_ref[...],
                            preferred_element_type=jnp.float32)

    @pl.when(k == pl.num_programs(2) - 1)
    def _epilogue():
        y = acc_ref[...] * s_ref[...] + t_ref[...]
        if relu:
            y = jnp.maximum(y, 0.0)
        o_ref[...] = y


def _mm_res_kernel(a_ref, w_ref, s_ref, t_ref, r_ref, o_ref, acc_ref, *, relu):
    """Same as _mm_kernel plus fused residual add (non_bottleneck skip)."""
    k = pl.program_id(2)

    @pl.when(k == 0)
    def _init():
        acc_ref[...] = jnp.zeros_like(acc_ref)

    acc_ref[...] += jnp.dot(a_ref[...], w_ref[...],
                            preferred_element_type=jnp.float32)

    @pl.when(k == pl.num_programs(2) - 1)
    def _epilogue():
        y = acc_ref[...] * s_ref[...] + t_ref[...] + r_ref[...]
        if relu:
            y = jnp.maximum(y, 0.0)
        o_ref[...] = y


def _pool_bn_relu_kernel(x_ref, s_ref, t_ref, o_ref):
    """2x2 max-pool + folded-BN affine + ReLU, single read of the input tile.

    x_ref block: (tm, 2, Wo, 2*C) ; o_ref block: (tm, Wo, C)."""
    c = o_ref.shape[-1]
    v = jnp.maximum(x_ref[:, 0], x_ref[:, 1])       # vertical 2-max   (tm, Wo, 2C)
    h = jnp.maximum(v[:, :, :c], v[:, :, c:])       # horizontal 2-max (tm, Wo, C)
    o_ref[...] = jnp.maximum(h * s_ref[...] + t_ref[...], 0.0)


# ----------------------------------------------------------------------------
# Pallas wrappers
# ----------------------------------------------------------------------------
def fused_matmul(a, w, scale, shift, residual=None, relu=False):
    """out = [relu]( (a @ w) * scale + shift (+ residual) ).

    a: (M, K) f32, w: (K, N) f32, scale/shift: (N,), residual: (M, N) or None.
    MXU in bf16, f32 accumulation, f32 output.  All dims padded to 128."""
    M, K = a.shape
    N = w.shape[1]
    Mp, Kp, Np = _round_up(M, 128), _round_up(K, 128), _round_up(N, 128)
    tm, tk, tn = _largest_tile(Mp), _largest_tile(Kp), 128

    a_p = jnp.pad(a, ((0, Mp - M), (0, Kp - K))).astype(jnp.bfloat16)
    w_p = jnp.pad(w, ((0, Kp - K), (0, Np - N))).astype(jnp.bfloat16)
    s_p = jnp.pad(scale.reshape(1, N).astype(jnp.float32), ((0, 0), (0, Np - N)))
    t_p = jnp.pad(shift.reshape(1, N).astype(jnp.float32), ((0, 0), (0, Np - N)))

    in_specs = [
        pl.BlockSpec((tm, tk), lambda i, j, k: (i, k)),
        pl.BlockSpec((tk, tn), lambda i, j, k: (k, j)),
        pl.BlockSpec((1, tn), lambda i, j, k: (0, j)),
        pl.BlockSpec((1, tn), lambda i, j, k: (0, j)),
    ]
    args = [a_p, w_p, s_p, t_p]
    bytes_accessed = (Mp * Kp + Kp * Np) * 2 + Mp * Np * 4
    if residual is None:
        kern = functools.partial(_mm_kernel, relu=relu)
    else:
        r_p = jnp.pad(residual.astype(jnp.float32), ((0, Mp - M), (0, Np - N)))
        in_specs.append(pl.BlockSpec((tm, tn), lambda i, j, k: (i, j)))
        args.append(r_p)
        bytes_accessed += Mp * Np * 4
        kern = functools.partial(_mm_res_kernel, relu=relu)

    out = pl.pallas_call(
        kern,
        grid=(Mp // tm, Np // tn, Kp // tk),
        in_specs=in_specs,
        out_specs=pl.BlockSpec((tm, tn), lambda i, j, k: (i, j)),
        out_shape=jax.ShapeDtypeStruct((Mp, Np), jnp.float32),
        scratch_shapes=[pltpu.VMEM((tm, tn), jnp.float32)],
        compiler_params=pltpu.CompilerParams(
            dimension_semantics=("parallel", "parallel", "arbitrary")),
        cost_estimate=pl.CostEstimate(flops=2 * Mp * Kp * Np,
                                      transcendentals=0,
                                      bytes_accessed=bytes_accessed),
    )(*args)
    return out[:M, :N]


def maxpool2x2_bn_relu(x, scale, shift):
    """MaxPool2d(2,2) + folded-BN affine + ReLU on NHWC in one Pallas kernel."""
    N, H, W, C = x.shape
    Ho, Wo = H // 2, W // 2
    rows = N * Ho
    xr = x.reshape(rows, 2, Wo, 2 * C)      # contiguity-preserving reshape
    tm = _row_tile(rows)
    out = pl.pallas_call(
        _pool_bn_relu_kernel,
        grid=(rows // tm,),
        in_specs=[
            pl.BlockSpec((tm, 2, Wo, 2 * C), lambda i: (i, 0, 0, 0)),
            pl.BlockSpec((1, 1, C), lambda i: (0, 0, 0)),
            pl.BlockSpec((1, 1, C), lambda i: (0, 0, 0)),
        ],
        out_specs=pl.BlockSpec((tm, Wo, C), lambda i: (i, 0, 0)),
        out_shape=jax.ShapeDtypeStruct((rows, Wo, C), jnp.float32),
        compiler_params=pltpu.CompilerParams(dimension_semantics=("parallel",)),
    )(xr, scale.reshape(1, 1, C), shift.reshape(1, 1, C))
    return out.reshape(N, Ho, Wo, C)


# ----------------------------------------------------------------------------
# Convolution glue (im2col in JAX, matmul + full epilogue in Pallas)
# ----------------------------------------------------------------------------
def conv2d(x, w, scale, shift, stride=(1, 1), padding=((0, 0), (0, 0)),
           dilation=(1, 1), relu=False, residual=None):
    """x: NHWC, w: (kh, kw, Cin, Cout); scale/shift already include the bias."""
    N, H, W, C = x.shape
    kh, kw, _, Cout = w.shape
    sh, sw = stride
    dh, dw = dilation
    xp = jnp.pad(x, ((0, 0), padding[0], padding[1], (0, 0)))
    Hp, Wp = xp.shape[1], xp.shape[2]
    oh = (Hp - (kh - 1) * dh - 1) // sh + 1
    ow = (Wp - (kw - 1) * dw - 1) // sw + 1
    if kh == 1 and kw == 1 and sh == 1 and sw == 1:
        a = xp.reshape(N * oh * ow, C)
    else:
        patches = []
        for i in range(kh):
            for j in range(kw):
                di, dj = i * dh, j * dw
                patches.append(xp[:, di:di + (oh - 1) * sh + 1:sh,
                                     dj:dj + (ow - 1) * sw + 1:sw, :])
        a = jnp.concatenate(patches, axis=-1).reshape(N * oh * ow, kh * kw * C)
    res = residual.reshape(N * oh * ow, Cout) if residual is not None else None
    out = fused_matmul(a, w.reshape(kh * kw * C, Cout), scale, shift,
                       residual=res, relu=relu)
    return out.reshape(N, oh, ow, Cout)


def _interleave_phases(y, N, H, W, Cout):
    """(N*H*W, 4*Cout) phase-major [(0,0),(0,1),(1,0),(1,1)] -> (N,2H,2W,Cout)."""
    y = y.reshape(N, H, W, 2, 2, Cout)
    y = jnp.transpose(y, (0, 1, 3, 2, 4, 5))
    return y.reshape(N, 2 * H, 2 * W, Cout)


# ----------------------------------------------------------------------------
# Deterministic parameter generation
# ----------------------------------------------------------------------------
class ParamGen:
    def __init__(self, key):
        self.key = key

    def _next(self):
        self.key, sub = jax.random.split(self.key)
        return sub

    def uniform(self, shape, lo, hi):
        return jax.random.uniform(self._next(), shape, jnp.float32, lo, hi)


def conv_params(pg, cin, cout, kh, kw):
    fan_in = cin * kh * kw
    bound = 1.0 / (fan_in ** 0.5)
    w = pg.uniform((kh, kw, cin, cout), -bound, bound)
    b = pg.uniform((cout,), -bound, bound)
    return w, b


def bn_params(pg, ch, eps=1e-3):
    gamma = pg.uniform((ch,), 0.8, 1.2)
    beta = pg.uniform((ch,), -0.1, 0.1)
    running_mean = pg.uniform((ch,), -0.1, 0.1)
    running_var = pg.uniform((ch,), 0.8, 1.2)
    scale = gamma / jnp.sqrt(running_var + eps)
    shift = beta - running_mean * scale
    return scale, shift


# ----------------------------------------------------------------------------
# ERFNet blocks
# ----------------------------------------------------------------------------
def init_downsampler(pg, nin, nout):
    w, b = conv_params(pg, nin, nout - nin, 3, 3)
    scale, shift = bn_params(pg, nout)
    nc = nout - nin
    return dict(kind="down", w=w,
                conv_scale=scale[:nc], conv_shift=shift[:nc] + b * scale[:nc],
                pool_scale=scale[nc:], pool_shift=shift[nc:])


def downsampler_fwd(p, x):
    conv_out = conv2d(x, p["w"], p["conv_scale"], p["conv_shift"],
                      stride=(2, 2), padding=((1, 1), (1, 1)), relu=True)
    pool_out = maxpool2x2_bn_relu(x, p["pool_scale"], p["pool_shift"])
    # torch.cat([conv(input), pool(input)], 1); BN+ReLU already fused above.
    return jnp.concatenate([conv_out, pool_out], axis=-1)


def init_non_bottleneck(pg, ch, dilated):
    w1, b1 = conv_params(pg, ch, ch, 3, 1)
    w2, b2 = conv_params(pg, ch, ch, 1, 3)
    bn1_s, bn1_t = bn_params(pg, ch)
    w3, b3 = conv_params(pg, ch, ch, 3, 1)
    w4, b4 = conv_params(pg, ch, ch, 1, 3)
    bn2_s, bn2_t = bn_params(pg, ch)
    ones = jnp.ones((ch,), jnp.float32)
    return dict(
        kind="nb", dil=dilated,
        w1=w1, s1=ones, t1=b1,                    # conv3x1_1 (+ReLU)
        w2=w2, s2=bn1_s, t2=bn1_t + b2 * bn1_s,   # conv1x3_1 + BN1 (+ReLU)
        w3=w3, s3=ones, t3=b3,                    # conv3x1_2 dilated (+ReLU)
        w4=w4, s4=bn2_s, t4=bn2_t + b4 * bn2_s,   # conv1x3_2 dilated + BN2 (+skip+ReLU)
    )


def non_bottleneck_fwd(p, x):
    d = p["dil"]
    out = conv2d(x, p["w1"], p["s1"], p["t1"], padding=((1, 1), (0, 0)), relu=True)
    out = conv2d(out, p["w2"], p["s2"], p["t2"], padding=((0, 0), (1, 1)), relu=True)
    out = conv2d(out, p["w3"], p["s3"], p["t3"], padding=((d, d), (0, 0)),
                 dilation=(d, 1), relu=True)
    # Dropout2d is identity in inference mode.
    return conv2d(out, p["w4"], p["s4"], p["t4"], padding=((0, 0), (d, d)),
                  dilation=(1, d), relu=True, residual=x)


def init_upsampler(pg, nin, nout):
    # ConvTranspose2d(nin, nout, 3, stride=2, padding=1, output_padding=1)
    # decomposed into 4 sub-pixel phases, packed into one (4*nin, 4*nout) weight:
    #   rows grouped by shifted inputs [x00; x01; x10; x11],
    #   cols grouped by output phases [(0,0),(0,1),(1,0),(1,1)].
    w, b = conv_params(pg, nin, nout, 3, 3)           # W[kh, kw, ci, co]
    s, t = bn_params(pg, nout)
    z = jnp.zeros((nin, nout), jnp.float32)
    wc = jnp.concatenate([
        jnp.concatenate([w[1, 1], w[1, 2], w[2, 1], w[2, 2]], axis=1),
        jnp.concatenate([z,       w[1, 0], z,       w[2, 0]], axis=1),
        jnp.concatenate([z,       z,       w[0, 1], w[0, 2]], axis=1),
        jnp.concatenate([z,       z,       z,       w[0, 0]], axis=1),
    ], axis=0)
    return dict(kind="up", wc=wc, nout=nout,
                scale=jnp.tile(s, 4), shift=jnp.tile(t + b * s, 4))


def upsampler_fwd(p, x):
    N, H, W, Cin = x.shape
    x01 = jnp.pad(x[:, :, 1:, :], ((0, 0), (0, 0), (0, 1), (0, 0)))
    x10 = jnp.pad(x[:, 1:, :, :], ((0, 0), (0, 1), (0, 0), (0, 0)))
    x11 = jnp.pad(x[:, 1:, 1:, :], ((0, 0), (0, 1), (0, 1), (0, 0)))
    a = jnp.concatenate([x, x01, x10, x11], axis=-1).reshape(N * H * W, 4 * Cin)
    y = fused_matmul(a, p["wc"], p["scale"], p["shift"], relu=True)
    return _interleave_phases(y, N, H, W, p["nout"])


def init_output_conv(pg, nin, num_classes):
    # ConvTranspose2d(nin, num_classes, 2, stride=2): each output phase (a,b)
    # is an independent 1x1 conv with W[a, b] -> one matmul, 4*num_classes cols.
    w, b = conv_params(pg, nin, num_classes, 2, 2)
    wc = jnp.concatenate([w[0, 0], w[0, 1], w[1, 0], w[1, 1]], axis=1)
    return dict(wc=wc, nout=num_classes,
                scale=jnp.ones((4 * num_classes,), jnp.float32),
                shift=jnp.tile(b, 4))


def output_conv_fwd(p, x):
    N, H, W, Cin = x.shape
    y = fused_matmul(x.reshape(N * H * W, Cin), p["wc"], p["scale"], p["shift"],
                     relu=False)
    return _interleave_phases(y, N, H, W, p["nout"])


_FWD = {"down": downsampler_fwd, "nb": non_bottleneck_fwd, "up": upsampler_fwd}


# ----------------------------------------------------------------------------
# ERFNet: init + forward
# ----------------------------------------------------------------------------
def init_erfnet(key, num_classes):
    pg = ParamGen(key)
    enc = [init_downsampler(pg, 3, 16),           # initial_block
           init_downsampler(pg, 16, 64)]
    for _ in range(5):
        enc.append(init_non_bottleneck(pg, 64, 1))
    enc.append(init_downsampler(pg, 64, 128))
    for _ in range(2):
        for d in (2, 4, 8, 16):
            enc.append(init_non_bottleneck(pg, 128, d))
    # Encoder.output_conv is unused when only_encode=False.

    dec = [init_upsampler(pg, 128, 64),
           init_non_bottleneck(pg, 64, 1),
           init_non_bottleneck(pg, 64, 1),
           init_upsampler(pg, 64, 16),
           init_non_bottleneck(pg, 16, 1),
           init_non_bottleneck(pg, 16, 1)]
    out = init_output_conv(pg, 16, num_classes)
    return dict(enc=enc, dec=dec, out=out)


def erfnet_forward(params, x_nchw):
    x = jnp.transpose(x_nchw, (0, 2, 3, 1)).astype(jnp.float32)  # NCHW -> NHWC
    out = x
    for p in params["enc"]:
        out = _FWD[p["kind"]](p, out)
    for p in params["dec"]:
        out = _FWD[p["kind"]](p, out)
    out = output_conv_fwd(params["out"], out)
    return jnp.transpose(out, (0, 3, 1, 2))                      # NHWC -> NCHW


# ----------------------------------------------------------------------------
if __name__ == "__main__":
    num_classes = 4
    key = jax.random.PRNGKey(0)
    pkey, xkey = jax.random.split(key)

    params = init_erfnet(pkey, num_classes)
    x = jax.random.normal(xkey, (2, 3, 16, 16), jnp.float32)  # NCHW like PyTorch

    fwd = jax.jit(functools.partial(erfnet_forward, params))
    y = fwd(x)
    jax.block_until_ready(y)

    assert y.shape == (2, num_classes, 16, 16), y.shape
    assert jnp.all(jnp.isfinite(y))
    print("KERNEL_OK")
</pallas_src>

<mosaic_0001>
module attributes {stable_mosaic.version = 11 : i64} {
  func.func @_pool_bn_relu_kernel(%arg0: i32, %arg1: memref<16x2x8x6xf32, #tpu.memory_space<vmem>>, %arg2: memref<1x1x3xf32, #tpu.memory_space<vmem>>, %arg3: memref<1x1x3xf32, #tpu.memory_space<vmem>>, %arg4: memref<16x8x3xf32, #tpu.memory_space<vmem>>) attributes {dimension_semantics = [#tpu.dimension_semantics<parallel>], iteration_bounds = array<i64: 1>, scalar_prefetch = 0 : i64, scratch_operands = 0 : i64, tpu.core_type = #tpu.core_type<tc>, window_params = [{transform_indices = @transform_0, window_bounds = array<i64: 16, 2, 8, 6>}, {pipeline_mode = #tpu.pipeline_mode<synchronous>, transform_indices = @transform_1, window_bounds = array<i64: 1, 1, 3>}, {pipeline_mode = #tpu.pipeline_mode<synchronous>, transform_indices = @transform_2, window_bounds = array<i64: 1, 1, 3>}, {transform_indices = @transform_3, window_bounds = array<i64: 16, 8, 3>}]} {
    %c0 = arith.constant 0 : index
    %c0_0 = arith.constant 0 : index
    %c0_1 = arith.constant 0 : index
    %c0_2 = arith.constant 0 : index
    %0 = vector.load %arg1[%c0, %c0_0, %c0_1, %c0_2] : memref<16x2x8x6xf32, #tpu.memory_space<vmem>>, vector<16x1x8x6xf32>
    %1 = vector.shape_cast %0 : vector<16x1x8x6xf32> to vector<16x8x6xf32>
    %c0_3 = arith.constant 0 : index
    %c1 = arith.constant 1 : index
    %c0_4 = arith.constant 0 : index
    %c0_5 = arith.constant 0 : index
    %2 = vector.load %arg1[%c0_3, %c1, %c0_4, %c0_5] : memref<16x2x8x6xf32, #tpu.memory_space<vmem>>, vector<16x1x8x6xf32>
    %3 = vector.shape_cast %2 : vector<16x1x8x6xf32> to vector<16x8x6xf32>
    %4 = arith.maximumf %1, %3 : vector<16x8x6xf32>
    %5 = vector.extract_strided_slice %4 {offsets = [0, 0, 0], sizes = [16, 8, 3], strides = [1, 1, 1]} : vector<16x8x6xf32> to vector<16x8x3xf32>
    %6 = vector.extract_strided_slice %4 {offsets = [0, 0, 3], sizes = [16, 8, 3], strides = [1, 1, 1]} : vector<16x8x6xf32> to vector<16x8x3xf32>
    %7 = arith.maximumf %5, %6 : vector<16x8x3xf32>
    %c0_6 = arith.constant 0 : index
    %c0_7 = arith.constant 0 : index
    %c0_8 = arith.constant 0 : index
    %8 = vector.load %arg2[%c0_6, %c0_7, %c0_8] : memref<1x1x3xf32, #tpu.memory_space<vmem>>, vector<1x1x3xf32>
    %9 = vector.broadcast %8 : vector<1x1x3xf32> to vector<16x8x3xf32>
    %10 = arith.mulf %7, %9 : vector<16x8x3xf32>
    %c0_9 = arith.constant 0 : index
    %c0_10 = arith.constant 0 : index
    %c0_11 = arith.constant 0 : index
    %11 = vector.load %arg3[%c0_9, %c0_10, %c0_11] : memref<1x1x3xf32, #tpu.memory_space<vmem>>, vector<1x1x3xf32>
    %12 = vector.broadcast %11 : vector<1x1x3xf32> to vector<16x8x3xf32>
    %13 = arith.addf %10, %12 : vector<16x8x3xf32>
    %cst = arith.constant 0.000000e+00 : f32
    %14 = vector.broadcast %cst : f32 to vector<16x8x3xf32>
    %15 = arith.maximumf %13, %14 : vector<16x8x3xf32>
    %c0_12 = arith.constant 0 : index
    %c0_13 = arith.constant 0 : index
    %c0_14 = arith.constant 0 : index
    %16 = vector.load %arg4[%c0_12, %c0_13, %c0_14] : memref<16x8x3xf32, #tpu.memory_space<vmem>>, vector<16x8x3xf32>
    tpu.vector_store %arg4[%c0_12, %c0_13, %c0_14], %15 {strides = array<i32>} : memref<16x8x3xf32, #tpu.memory_space<vmem>>, vector<16x8x3xf32>,
    return
  }
  func.func @transform_0(%arg0: i32) -> (i32, i32, i32, i32) {
    %c0_i32 = arith.constant 0 : i32
    %c0_i32_0 = arith.constant 0 : i32
    %c0_i32_1 = arith.constant 0 : i32
    %c0_i32_2 = arith.constant 0 : i32
    return %arg0, %c0_i32, %c0_i32_0, %c0_i32_1 : i32, i32, i32, i32
  }
  func.func @transform_1(%arg0: i32) -> (i32, i32, i32) {
    %c0_i32 = arith.constant 0 : i32
    %c0_i32_0 = arith.constant 0 : i32
    %c0_i32_1 = arith.constant 0 : i32
    %c0_i32_2 = arith.constant 0 : i32
    return %c0_i32, %c0_i32_0, %c0_i32_1 : i32, i32, i32
  }
  func.func @transform_2(%arg0: i32) -> (i32, i32, i32) {
    %c0_i32 = arith.constant 0 : i32
    %c0_i32_0 = arith.constant 0 : i32
    %c0_i32_1 = arith.constant 0 : i32
    %c0_i32_2 = arith.constant 0 : i32
    return %c0_i32, %c0_i32_0, %c0_i32_1 : i32, i32, i32
  }
  func.func @transform_3(%arg0: i32) -> (i32, i32, i32) {
    %c0_i32 = arith.constant 0 : i32
    %c0_i32_0 = arith.constant 0 : i32
    %c0_i32_1 = arith.constant 0 : i32
    return %arg0, %c0_i32, %c0_i32_0 : i32, i32, i32
  }
}

module attributes {stable_mosaic.version = 11 : i64} {
  func.func @_mm_kernel(%arg0: i32, %arg1: i32, %arg2: i32, %arg3: memref<128x128xbf16, #tpu.memory_space<vmem>>, %arg4: memref<128x128xbf16, #tpu.memory_space<vmem>>, %arg5: memref<1x128xf32, #tpu.memory_space<vmem>>, %arg6: memref<1x128xf32, #tpu.memory_space<vmem>>, %arg7: memref<128x128xf32, #tpu.memory_space<vmem>>, %arg8: memref<128x128xf32, #tpu.memory_space<vmem>>) attributes {dimension_semantics = [#tpu.dimension_semantics<parallel>, #tpu.dimension_semantics<parallel>, #tpu.dimension_semantics<arbitrary>], iteration_bounds = array<i64: 1, 1, 1>, scalar_prefetch = 0 : i64, scratch_operands = 1 : i64, tpu.core_type = #tpu.core_type<tc>, window_params = [{transform_indices = @transform_0, window_bounds = array<i64: 128, 128>}, {transform_indices = @transform_1, window_bounds = array<i64: 128, 128>}, {transform_indices = @transform_2, window_bounds = array<i64: 1, 128>}, {transform_indices = @transform_3, window_bounds = array<i64: 1, 128>}, {transform_indices = @transform_4, window_bounds = array<i64: 128, 128>}]} {
    %c0_i32 = arith.constant 0 : i32
    %0 = arith.cmpi eq, %arg2, %c0_i32 : i32
    %1 = arith.extui %0 : i1 to i32
    %c0_i32_0 = arith.constant 0 : i32
    %2 = arith.cmpi ne, %1, %c0_i32_0 : i32
    scf.if %2 {
      %cst_10 = arith.constant 0.000000e+00 : f32
      %12 = vector.broadcast %cst_10 : f32 to vector<128x128xf32>
      %c0_11 = arith.constant 0 : index
      %c0_12 = arith.constant 0 : index
      %13 = vector.load %arg8[%c0_11, %c0_12] : memref<128x128xf32, #tpu.memory_space<vmem>>, vector<128x128xf32>
      tpu.vector_store %arg8[%c0_11, %c0_12], %12 {strides = array<i32>} : memref<128x128xf32, #tpu.memory_space<vmem>>, vector<128x128xf32>,
    } else {
    }
    %c0 = arith.constant 0 : index
    %c0_1 = arith.constant 0 : index
    %3 = vector.load %arg8[%c0, %c0_1] : memref<128x128xf32, #tpu.memory_space<vmem>>, vector<128x128xf32>
    %c0_2 = arith.constant 0 : index
    %c0_3 = arith.constant 0 : index
    %4 = vector.load %arg3[%c0_2, %c0_3] : memref<128x128xbf16, #tpu.memory_space<vmem>>, vector<128x128xbf16>
    %c0_4 = arith.constant 0 : index
    %c0_5 = arith.constant 0 : index
    %5 = vector.load %arg4[%c0_4, %c0_5] : memref<128x128xbf16, #tpu.memory_space<vmem>>, vector<128x128xbf16>
    %cst = arith.constant dense<0.000000e+00> : vector<128x128xf32>
    %6 = tpu.matmul %4, %5, %cst {dimension_numbers = #tpu.dot_dimension_numbers<[1], [0], [0], [1], [0, 0, 1, 1], [], []>} : vector<128x128xbf16>, vector<128x128xbf16>, vector<128x128xf32> -> vector<128x128xf32>
    %7 = arith.addf %3, %6 : vector<128x128xf32>
    %c0_6 = arith.constant 0 : index
    %c0_7 = arith.constant 0 : index
    %8 = vector.load %arg8[%c0_6, %c0_7] : memref<128x128xf32, #tpu.memory_space<vmem>>, vector<128x128xf32>
    tpu.vector_store %arg8[%c0_6, %c0_7], %7 {strides = array<i32>} : memref<128x128xf32, #tpu.memory_space<vmem>>, vector<128x128xf32>,
    %c0_i32_8 = arith.constant 0 : i32
    %9 = arith.cmpi eq, %arg2, %c0_i32_8 : i32
    %10 = arith.extui %9 : i1 to i32
    %c0_i32_9 = arith.constant 0 : i32
    %11 = arith.cmpi ne, %10, %c0_i32_9 : i32
    scf.if %11 {
      %c0_10 = arith.constant 0 : index
      %c0_11 = arith.constant 0 : index
      %12 = vector.load %arg8[%c0_10, %c0_11] : memref<128x128xf32, #tpu.memory_space<vmem>>, vector<128x128xf32>
      %c0_12 = arith.constant 0 : index
      %c0_13 = arith.constant 0 : index
      %13 = vector.load %arg5[%c0_12, %c0_13] : memref<1x128xf32, #tpu.memory_space<vmem>>, vector<1x128xf32>
      %14 = vector.broadcast %13 : vector<1x128xf32> to vector<128x128xf32>
      %15 = arith.mulf %12, %14 : vector<128x128xf32>
      %c0_14 = arith.constant 0 : index
      %c0_15 = arith.constant 0 : index
      %16 = vector.load %arg6[%c0_14, %c0_15] : memref<1x128xf32, #tpu.memory_space<vmem>>, vector<1x128xf32>
      %17 = vector.broadcast %16 : vector<1x128xf32> to vector<128x128xf32>
      %18 = arith.addf %15, %17 : vector<128x128xf32>
      %cst_16 = arith.constant 0.000000e+00 : f32
      %19 = vector.broadcast %cst_16 : f32 to vector<128x128xf32>
      %20 = arith.maximumf %18, %19 : vector<128x128xf32>
      %c0_17 = arith.constant 0 : index
      %c0_18 = arith.constant 0 : index
      %21 = vector.load %arg7[%c0_17, %c0_18] : memref<128x128xf32, #tpu.memory_space<vmem>>, vector<128x128xf32>
      tpu.vector_store %arg7[%c0_17, %c0_18], %20 {strides = array<i32>} : memref<128x128xf32, #tpu.memory_space<vmem>>, vector<128x128xf32>,
    } else {
    }
    return
  }
  func.func @transform_0(%arg0: i32, %arg1: i32, %arg2: i32) -> (i32, i32) {
    %c0_i32 = arith.constant 0 : i32
    return %arg0, %arg2 : i32, i32
  }
  func.func @transform_1(%arg0: i32, %arg1: i32, %arg2: i32) -> (i32, i32) {
    %c0_i32 = arith.constant 0 : i32
    return %arg2, %arg1 : i32, i32
  }
  func.func @transform_2(%arg0: i32, %arg1: i32, %arg2: i32) -> (i32, i32) {
    %c0_i32 = arith.constant 0 : i32
    %c0_i32_0 = arith.constant 0 : i32
    return %c0_i32, %arg1 : i32, i32
  }
  func.func @transform_3(%arg0: i32, %arg1: i32, %arg2: i32) -> (i32, i32) {
    %c0_i32 = arith.constant 0 : i32
    %c0_i32_0 = arith.constant 0 : i32
    return %c0_i32, %arg1 : i32, i32
  }
  func.func @transform_4(%arg0: i32, %arg1: i32, %arg2: i32) -> (i32, i32) {
    %c0_i32 = arith.constant 0 : i32
    return %arg0, %arg1 : i32, i32
  }
}

module attributes {stable_mosaic.version = 11 : i64} {
  func.func @_pool_bn_relu_kernel(%arg0: i32, %arg1: memref<8x2x4x32xf32, #tpu.memory_space<vmem>>, %arg2: memref<1x1x16xf32, #tpu.memory_space<vmem>>, %arg3: memref<1x1x16xf32, #tpu.memory_space<vmem>>, %arg4: memref<8x4x16xf32, #tpu.memory_space<vmem>>) attributes {dimension_semantics = [#tpu.dimension_semantics<parallel>], iteration_bounds = array<i64: 1>, scalar_prefetch = 0 : i64, scratch_operands = 0 : i64, tpu.core_type = #tpu.core_type<tc>, window_params = [{transform_indices = @transform_0, window_bounds = array<i64: 8, 2, 4, 32>}, {pipeline_mode = #tpu.pipeline_mode<synchronous>, transform_indices = @transform_1, window_bounds = array<i64: 1, 1, 16>}, {pipeline_mode = #tpu.pipeline_mode<synchronous>, transform_indices = @transform_2, window_bounds = array<i64: 1, 1, 16>}, {transform_indices = @transform_3, window_bounds = array<i64: 8, 4, 16>}]} {
    %c0 = arith.constant 0 : index
    %c0_0 = arith.constant 0 : index
    %c0_1 = arith.constant 0 : index
    %c0_2 = arith.constant 0 : index
    %0 = vector.load %arg1[%c0, %c0_0, %c0_1, %c0_2] : memref<8x2x4x32xf32, #tpu.memory_space<vmem>>, vector<8x1x4x32xf32>
    %1 = vector.shape_cast %0 : vector<8x1x4x32xf32> to vector<8x4x32xf32>
    %c0_3 = arith.constant 0 : index
    %c1 = arith.constant 1 : index
    %c0_4 = arith.constant 0 : index
    %c0_5 = arith.constant 0 : index
    %2 = vector.load %arg1[%c0_3, %c1, %c0_4, %c0_5] : memref<8x2x4x32xf32, #tpu.memory_space<vmem>>, vector<8x1x4x32xf32>
    %3 = vector.shape_cast %2 : vector<8x1x4x32xf32> to vector<8x4x32xf32>
    %4 = arith.maximumf %1, %3 : vector<8x4x32xf32>
    %5 = vector.extract_strided_slice %4 {offsets = [0, 0, 0], sizes = [8, 4, 16], strides = [1, 1, 1]} : vector<8x4x32xf32> to vector<8x4x16xf32>
    %6 = vector.extract_strided_slice %4 {offsets = [0, 0, 16], sizes = [8, 4, 16], strides = [1, 1, 1]} : vector<8x4x32xf32> to vector<8x4x16xf32>
    %7 = arith.maximumf %5, %6 : vector<8x4x16xf32>
    %c0_6 = arith.constant 0 : index
    %c0_7 = arith.constant 0 : index
    %c0_8 = arith.constant 0 : index
    %8 = vector.load %arg2[%c0_6, %c0_7, %c0_8] : memref<1x1x16xf32, #tpu.memory_space<vmem>>, vector<1x1x16xf32>
    %9 = vector.broadcast %8 : vector<1x1x16xf32> to vector<8x4x16xf32>
    %10 = arith.mulf %7, %9 : vector<8x4x16xf32>
    %c0_9 = arith.constant 0 : index
    %c0_10 = arith.constant 0 : index
    %c0_11 = arith.constant 0 : index
    %11 = vector.load %arg3[%c0_9, %c0_10, %c0_11] : memref<1x1x16xf32, #tpu.memory_space<vmem>>, vector<1x1x16xf32>
    %12 = vector.broadcast %11 : vector<1x1x16xf32> to vector<8x4x16xf32>
    %13 = arith.addf %10, %12 : vector<8x4x16xf32>
    %cst = arith.constant 0.000000e+00 : f32
    %14 = vector.broadcast %cst : f32 to vector<8x4x16xf32>
    %15 = arith.maximumf %13, %14 : vector<8x4x16xf32>
    %c0_12 = arith.constant 0 : index
    %c0_13 = arith.constant 0 : index
    %c0_14 = arith.constant 0 : index
    %16 = vector.load %arg4[%c0_12, %c0_13, %c0_14] : memref<8x4x16xf32, #tpu.memory_space<vmem>>, vector<8x4x16xf32>
    tpu.vector_store %arg4[%c0_12, %c0_13, %c0_14], %15 {strides = array<i32>} : memref<8x4x16xf32, #tpu.memory_space<vmem>>, vector<8x4x16xf32>,
    return
  }
  func.func @transform_0(%arg0: i32) -> (i32, i32, i32, i32) {
    %c0_i32 = arith.constant 0 : i32
    %c0_i32_0 = arith.constant 0 : i32
    %c0_i32_1 = arith.constant 0 : i32
    %c0_i32_2 = arith.constant 0 : i32
    return %arg0, %c0_i32, %c0_i32_0, %c0_i32_1 : i32, i32, i32, i32
  }
  func.func @transform_1(%arg0: i32) -> (i32, i32, i32) {
    %c0_i32 = arith.constant 0 : i32
    %c0_i32_0 = arith.constant 0 : i32
    %c0_i32_1 = arith.constant 0 : i32
    %c0_i32_2 = arith.constant 0 : i32
    return %c0_i32, %c0_i32_0, %c0_i32_1 : i32, i32, i32
  }
  func.func @transform_2(%arg0: i32) -> (i32, i32, i32) {
    %c0_i32 = arith.constant 0 : i32
    %c0_i32_0 = arith.constant 0 : i32
    %c0_i32_1 = arith.constant 0 : i32
    %c0_i32_2 = arith.constant 0 : i32
    return %c0_i32, %c0_i32_0, %c0_i32_1 : i32, i32, i32
  }
  func.func @transform_3(%arg0: i32) -> (i32, i32, i32) {
    %c0_i32 = arith.constant 0 : i32
    %c0_i32_0 = arith.constant 0 : i32
    %c0_i32_1 = arith.constant 0 : i32
    return %arg0, %c0_i32, %c0_i32_0 : i32, i32, i32
  }
}

module attributes {stable_mosaic.version = 11 : i64} {
  func.func @_mm_kernel(%arg0: i32, %arg1: i32, %arg2: i32, %arg3: memref<128x256xbf16, #tpu.memory_space<vmem>>, %arg4: memref<256x128xbf16, #tpu.memory_space<vmem>>, %arg5: memref<1x128xf32, #tpu.memory_space<vmem>>, %arg6: memref<1x128xf32, #tpu.memory_space<vmem>>, %arg7: memref<128x128xf32, #tpu.memory_space<vmem>>, %arg8: memref<128x128xf32, #tpu.memory_space<vmem>>) attributes {dimension_semantics = [#tpu.dimension_semantics<parallel>, #tpu.dimension_semantics<parallel>, #tpu.dimension_semantics<arbitrary>], iteration_bounds = array<i64: 1, 1, 1>, scalar_prefetch = 0 : i64, scratch_operands = 1 : i64, tpu.core_type = #tpu.core_type<tc>, window_params = [{transform_indices = @transform_0, window_bounds = array<i64: 128, 256>}, {transform_indices = @transform_1, window_bounds = array<i64: 256, 128>}, {transform_indices = @transform_2, window_bounds = array<i64: 1, 128>}, {transform_indices = @transform_3, window_bounds = array<i64: 1, 128>}, {transform_indices = @transform_4, window_bounds = array<i64: 128, 128>}]} {
    %c0_i32 = arith.constant 0 : i32
    %0 = arith.cmpi eq, %arg2, %c0_i32 : i32
    %1 = arith.extui %0 : i1 to i32
    %c0_i32_0 = arith.constant 0 : i32
    %2 = arith.cmpi ne, %1, %c0_i32_0 : i32
    scf.if %2 {
      %cst_10 = arith.constant 0.000000e+00 : f32
      %12 = vector.broadcast %cst_10 : f32 to vector<128x128xf32>
      %c0_11 = arith.constant 0 : index
      %c0_12 = arith.constant 0 : index
      %13 = vector.load %arg8[%c0_11, %c0_12] : memref<128x128xf32, #tpu.memory_space<vmem>>, vector<128x128xf32>
      tpu.vector_store %arg8[%c0_11, %c0_12], %12 {strides = array<i32>} : memref<128x128xf32, #tpu.memory_space<vmem>>, vector<128x128xf32>,
    } else {
    }
    %c0 = arith.constant 0 : index
    %c0_1 = arith.constant 0 : index
    %3 = vector.load %arg8[%c0, %c0_1] : memref<128x128xf32, #tpu.memory_space<vmem>>, vector<128x128xf32>
    %c0_2 = arith.constant 0 : index
    %c0_3 = arith.constant 0 : index
    %4 = vector.load %arg3[%c0_2, %c0_3] : memref<128x256xbf16, #tpu.memory_space<vmem>>, vector<128x256xbf16>
    %c0_4 = arith.constant 0 : index
    %c0_5 = arith.constant 0 : index
    %5 = vector.load %arg4[%c0_4, %c0_5] : memref<256x128xbf16, #tpu.memory_space<vmem>>, vector<256x128xbf16>
    %cst = arith.constant dense<0.000000e+00> : vector<128x128xf32>
    %6 = tpu.matmul %4, %5, %cst {dimension_numbers = #tpu.dot_dimension_numbers<[1], [0], [0], [1], [0, 0, 1, 1], [], []>} : vector<128x256xbf16>, vector<256x128xbf16>, vector<128x128xf32> -> vector<128x128xf32>
    %7 = arith.addf %3, %6 : vector<128x128xf32>
    %c0_6 = arith.constant 0 : index
    %c0_7 = arith.constant 0 : index
    %8 = vector.load %arg8[%c0_6, %c0_7] : memref<128x128xf32, #tpu.memory_space<vmem>>, vector<128x128xf32>
    tpu.vector_store %arg8[%c0_6, %c0_7], %7 {strides = array<i32>} : memref<128x128xf32, #tpu.memory_space<vmem>>, vector<128x128xf32>,
    %c0_i32_8 = arith.constant 0 : i32
    %9 = arith.cmpi eq, %arg2, %c0_i32_8 : i32
    %10 = arith.extui %9 : i1 to i32
    %c0_i32_9 = arith.constant 0 : i32
    %11 = arith.cmpi ne, %10, %c0_i32_9 : i32
    scf.if %11 {
      %c0_10 = arith.constant 0 : index
      %c0_11 = arith.constant 0 : index
      %12 = vector.load %arg8[%c0_10, %c0_11] : memref<128x128xf32, #tpu.memory_space<vmem>>, vector<128x128xf32>
      %c0_12 = arith.constant 0 : index
      %c0_13 = arith.constant 0 : index
      %13 = vector.load %arg5[%c0_12, %c0_13] : memref<1x128xf32, #tpu.memory_space<vmem>>, vector<1x128xf32>
      %14 = vector.broadcast %13 : vector<1x128xf32> to vector<128x128xf32>
      %15 = arith.mulf %12, %14 : vector<128x128xf32>
      %c0_14 = arith.constant 0 : index
      %c0_15 = arith.constant 0 : index
      %16 = vector.load %arg6[%c0_14, %c0_15] : memref<1x128xf32, #tpu.memory_space<vmem>>, vector<1x128xf32>
      %17 = vector.broadcast %16 : vector<1x128xf32> to vector<128x128xf32>
      %18 = arith.addf %15, %17 : vector<128x128xf32>
      %cst_16 = arith.constant 0.000000e+00 : f32
      %19 = vector.broadcast %cst_16 : f32 to vector<128x128xf32>
      %20 = arith.maximumf %18, %19 : vector<128x128xf32>
      %c0_17 = arith.constant 0 : index
      %c0_18 = arith.constant 0 : index
      %21 = vector.load %arg7[%c0_17, %c0_18] : memref<128x128xf32, #tpu.memory_space<vmem>>, vector<128x128xf32>
      tpu.vector_store %arg7[%c0_17, %c0_18], %20 {strides = array<i32>} : memref<128x128xf32, #tpu.memory_space<vmem>>, vector<128x128xf32>,
    } else {
    }
    return
  }
  func.func @transform_0(%arg0: i32, %arg1: i32, %arg2: i32) -> (i32, i32) {
    %c0_i32 = arith.constant 0 : i32
    return %arg0, %arg2 : i32, i32
  }
  func.func @transform_1(%arg0: i32, %arg1: i32, %arg2: i32) -> (i32, i32) {
    %c0_i32 = arith.constant 0 : i32
    return %arg2, %arg1 : i32, i32
  }
  func.func @transform_2(%arg0: i32, %arg1: i32, %arg2: i32) -> (i32, i32) {
    %c0_i32 = arith.constant 0 : i32
    %c0_i32_0 = arith.constant 0 : i32
    return %c0_i32, %arg1 : i32, i32
  }
  func.func @transform_3(%arg0: i32, %arg1: i32, %arg2: i32) -> (i32, i32) {
    %c0_i32 = arith.constant 0 : i32
    %c0_i32_0 = arith.constant 0 : i32
    return %c0_i32, %arg1 : i32, i32
  }
  func.func @transform_4(%arg0: i32, %arg1: i32, %arg2: i32) -> (i32, i32) {
    %c0_i32 = arith.constant 0 : i32
    return %arg0, %arg1 : i32, i32
  }
}

module attributes {stable_mosaic.version = 11 : i64} {
  func.func @_mm_res_kernel(%arg0: i32, %arg1: i32, %arg2: i32, %arg3: memref<128x256xbf16, #tpu.memory_space<vmem>>, %arg4: memref<256x128xbf16, #tpu.memory_space<vmem>>, %arg5: memref<1x128xf32, #tpu.memory_space<vmem>>, %arg6: memref<1x128xf32, #tpu.memory_space<vmem>>, %arg7: memref<128x128xf32, #tpu.memory_space<vmem>>, %arg8: memref<128x128xf32, #tpu.memory_space<vmem>>, %arg9: memref<128x128xf32, #tpu.memory_space<vmem>>) attributes {dimension_semantics = [#tpu.dimension_semantics<parallel>, #tpu.dimension_semantics<parallel>, #tpu.dimension_semantics<arbitrary>], iteration_bounds = array<i64: 1, 1, 1>, scalar_prefetch = 0 : i64, scratch_operands = 1 : i64, tpu.core_type = #tpu.core_type<tc>, window_params = [{transform_indices = @transform_0, window_bounds = array<i64: 128, 256>}, {transform_indices = @transform_1, window_bounds = array<i64: 256, 128>}, {transform_indices = @transform_2, window_bounds = array<i64: 1, 128>}, {transform_indices = @transform_3, window_bounds = array<i64: 1, 128>}, {transform_indices = @transform_4, window_bounds = array<i64: 128, 128>}, {transform_indices = @transform_5, window_bounds = array<i64: 128, 128>}]} {
    %c0_i32 = arith.constant 0 : i32
    %0 = arith.cmpi eq, %arg2, %c0_i32 : i32
    %1 = arith.extui %0 : i1 to i32
    %c0_i32_0 = arith.constant 0 : i32
    %2 = arith.cmpi ne, %1, %c0_i32_0 : i32
    scf.if %2 {
      %cst_10 = arith.constant 0.000000e+00 : f32
      %12 = vector.broadcast %cst_10 : f32 to vector<128x128xf32>
      %c0_11 = arith.constant 0 : index
      %c0_12 = arith.constant 0 : index
      %13 = vector.load %arg9[%c0_11, %c0_12] : memref<128x128xf32, #tpu.memory_space<vmem>>, vector<128x128xf32>
      tpu.vector_store %arg9[%c0_11, %c0_12], %12 {strides = array<i32>} : memref<128x128xf32, #tpu.memory_space<vmem>>, vector<128x128xf32>,
    } else {
    }
    %c0 = arith.constant 0 : index
    %c0_1 = arith.constant 0 : index
    %3 = vector.load %arg9[%c0, %c0_1] : memref<128x128xf32, #tpu.memory_space<vmem>>, vector<128x128xf32>
    %c0_2 = arith.constant 0 : index
    %c0_3 = arith.constant 0 : index
    %4 = vector.load %arg3[%c0_2, %c0_3] : memref<128x256xbf16, #tpu.memory_space<vmem>>, vector<128x256xbf16>
    %c0_4 = arith.constant 0 : index
    %c0_5 = arith.constant 0 : index
    %5 = vector.load %arg4[%c0_4, %c0_5] : memref<256x128xbf16, #tpu.memory_space<vmem>>, vector<256x128xbf16>
    %cst = arith.constant dense<0.000000e+00> : vector<128x128xf32>
    %6 = tpu.matmul %4, %5, %cst {dimension_numbers = #tpu.dot_dimension_numbers<[1], [0], [0], [1], [0, 0, 1, 1], [], []>} : vector<128x256xbf16>, vector<256x128xbf16>, vector<128x128xf32> -> vector<128x128xf32>
    %7 = arith.addf %3, %6 : vector<128x128xf32>
    %c0_6 = arith.constant 0 : index
    %c0_7 = arith.constant 0 : index
    %8 = vector.load %arg9[%c0_6, %c0_7] : memref<128x128xf32, #tpu.memory_space<vmem>>, vector<128x128xf32>
    tpu.vector_store %arg9[%c0_6, %c0_7], %7 {strides = array<i32>} : memref<128x128xf32, #tpu.memory_space<vmem>>, vector<128x128xf32>,
    %c0_i32_8 = arith.constant 0 : i32
    %9 = arith.cmpi eq, %arg2, %c0_i32_8 : i32
    %10 = arith.extui %9 : i1 to i32
    %c0_i32_9 = arith.constant 0 : i32
    %11 = arith.cmpi ne, %10, %c0_i32_9 : i32
    scf.if %11 {
      %c0_10 = arith.constant 0 : index
      %c0_11 = arith.constant 0 : index
      %12 = vector.load %arg9[%c0_10, %c0_11] : memref<128x128xf32, #tpu.memory_space<vmem>>, vector<128x128xf32>
      %c0_12 = arith.constant 0 : index
      %c0_13 = arith.constant 0 : index
      %13 = vector.load %arg5[%c0_12, %c0_13] : memref<1x128xf32, #tpu.memory_space<vmem>>, vector<1x128xf32>
      %14 = vector.broadcast %13 : vector<1x128xf32> to vector<128x128xf32>
      %15 = arith.mulf %12, %14 : vector<128x128xf32>
      %c0_14 = arith.constant 0 : index
      %c0_15 = arith.constant 0 : index
      %16 = vector.load %arg6[%c0_14, %c0_15] : memref<1x128xf32, #tpu.memory_space<vmem>>, vector<1x128xf32>
      %17 = vector.broadcast %16 : vector<1x128xf32> to vector<128x128xf32>
      %18 = arith.addf %15, %17 : vector<128x128xf32>
      %c0_16 = arith.constant 0 : index
      %c0_17 = arith.constant 0 : index
      %19 = vector.load %arg7[%c0_16, %c0_17] : memref<128x128xf32, #tpu.memory_space<vmem>>, vector<128x128xf32>
      %20 = arith.addf %18, %19 : vector<128x128xf32>
      %cst_18 = arith.constant 0.000000e+00 : f32
      %21 = vector.broadcast %cst_18 : f32 to vector<128x128xf32>
      %22 = arith.maximumf %20, %21 : vector<128x128xf32>
      %c0_19 = arith.constant 0 : index
      %c0_20 = arith.constant 0 : index
      %23 = vector.load %arg8[%c0_19, %c0_20] : memref<128x128xf32, #tpu.memory_space<vmem>>, vector<128x128xf32>
      tpu.vector_store %arg8[%c0_19, %c0_20], %22 {strides = array<i32>} : memref<128x128xf32, #tpu.memory_space<vmem>>, vector<128x128xf32>,
    } else {
    }
    return
  }
  func.func @transform_0(%arg0: i32, %arg1: i32, %arg2: i32) -> (i32, i32) {
    %c0_i32 = arith.constant 0 : i32
    return %arg0, %arg2 : i32, i32
  }
  func.func @transform_1(%arg0: i32, %arg1: i32, %arg2: i32) -> (i32, i32) {
    %c0_i32 = arith.constant 0 : i32
    return %arg2, %arg1 : i32, i32
  }
  func.func @transform_2(%arg0: i32, %arg1: i32, %arg2: i32) -> (i32, i32) {
    %c0_i32 = arith.constant 0 : i32
    %c0_i32_0 = arith.constant 0 : i32
    return %c0_i32, %arg1 : i32, i32
  }
  func.func @transform_3(%arg0: i32, %arg1: i32, %arg2: i32) -> (i32, i32) {
    %c0_i32 = arith.constant 0 : i32
    %c0_i32_0 = arith.constant 0 : i32
    return %c0_i32, %arg1 : i32, i32
  }
  func.func @transform_4(%arg0: i32, %arg1: i32, %arg2: i32) -> (i32, i32) {
    %c0_i32 = arith.constant 0 : i32
    return %arg0, %arg1 : i32, i32
  }
  func.func @transform_5(%arg0: i32, %arg1: i32, %arg2: i32) -> (i32, i32) {
    %c0_i32 = arith.constant 0 : i32
    return %arg0, %arg1 : i32, i32
  }
}

module attributes {stable_mosaic.version = 11 : i64} {
  func.func @_pool_bn_relu_kernel(%arg0: i32, %arg1: memref<4x2x2x128xf32, #tpu.memory_space<vmem>>, %arg2: memref<1x1x64xf32, #tpu.memory_space<vmem>>, %arg3: memref<1x1x64xf32, #tpu.memory_space<vmem>>, %arg4: memref<4x2x64xf32, #tpu.memory_space<vmem>>) attributes {dimension_semantics = [#tpu.dimension_semantics<parallel>], iteration_bounds = array<i64: 1>, scalar_prefetch = 0 : i64, scratch_operands = 0 : i64, tpu.core_type = #tpu.core_type<tc>, window_params = [{transform_indices = @transform_0, window_bounds = array<i64: 4, 2, 2, 128>}, {pipeline_mode = #tpu.pipeline_mode<synchronous>, transform_indices = @transform_1, window_bounds = array<i64: 1, 1, 64>}, {pipeline_mode = #tpu.pipeline_mode<synchronous>, transform_indices = @transform_2, window_bounds = array<i64: 1, 1, 64>}, {transform_indices = @transform_3, window_bounds = array<i64: 4, 2, 64>}]} {
    %c0 = arith.constant 0 : index
    %c0_0 = arith.constant 0 : index
    %c0_1 = arith.constant 0 : index
    %c0_2 = arith.constant 0 : index
    %0 = vector.load %arg1[%c0, %c0_0, %c0_1, %c0_2] : memref<4x2x2x128xf32, #tpu.memory_space<vmem>>, vector<4x1x2x128xf32>
    %1 = vector.shape_cast %0 : vector<4x1x2x128xf32> to vector<4x2x128xf32>
    %c0_3 = arith.constant 0 : index
    %c1 = arith.constant 1 : index
    %c0_4 = arith.constant 0 : index
    %c0_5 = arith.constant 0 : index
    %2 = vector.load %arg1[%c0_3, %c1, %c0_4, %c0_5] : memref<4x2x2x128xf32, #tpu.memory_space<vmem>>, vector<4x1x2x128xf32>
    %3 = vector.shape_cast %2 : vector<4x1x2x128xf32> to vector<4x2x128xf32>
    %4 = arith.maximumf %1, %3 : vector<4x2x128xf32>
    %5 = vector.extract_strided_slice %4 {offsets = [0, 0, 0], sizes = [4, 2, 64], strides = [1, 1, 1]} : vector<4x2x128xf32> to vector<4x2x64xf32>
    %6 = vector.extract_strided_slice %4 {offsets = [0, 0, 64], sizes = [4, 2, 64], strides = [1, 1, 1]} : vector<4x2x128xf32> to vector<4x2x64xf32>
    %7 = arith.maximumf %5, %6 : vector<4x2x64xf32>
    %c0_6 = arith.constant 0 : index
    %c0_7 = arith.constant 0 : index
    %c0_8 = arith.constant 0 : index
    %8 = vector.load %arg2[%c0_6, %c0_7, %c0_8] : memref<1x1x64xf32, #tpu.memory_space<vmem>>, vector<1x1x64xf32>
    %9 = vector.broadcast %8 : vector<1x1x64xf32> to vector<4x2x64xf32>
    %10 = arith.mulf %7, %9 : vector<4x2x64xf32>
    %c0_9 = arith.constant 0 : index
    %c0_10 = arith.constant 0 : index
    %c0_11 = arith.constant 0 : index
    %11 = vector.load %arg3[%c0_9, %c0_10, %c0_11] : memref<1x1x64xf32, #tpu.memory_space<vmem>>, vector<1x1x64xf32>
    %12 = vector.broadcast %11 : vector<1x1x64xf32> to vector<4x2x64xf32>
    %13 = arith.addf %10, %12 : vector<4x2x64xf32>
    %cst = arith.constant 0.000000e+00 : f32
    %14 = vector.broadcast %cst : f32 to vector<4x2x64xf32>
    %15 = arith.maximumf %13, %14 : vector<4x2x64xf32>
    %c0_12 = arith.constant 0 : index
    %c0_13 = arith.constant 0 : index
    %c0_14 = arith.constant 0 : index
    %16 = vector.load %arg4[%c0_12, %c0_13, %c0_14] : memref<4x2x64xf32, #tpu.memory_space<vmem>>, vector<4x2x64xf32>
    tpu.vector_store %arg4[%c0_12, %c0_13, %c0_14], %15 {strides = array<i32>} : memref<4x2x64xf32, #tpu.memory_space<vmem>>, vector<4x2x64xf32>,
    return
  }
  func.func @transform_0(%arg0: i32) -> (i32, i32, i32, i32) {
    %c0_i32 = arith.constant 0 : i32
    %c0_i32_0 = arith.constant 0 : i32
    %c0_i32_1 = arith.constant 0 : i32
    %c0_i32_2 = arith.constant 0 : i32
    return %arg0, %c0_i32, %c0_i32_0, %c0_i32_1 : i32, i32, i32, i32
  }
  func.func @transform_1(%arg0: i32) -> (i32, i32, i32) {
    %c0_i32 = arith.constant 0 : i32
    %c0_i32_0 = arith.constant 0 : i32
    %c0_i32_1 = arith.constant 0 : i32
    %c0_i32_2 = arith.constant 0 : i32
    return %c0_i32, %c0_i32_0, %c0_i32_1 : i32, i32, i32
  }
  func.func @transform_2(%arg0: i32) -> (i32, i32, i32) {
    %c0_i32 = arith.constant 0 : i32
    %c0_i32_0 = arith.constant 0 : i32
    %c0_i32_1 = arith.constant 0 : i32
    %c0_i32_2 = arith.constant 0 : i32
    return %c0_i32, %c0_i32_0, %c0_i32_1 : i32, i32, i32
  }
  func.func @transform_3(%arg0: i32) -> (i32, i32, i32) {
    %c0_i32 = arith.constant 0 : i32
    %c0_i32_0 = arith.constant 0 : i32
    %c0_i32_1 = arith.constant 0 : i32
    return %arg0, %c0_i32, %c0_i32_0 : i32, i32, i32
  }
}

module attributes {stable_mosaic.version = 11 : i64} {
  func.func @_mm_kernel(%arg0: i32, %arg1: i32, %arg2: i32, %arg3: memref<128x128xbf16, #tpu.memory_space<vmem>>, %arg4: memref<128x128xbf16, #tpu.memory_space<vmem>>, %arg5: memref<1x128xf32, #tpu.memory_space<vmem>>, %arg6: memref<1x128xf32, #tpu.memory_space<vmem>>, %arg7: memref<128x128xf32, #tpu.memory_space<vmem>>, %arg8: memref<128x128xf32, #tpu.memory_space<vmem>>) attributes {dimension_semantics = [#tpu.dimension_semantics<parallel>, #tpu.dimension_semantics<parallel>, #tpu.dimension_semantics<arbitrary>], iteration_bounds = array<i64: 1, 1, 5>, scalar_prefetch = 0 : i64, scratch_operands = 1 : i64, tpu.core_type = #tpu.core_type<tc>, window_params = [{transform_indices = @transform_0, window_bounds = array<i64: 128, 128>}, {transform_indices = @transform_1, window_bounds = array<i64: 128, 128>}, {transform_indices = @transform_2, window_bounds = array<i64: 1, 128>}, {transform_indices = @transform_3, window_bounds = array<i64: 1, 128>}, {transform_indices = @transform_4, window_bounds = array<i64: 128, 128>}]} {
    %c0_i32 = arith.constant 0 : i32
    %0 = arith.cmpi eq, %arg2, %c0_i32 : i32
    %1 = arith.extui %0 : i1 to i32
    %c0_i32_0 = arith.constant 0 : i32
    %2 = arith.cmpi ne, %1, %c0_i32_0 : i32
    scf.if %2 {
      %cst_9 = arith.constant 0.000000e+00 : f32
      %12 = vector.broadcast %cst_9 : f32 to vector<128x128xf32>
      %c0_10 = arith.constant 0 : index
      %c0_11 = arith.constant 0 : index
      %13 = vector.load %arg8[%c0_10, %c0_11] : memref<128x128xf32, #tpu.memory_space<vmem>>, vector<128x128xf32>
      tpu.vector_store %arg8[%c0_10, %c0_11], %12 {strides = array<i32>} : memref<128x128xf32, #tpu.memory_space<vmem>>, vector<128x128xf32>,
    } else {
    }
    %c0 = arith.constant 0 : index
    %c0_1 = arith.constant 0 : index
    %3 = vector.load %arg8[%c0, %c0_1] : memref<128x128xf32, #tpu.memory_space<vmem>>, vector<128x128xf32>
    %c0_2 = arith.constant 0 : index
    %c0_3 = arith.constant 0 : index
    %4 = vector.load %arg3[%c0_2, %c0_3] : memref<128x128xbf16, #tpu.memory_space<vmem>>, vector<128x128xbf16>
    %c0_4 = arith.constant 0 : index
    %c0_5 = arith.constant 0 : index
    %5 = vector.load %arg4[%c0_4, %c0_5] : memref<128x128xbf16, #tpu.memory_space<vmem>>, vector<128x128xbf16>
    %cst = arith.constant dense<0.000000e+00> : vector<128x128xf32>
    %6 = tpu.matmul %4, %5, %cst {dimension_numbers = #tpu.dot_dimension_numbers<[1], [0], [0], [1], [0, 0, 1, 1], [], []>} : vector<128x128xbf16>, vector<128x128xbf16>, vector<128x128xf32> -> vector<128x128xf32>
    %7 = arith.addf %3, %6 : vector<128x128xf32>
    %c0_6 = arith.constant 0 : index
    %c0_7 = arith.constant 0 : index
    %8 = vector.load %arg8[%c0_6, %c0_7] : memref<128x128xf32, #tpu.memory_space<vmem>>, vector<128x128xf32>
    tpu.vector_store %arg8[%c0_6, %c0_7], %7 {strides = array<i32>} : memref<128x128xf32, #tpu.memory_space<vmem>>, vector<128x128xf32>,
    %c4_i32 = arith.constant 4 : i32
    %9 = arith.cmpi eq, %arg2, %c4_i32 : i32
    %10 = arith.extui %9 : i1 to i32
    %c0_i32_8 = arith.constant 0 : i32
    %11 = arith.cmpi ne, %10, %c0_i32_8 : i32
    scf.if %11 {
      %c0_9 = arith.constant 0 : index
      %c0_10 = arith.constant 0 : index
      %12 = vector.load %arg8[%c0_9, %c0_10] : memref<128x128xf32, #tpu.memory_space<vmem>>, vector<128x128xf32>
      %c0_11 = arith.constant 0 : index
      %c0_12 = arith.constant 0 : index
      %13 = vector.load %arg5[%c0_11, %c0_12] : memref<1x128xf32, #tpu.memory_space<vmem>>, vector<1x128xf32>
      %14 = vector.broadcast %13 : vector<1x128xf32> to vector<128x128xf32>
      %15 = arith.mulf %12, %14 : vector<128x128xf32>
      %c0_13 = arith.constant 0 : index
      %c0_14 = arith.constant 0 : index
      %16 = vector.load %arg6[%c0_13, %c0_14] : memref<1x128xf32, #tpu.memory_space<vmem>>, vector<1x128xf32>
      %17 = vector.broadcast %16 : vector<1x128xf32> to vector<128x128xf32>
      %18 = arith.addf %15, %17 : vector<128x128xf32>
      %cst_15 = arith.constant 0.000000e+00 : f32
      %19 = vector.broadcast %cst_15 : f32 to vector<128x128xf32>
      %20 = arith.maximumf %18, %19 : vector<128x128xf32>
      %c0_16 = arith.constant 0 : index
      %c0_17 = arith.constant 0 : index
      %21 = vector.load %arg7[%c0_16, %c0_17] : memref<128x128xf32, #tpu.memory_space<vmem>>, vector<128x128xf32>
      tpu.vector_store %arg7[%c0_16, %c0_17], %20 {strides = array<i32>} : memref<128x128xf32, #tpu.memory_space<vmem>>, vector<128x128xf32>,
    } else {
    }
    return
  }
  func.func @transform_0(%arg0: i32, %arg1: i32, %arg2: i32) -> (i32, i32) {
    %c0_i32 = arith.constant 0 : i32
    return %arg0, %arg2 : i32, i32
  }
  func.func @transform_1(%arg0: i32, %arg1: i32, %arg2: i32) -> (i32, i32) {
    %c0_i32 = arith.constant 0 : i32
    return %arg2, %arg1 : i32, i32
  }
  func.func @transform_2(%arg0: i32, %arg1: i32, %arg2: i32) -> (i32, i32) {
    %c0_i32 = arith.constant 0 : i32
    %c0_i32_0 = arith.constant 0 : i32
    return %c0_i32, %arg1 : i32, i32
  }
  func.func @transform_3(%arg0: i32, %arg1: i32, %arg2: i32) -> (i32, i32) {
    %c0_i32 = arith.constant 0 : i32
    %c0_i32_0 = arith.constant 0 : i32
    return %c0_i32, %arg1 : i32, i32
  }
  func.func @transform_4(%arg0: i32, %arg1: i32, %arg2: i32) -> (i32, i32) {
    %c0_i32 = arith.constant 0 : i32
    return %arg0, %arg1 : i32, i32
  }
}

module attributes {stable_mosaic.version = 11 : i64} {
  func.func @_mm_kernel(%arg0: i32, %arg1: i32, %arg2: i32, %arg3: memref<128x128xbf16, #tpu.memory_space<vmem>>, %arg4: memref<128x128xbf16, #tpu.memory_space<vmem>>, %arg5: memref<1x128xf32, #tpu.memory_space<vmem>>, %arg6: memref<1x128xf32, #tpu.memory_space<vmem>>, %arg7: memref<128x128xf32, #tpu.memory_space<vmem>>, %arg8: memref<128x128xf32, #tpu.memory_space<vmem>>) attributes {dimension_semantics = [#tpu.dimension_semantics<parallel>, #tpu.dimension_semantics<parallel>, #tpu.dimension_semantics<arbitrary>], iteration_bounds = array<i64: 1, 1, 3>, scalar_prefetch = 0 : i64, scratch_operands = 1 : i64, tpu.core_type = #tpu.core_type<tc>, window_params = [{transform_indices = @transform_0, window_bounds = array<i64: 128, 128>}, {transform_indices = @transform_1, window_bounds = array<i64: 128, 128>}, {transform_indices = @transform_2, window_bounds = array<i64: 1, 128>}, {transform_indices = @transform_3, window_bounds = array<i64: 1, 128>}, {transform_indices = @transform_4, window_bounds = array<i64: 128, 128>}]} {
    %c0_i32 = arith.constant 0 : i32
    %0 = arith.cmpi eq, %arg2, %c0_i32 : i32
    %1 = arith.extui %0 : i1 to i32
    %c0_i32_0 = arith.constant 0 : i32
    %2 = arith.cmpi ne, %1, %c0_i32_0 : i32
    scf.if %2 {
      %cst_9 = arith.constant 0.000000e+00 : f32
      %12 = vector.broadcast %cst_9 : f32 to vector<128x128xf32>
      %c0_10 = arith.constant 0 : index
      %c0_11 = arith.constant 0 : index
      %13 = vector.load %arg8[%c0_10, %c0_11] : memref<128x128xf32, #tpu.memory_space<vmem>>, vector<128x128xf32>
      tpu.vector_store %arg8[%c0_10, %c0_11], %12 {strides = array<i32>} : memref<128x128xf32, #tpu.memory_space<vmem>>, vector<128x128xf32>,
    } else {
    }
    %c0 = arith.constant 0 : index
    %c0_1 = arith.constant 0 : index
    %3 = vector.load %arg8[%c0, %c0_1] : memref<128x128xf32, #tpu.memory_space<vmem>>, vector<128x128xf32>
    %c0_2 = arith.constant 0 : index
    %c0_3 = arith.constant 0 : index
    %4 = vector.load %arg3[%c0_2, %c0_3] : memref<128x128xbf16, #tpu.memory_space<vmem>>, vector<128x128xbf16>
    %c0_4 = arith.constant 0 : index
    %c0_5 = arith.constant 0 : index
    %5 = vector.load %arg4[%c0_4, %c0_5] : memref<128x128xbf16, #tpu.memory_space<vmem>>, vector<128x128xbf16>
    %cst = arith.constant dense<0.000000e+00> : vector<128x128xf32>
    %6 = tpu.matmul %4, %5, %cst {dimension_numbers = #tpu.dot_dimension_numbers<[1], [0], [0], [1], [0, 0, 1, 1], [], []>} : vector<128x128xbf16>, vector<128x128xbf16>, vector<128x128xf32> -> vector<128x128xf32>
    %7 = arith.addf %3, %6 : vector<128x128xf32>
    %c0_6 = arith.constant 0 : index
    %c0_7 = arith.constant 0 : index
    %8 = vector.load %arg8[%c0_6, %c0_7] : memref<128x128xf32, #tpu.memory_space<vmem>>, vector<128x128xf32>
    tpu.vector_store %arg8[%c0_6, %c0_7], %7 {strides = array<i32>} : memref<128x128xf32, #tpu.memory_space<vmem>>, vector<128x128xf32>,
    %c2_i32 = arith.constant 2 : i32
    %9 = arith.cmpi eq, %arg2, %c2_i32 : i32
    %10 = arith.extui %9 : i1 to i32
    %c0_i32_8 = arith.constant 0 : i32
    %11 = arith.cmpi ne, %10, %c0_i32_8 : i32
    scf.if %11 {
      %c0_9 = arith.constant 0 : index
      %c0_10 = arith.constant 0 : index
      %12 = vector.load %arg8[%c0_9, %c0_10] : memref<128x128xf32, #tpu.memory_space<vmem>>, vector<128x128xf32>
      %c0_11 = arith.constant 0 : index
      %c0_12 = arith.constant 0 : index
      %13 = vector.load %arg5[%c0_11, %c0_12] : memref<1x128xf32, #tpu.memory_space<vmem>>, vector<1x128xf32>
      %14 = vector.broadcast %13 : vector<1x128xf32> to vector<128x128xf32>
      %15 = arith.mulf %12, %14 : vector<128x128xf32>
      %c0_13 = arith.constant 0 : index
      %c0_14 = arith.constant 0 : index
      %16 = vector.load %arg6[%c0_13, %c0_14] : memref<1x128xf32, #tpu.memory_space<vmem>>, vector<1x128xf32>
      %17 = vector.broadcast %16 : vector<1x128xf32> to vector<128x128xf32>
      %18 = arith.addf %15, %17 : vector<128x128xf32>
      %cst_15 = arith.constant 0.000000e+00 : f32
      %19 = vector.broadcast %cst_15 : f32 to vector<128x128xf32>
      %20 = arith.maximumf %18, %19 : vector<128x128xf32>
      %c0_16 = arith.constant 0 : index
      %c0_17 = arith.constant 0 : index
      %21 = vector.load %arg7[%c0_16, %c0_17] : memref<128x128xf32, #tpu.memory_space<vmem>>, vector<128x128xf32>
      tpu.vector_store %arg7[%c0_16, %c0_17], %20 {strides = array<i32>} : memref<128x128xf32, #tpu.memory_space<vmem>>, vector<128x128xf32>,
    } else {
    }
    return
  }
  func.func @transform_0(%arg0: i32, %arg1: i32, %arg2: i32) -> (i32, i32) {
    %c0_i32 = arith.constant 0 : i32
    return %arg0, %arg2 : i32, i32
  }
  func.func @transform_1(%arg0: i32, %arg1: i32, %arg2: i32) -> (i32, i32) {
    %c0_i32 = arith.constant 0 : i32
    return %arg2, %arg1 : i32, i32
  }
  func.func @transform_2(%arg0: i32, %arg1: i32, %arg2: i32) -> (i32, i32) {
    %c0_i32 = arith.constant 0 : i32
    %c0_i32_0 = arith.constant 0 : i32
    return %c0_i32, %arg1 : i32, i32
  }
  func.func @transform_3(%arg0: i32, %arg1: i32, %arg2: i32) -> (i32, i32) {
    %c0_i32 = arith.constant 0 : i32
    %c0_i32_0 = arith.constant 0 : i32
    return %c0_i32, %arg1 : i32, i32
  }
  func.func @transform_4(%arg0: i32, %arg1: i32, %arg2: i32) -> (i32, i32) {
    %c0_i32 = arith.constant 0 : i32
    return %arg0, %arg1 : i32, i32
  }
}

module attributes {stable_mosaic.version = 11 : i64} {
  func.func @_mm_res_kernel(%arg0: i32, %arg1: i32, %arg2: i32, %arg3: memref<128x128xbf16, #tpu.memory_space<vmem>>, %arg4: memref<128x128xbf16, #tpu.memory_space<vmem>>, %arg5: memref<1x128xf32, #tpu.memory_space<vmem>>, %arg6: memref<1x128xf32, #tpu.memory_space<vmem>>, %arg7: memref<128x128xf32, #tpu.memory_space<vmem>>, %arg8: memref<128x128xf32, #tpu.memory_space<vmem>>, %arg9: memref<128x128xf32, #tpu.memory_space<vmem>>) attributes {dimension_semantics = [#tpu.dimension_semantics<parallel>, #tpu.dimension_semantics<parallel>, #tpu.dimension_semantics<arbitrary>], iteration_bounds = array<i64: 1, 1, 3>, scalar_prefetch = 0 : i64, scratch_operands = 1 : i64, tpu.core_type = #tpu.core_type<tc>, window_params = [{transform_indices = @transform_0, window_bounds = array<i64: 128, 128>}, {transform_indices = @transform_1, window_bounds = array<i64: 128, 128>}, {transform_indices = @transform_2, window_bounds = array<i64: 1, 128>}, {transform_indices = @transform_3, window_bounds = array<i64: 1, 128>}, {transform_indices = @transform_4, window_bounds = array<i64: 128, 128>}, {transform_indices = @transform_5, window_bounds = array<i64: 128, 128>}]} {
    %c0_i32 = arith.constant 0 : i32
    %0 = arith.cmpi eq, %arg2, %c0_i32 : i32
    %1 = arith.extui %0 : i1 to i32
    %c0_i32_0 = arith.constant 0 : i32
    %2 = arith.cmpi ne, %1, %c0_i32_0 : i32
    scf.if %2 {
      %cst_9 = arith.constant 0.000000e+00 : f32
      %12 = vector.broadcast %cst_9 : f32 to vector<128x128xf32>
      %c0_10 = arith.constant 0 : index
      %c0_11 = arith.constant 0 : index
      %13 = vector.load %arg9[%c0_10, %c0_11] : memref<128x128xf32, #tpu.memory_space<vmem>>, vector<128x128xf32>
      tpu.vector_store %arg9[%c0_10, %c0_11], %12 {strides = array<i32>} : memref<128x128xf32, #tpu.memory_space<vmem>>, vector<128x128xf32>,
    } else {
    }
    %c0 = arith.constant 0 : index
    %c0_1 = arith.constant 0 : index
    %3 = vector.load %arg9[%c0, %c0_1] : memref<128x128xf32, #tpu.memory_space<vmem>>, vector<128x128xf32>
    %c0_2 = arith.constant 0 : index
    %c0_3 = arith.constant 0 : index
    %4 = vector.load %arg3[%c0_2, %c0_3] : memref<128x128xbf16, #tpu.memory_space<vmem>>, vector<128x128xbf16>
    %c0_4 = arith.constant 0 : index
    %c0_5 = arith.constant 0 : index
    %5 = vector.load %arg4[%c0_4, %c0_5] : memref<128x128xbf16, #tpu.memory_space<vmem>>, vector<128x128xbf16>
    %cst = arith.constant dense<0.000000e+00> : vector<128x128xf32>
    %6 = tpu.matmul %4, %5, %cst {dimension_numbers = #tpu.dot_dimension_numbers<[1], [0], [0], [1], [0, 0, 1, 1], [], []>} : vector<128x128xbf16>, vector<128x128xbf16>, vector<128x128xf32> -> vector<128x128xf32>
    %7 = arith.addf %3, %6 : vector<128x128xf32>
    %c0_6 = arith.constant 0 : index
    %c0_7 = arith.constant 0 : index
    %8 = vector.load %arg9[%c0_6, %c0_7] : memref<128x128xf32, #tpu.memory_space<vmem>>, vector<128x128xf32>
    tpu.vector_store %arg9[%c0_6, %c0_7], %7 {strides = array<i32>} : memref<128x128xf32, #tpu.memory_space<vmem>>, vector<128x128xf32>,
    %c2_i32 = arith.constant 2 : i32
    %9 = arith.cmpi eq, %arg2, %c2_i32 : i32
    %10 = arith.extui %9 : i1 to i32
    %c0_i32_8 = arith.constant 0 : i32
    %11 = arith.cmpi ne, %10, %c0_i32_8 : i32
    scf.if %11 {
      %c0_9 = arith.constant 0 : index
      %c0_10 = arith.constant 0 : index
      %12 = vector.load %arg9[%c0_9, %c0_10] : memref<128x128xf32, #tpu.memory_space<vmem>>, vector<128x128xf32>
      %c0_11 = arith.constant 0 : index
      %c0_12 = arith.constant 0 : index
      %13 = vector.load %arg5[%c0_11, %c0_12] : memref<1x128xf32, #tpu.memory_space<vmem>>, vector<1x128xf32>
      %14 = vector.broadcast %13 : vector<1x128xf32> to vector<128x128xf32>
      %15 = arith.mulf %12, %14 : vector<128x128xf32>
      %c0_13 = arith.constant 0 : index
      %c0_14 = arith.constant 0 : index
      %16 = vector.load %arg6[%c0_13, %c0_14] : memref<1x128xf32, #tpu.memory_space<vmem>>, vector<1x128xf32>
      %17 = vector.broadcast %16 : vector<1x128xf32> to vector<128x128xf32>
      %18 = arith.addf %15, %17 : vector<128x128xf32>
      %c0_15 = arith.constant 0 : index
      %c0_16 = arith.constant 0 : index
      %19 = vector.load %arg7[%c0_15, %c0_16] : memref<128x128xf32, #tpu.memory_space<vmem>>, vector<128x128xf32>
      %20 = arith.addf %18, %19 : vector<128x128xf32>
      %cst_17 = arith.constant 0.000000e+00 : f32
      %21 = vector.broadcast %cst_17 : f32 to vector<128x128xf32>
      %22 = arith.maximumf %20, %21 : vector<128x128xf32>
      %c0_18 = arith.constant 0 : index
      %c0_19 = arith.constant 0 : index
      %23 = vector.load %arg8[%c0_18, %c0_19] : memref<128x128xf32, #tpu.memory_space<vmem>>, vector<128x128xf32>
      tpu.vector_store %arg8[%c0_18, %c0_19], %22 {strides = array<i32>} : memref<128x128xf32, #tpu.memory_space<vmem>>, vector<128x128xf32>,
    } else {
    }
    return
  }
  func.func @transform_0(%arg0: i32, %arg1: i32, %arg2: i32) -> (i32, i32) {
    %c0_i32 = arith.constant 0 : i32
    return %arg0, %arg2 : i32, i32
  }
  func.func @transform_1(%arg0: i32, %arg1: i32, %arg2: i32) -> (i32, i32) {
    %c0_i32 = arith.constant 0 : i32
    return %arg2, %arg1 : i32, i32
  }
  func.func @transform_2(%arg0: i32, %arg1: i32, %arg2: i32) -> (i32, i32) {
    %c0_i32 = arith.constant 0 : i32
    %c0_i32_0 = arith.constant 0 : i32
    return %c0_i32, %arg1 : i32, i32
  }
  func.func @transform_3(%arg0: i32, %arg1: i32, %arg2: i32) -> (i32, i32) {
    %c0_i32 = arith.constant 0 : i32
    %c0_i32_0 = arith.constant 0 : i32
    return %c0_i32, %arg1 : i32, i32
  }
  func.func @transform_4(%arg0: i32, %arg1: i32, %arg2: i32) -> (i32, i32) {
    %c0_i32 = arith.constant 0 : i32
    return %arg0, %arg1 : i32, i32
  }
  func.func @transform_5(%arg0: i32, %arg1: i32, %arg2: i32) -> (i32, i32) {
    %c0_i32 = arith.constant 0 : i32
    return %arg0, %arg1 : i32, i32
  }
}

module attributes {stable_mosaic.version = 11 : i64} {
  func.func @_mm_kernel(%arg0: i32, %arg1: i32, %arg2: i32, %arg3: memref<128x512xbf16, #tpu.memory_space<vmem>>, %arg4: memref<512x128xbf16, #tpu.memory_space<vmem>>, %arg5: memref<1x128xf32, #tpu.memory_space<vmem>>, %arg6: memref<1x128xf32, #tpu.memory_space<vmem>>, %arg7: memref<128x128xf32, #tpu.memory_space<vmem>>, %arg8: memref<128x128xf32, #tpu.memory_space<vmem>>) attributes {dimension_semantics = [#tpu.dimension_semantics<parallel>, #tpu.dimension_semantics<parallel>, #tpu.dimension_semantics<arbitrary>], iteration_bounds = array<i64: 1, 2, 1>, scalar_prefetch = 0 : i64, scratch_operands = 1 : i64, tpu.core_type = #tpu.core_type<tc>, window_params = [{transform_indices = @transform_0, window_bounds = array<i64: 128, 512>}, {transform_indices = @transform_1, window_bounds = array<i64: 512, 128>}, {transform_indices = @transform_2, window_bounds = array<i64: 1, 128>}, {transform_indices = @transform_3, window_bounds = array<i64: 1, 128>}, {transform_indices = @transform_4, window_bounds = array<i64: 128, 128>}]} {
    %c0_i32 = arith.constant 0 : i32
    %0 = arith.cmpi eq, %arg2, %c0_i32 : i32
    %1 = arith.extui %0 : i1 to i32
    %c0_i32_0 = arith.constant 0 : i32
    %2 = arith.cmpi ne, %1, %c0_i32_0 : i32
    scf.if %2 {
      %cst_10 = arith.constant 0.000000e+00 : f32
      %12 = vector.broadcast %cst_10 : f32 to vector<128x128xf32>
      %c0_11 = arith.constant 0 : index
      %c0_12 = arith.constant 0 : index
      %13 = vector.load %arg8[%c0_11, %c0_12] : memref<128x128xf32, #tpu.memory_space<vmem>>, vector<128x128xf32>
      tpu.vector_store %arg8[%c0_11, %c0_12], %12 {strides = array<i32>} : memref<128x128xf32, #tpu.memory_space<vmem>>, vector<128x128xf32>,
    } else {
    }
    %c0 = arith.constant 0 : index
    %c0_1 = arith.constant 0 : index
    %3 = vector.load %arg8[%c0, %c0_1] : memref<128x128xf32, #tpu.memory_space<vmem>>, vector<128x128xf32>
    %c0_2 = arith.constant 0 : index
    %c0_3 = arith.constant 0 : index
    %4 = vector.load %arg3[%c0_2, %c0_3] : memref<128x512xbf16, #tpu.memory_space<vmem>>, vector<128x512xbf16>
    %c0_4 = arith.constant 0 : index
    %c0_5 = arith.constant 0 : index
    %5 = vector.load %arg4[%c0_4, %c0_5] : memref<512x128xbf16, #tpu.memory_space<vmem>>, vector<512x128xbf16>
    %cst = arith.constant dense<0.000000e+00> : vector<128x128xf32>
    %6 = tpu.matmul %4, %5, %cst {dimension_numbers = #tpu.dot_dimension_numbers<[1], [0], [0], [1], [0, 0, 1, 1], [], []>} : vector<128x512xbf16>, vector<512x128xbf16>, vector<128x128xf32> -> vector<128x128xf32>
    %7 = arith.addf %3, %6 : vector<128x128xf32>
    %c0_6 = arith.constant 0 : index
    %c0_7 = arith.constant 0 : index
    %8 = vector.load %arg8[%c0_6, %c0_7] : memref<128x128xf32, #tpu.memory_space<vmem>>, vector<128x128xf32>
    tpu.vector_store %arg8[%c0_6, %c0_7], %7 {strides = array<i32>} : memref<128x128xf32, #tpu.memory_space<vmem>>, vector<128x128xf32>,
    %c0_i32_8 = arith.constant 0 : i32
    %9 = arith.cmpi eq, %arg2, %c0_i32_8 : i32
    %10 = arith.extui %9 : i1 to i32
    %c0_i32_9 = arith.constant 0 : i32
    %11 = arith.cmpi ne, %10, %c0_i32_9 : i32
    scf.if %11 {
      %c0_10 = arith.constant 0 : index
      %c0_11 = arith.constant 0 : index
      %12 = vector.load %arg8[%c0_10, %c0_11] : memref<128x128xf32, #tpu.memory_space<vmem>>, vector<128x128xf32>
      %c0_12 = arith.constant 0 : index
      %c0_13 = arith.constant 0 : index
      %13 = vector.load %arg5[%c0_12, %c0_13] : memref<1x128xf32, #tpu.memory_space<vmem>>, vector<1x128xf32>
      %14 = vector.broadcast %13 : vector<1x128xf32> to vector<128x128xf32>
      %15 = arith.mulf %12, %14 : vector<128x128xf32>
      %c0_14 = arith.constant 0 : index
      %c0_15 = arith.constant 0 : index
      %16 = vector.load %arg6[%c0_14, %c0_15] : memref<1x128xf32, #tpu.memory_space<vmem>>, vector<1x128xf32>
      %17 = vector.broadcast %16 : vector<1x128xf32> to vector<128x128xf32>
      %18 = arith.addf %15, %17 : vector<128x128xf32>
      %cst_16 = arith.constant 0.000000e+00 : f32
      %19 = vector.broadcast %cst_16 : f32 to vector<128x128xf32>
      %20 = arith.maximumf %18, %19 : vector<128x128xf32>
      %c0_17 = arith.constant 0 : index
      %c0_18 = arith.constant 0 : index
      %21 = vector.load %arg7[%c0_17, %c0_18] : memref<128x128xf32, #tpu.memory_space<vmem>>, vector<128x128xf32>
      tpu.vector_store %arg7[%c0_17, %c0_18], %20 {strides = array<i32>} : memref<128x128xf32, #tpu.memory_space<vmem>>, vector<128x128xf32>,
    } else {
    }
    return
  }
  func.func @transform_0(%arg0: i32, %arg1: i32, %arg2: i32) -> (i32, i32) {
    %c0_i32 = arith.constant 0 : i32
    return %arg0, %arg2 : i32, i32
  }
  func.func @transform_1(%arg0: i32, %arg1: i32, %arg2: i32) -> (i32, i32) {
    %c0_i32 = arith.constant 0 : i32
    return %arg2, %arg1 : i32, i32
  }
  func.func @transform_2(%arg0: i32, %arg1: i32, %arg2: i32) -> (i32, i32) {
    %c0_i32 = arith.constant 0 : i32
    %c0_i32_0 = arith.constant 0 : i32
    return %c0_i32, %arg1 : i32, i32
  }
  func.func @transform_3(%arg0: i32, %arg1: i32, %arg2: i32) -> (i32, i32) {
    %c0_i32 = arith.constant 0 : i32
    %c0_i32_0 = arith.constant 0 : i32
    return %c0_i32, %arg1 : i32, i32
  }
  func.func @transform_4(%arg0: i32, %arg1: i32, %arg2: i32) -> (i32, i32) {
    %c0_i32 = arith.constant 0 : i32
    return %arg0, %arg1 : i32, i32
  }
}

module attributes {stable_mosaic.version = 11 : i64} {
  func.func @_mm_res_kernel(%arg0: i32, %arg1: i32, %arg2: i32, %arg3: memref<128x128xbf16, #tpu.memory_space<vmem>>, %arg4: memref<128x128xbf16, #tpu.memory_space<vmem>>, %arg5: memref<1x128xf32, #tpu.memory_space<vmem>>, %arg6: memref<1x128xf32, #tpu.memory_space<vmem>>, %arg7: memref<128x128xf32, #tpu.memory_space<vmem>>, %arg8: memref<128x128xf32, #tpu.memory_space<vmem>>, %arg9: memref<128x128xf32, #tpu.memory_space<vmem>>) attributes {dimension_semantics = [#tpu.dimension_semantics<parallel>, #tpu.dimension_semantics<parallel>, #tpu.dimension_semantics<arbitrary>], iteration_bounds = array<i64: 1, 1, 1>, scalar_prefetch = 0 : i64, scratch_operands = 1 : i64, tpu.core_type = #tpu.core_type<tc>, window_params = [{transform_indices = @transform_0, window_bounds = array<i64: 128, 128>}, {transform_indices = @transform_1, window_bounds = array<i64: 128, 128>}, {transform_indices = @transform_2, window_bounds = array<i64: 1, 128>}, {transform_indices = @transform_3, window_bounds = array<i64: 1, 128>}, {transform_indices = @transform_4, window_bounds = array<i64: 128, 128>}, {transform_indices = @transform_5, window_bounds = array<i64: 128, 128>}]} {
    %c0_i32 = arith.constant 0 : i32
    %0 = arith.cmpi eq, %arg2, %c0_i32 : i32
    %1 = arith.extui %0 : i1 to i32
    %c0_i32_0 = arith.constant 0 : i32
    %2 = arith.cmpi ne, %1, %c0_i32_0 : i32
    scf.if %2 {
      %cst_10 = arith.constant 0.000000e+00 : f32
      %12 = vector.broadcast %cst_10 : f32 to vector<128x128xf32>
      %c0_11 = arith.constant 0 : index
      %c0_12 = arith.constant 0 : index
      %13 = vector.load %arg9[%c0_11, %c0_12] : memref<128x128xf32, #tpu.memory_space<vmem>>, vector<128x128xf32>
      tpu.vector_store %arg9[%c0_11, %c0_12], %12 {strides = array<i32>} : memref<128x128xf32, #tpu.memory_space<vmem>>, vector<128x128xf32>,
    } else {
    }
    %c0 = arith.constant 0 : index
    %c0_1 = arith.constant 0 : index
    %3 = vector.load %arg9[%c0, %c0_1] : memref<128x128xf32, #tpu.memory_space<vmem>>, vector<128x128xf32>
    %c0_2 = arith.constant 0 : index
    %c0_3 = arith.constant 0 : index
    %4 = vector.load %arg3[%c0_2, %c0_3] : memref<128x128xbf16, #tpu.memory_space<vmem>>, vector<128x128xbf16>
    %c0_4 = arith.constant 0 : index
    %c0_5 = arith.constant 0 : index
    %5 = vector.load %arg4[%c0_4, %c0_5] : memref<128x128xbf16, #tpu.memory_space<vmem>>, vector<128x128xbf16>
    %cst = arith.constant dense<0.000000e+00> : vector<128x128xf32>
    %6 = tpu.matmul %4, %5, %cst {dimension_numbers = #tpu.dot_dimension_numbers<[1], [0], [0], [1], [0, 0, 1, 1], [], []>} : vector<128x128xbf16>, vector<128x128xbf16>, vector<128x128xf32> -> vector<128x128xf32>
    %7 = arith.addf %3, %6 : vector<128x128xf32>
    %c0_6 = arith.constant 0 : index
    %c0_7 = arith.constant 0 : index
    %8 = vector.load %arg9[%c0_6, %c0_7] : memref<128x128xf32, #tpu.memory_space<vmem>>, vector<128x128xf32>
    tpu.vector_store %arg9[%c0_6, %c0_7], %7 {strides = array<i32>} : memref<128x128xf32, #tpu.memory_space<vmem>>, vector<128x128xf32>,
    %c0_i32_8 = arith.constant 0 : i32
    %9 = arith.cmpi eq, %arg2, %c0_i32_8 : i32
    %10 = arith.extui %9 : i1 to i32
    %c0_i32_9 = arith.constant 0 : i32
    %11 = arith.cmpi ne, %10, %c0_i32_9 : i32
    scf.if %11 {
      %c0_10 = arith.constant 0 : index
      %c0_11 = arith.constant 0 : index
      %12 = vector.load %arg9[%c0_10, %c0_11] : memref<128x128xf32, #tpu.memory_space<vmem>>, vector<128x128xf32>
      %c0_12 = arith.constant 0 : index
      %c0_13 = arith.constant 0 : index
      %13 = vector.load %arg5[%c0_12, %c0_13] : memref<1x128xf32, #tpu.memory_space<vmem>>, vector<1x128xf32>
      %14 = vector.broadcast %13 : vector<1x128xf32> to vector<128x128xf32>
      %15 = arith.mulf %12, %14 : vector<128x128xf32>
      %c0_14 = arith.constant 0 : index
      %c0_15 = arith.constant 0 : index
      %16 = vector.load %arg6[%c0_14, %c0_15] : memref<1x128xf32, #tpu.memory_space<vmem>>, vector<1x128xf32>
      %17 = vector.broadcast %16 : vector<1x128xf32> to vector<128x128xf32>
      %18 = arith.addf %15, %17 : vector<128x128xf32>
      %c0_16 = arith.constant 0 : index
      %c0_17 = arith.constant 0 : index
      %19 = vector.load %arg7[%c0_16, %c0_17] : memref<128x128xf32, #tpu.memory_space<vmem>>, vector<128x128xf32>
      %20 = arith.addf %18, %19 : vector<128x128xf32>
      %cst_18 = arith.constant 0.000000e+00 : f32
      %21 = vector.broadcast %cst_18 : f32 to vector<128x128xf32>
      %22 = arith.maximumf %20, %21 : vector<128x128xf32>
      %c0_19 = arith.constant 0 : index
      %c0_20 = arith.constant 0 : index
      %23 = vector.load %arg8[%c0_19, %c0_20] : memref<128x128xf32, #tpu.memory_space<vmem>>, vector<128x128xf32>
      tpu.vector_store %arg8[%c0_19, %c0_20], %22 {strides = array<i32>} : memref<128x128xf32, #tpu.memory_space<vmem>>, vector<128x128xf32>,
    } else {
    }
    return
  }
  func.func @transform_0(%arg0: i32, %arg1: i32, %arg2: i32) -> (i32, i32) {
    %c0_i32 = arith.constant 0 : i32
    return %arg0, %arg2 : i32, i32
  }
  func.func @transform_1(%arg0: i32, %arg1: i32, %arg2: i32) -> (i32, i32) {
    %c0_i32 = arith.constant 0 : i32
    return %arg2, %arg1 : i32, i32
  }
  func.func @transform_2(%arg0: i32, %arg1: i32, %arg2: i32) -> (i32, i32) {
    %c0_i32 = arith.constant 0 : i32
    %c0_i32_0 = arith.constant 0 : i32
    return %c0_i32, %arg1 : i32, i32
  }
  func.func @transform_3(%arg0: i32, %arg1: i32, %arg2: i32) -> (i32, i32) {
    %c0_i32 = arith.constant 0 : i32
    %c0_i32_0 = arith.constant 0 : i32
    return %c0_i32, %arg1 : i32, i32
  }
  func.func @transform_4(%arg0: i32, %arg1: i32, %arg2: i32) -> (i32, i32) {
    %c0_i32 = arith.constant 0 : i32
    return %arg0, %arg1 : i32, i32
  }
  func.func @transform_5(%arg0: i32, %arg1: i32, %arg2: i32) -> (i32, i32) {
    %c0_i32 = arith.constant 0 : i32
    return %arg0, %arg1 : i32, i32
  }
}

module attributes {stable_mosaic.version = 11 : i64} {
  func.func @_mm_kernel(%arg0: i32, %arg1: i32, %arg2: i32, %arg3: memref<128x128xbf16, #tpu.memory_space<vmem>>, %arg4: memref<128x128xbf16, #tpu.memory_space<vmem>>, %arg5: memref<1x128xf32, #tpu.memory_space<vmem>>, %arg6: memref<1x128xf32, #tpu.memory_space<vmem>>, %arg7: memref<128x128xf32, #tpu.memory_space<vmem>>, %arg8: memref<128x128xf32, #tpu.memory_space<vmem>>) attributes {dimension_semantics = [#tpu.dimension_semantics<parallel>, #tpu.dimension_semantics<parallel>, #tpu.dimension_semantics<arbitrary>], iteration_bounds = array<i64: 1, 1, 1>, scalar_prefetch = 0 : i64, scratch_operands = 1 : i64, tpu.core_type = #tpu.core_type<tc>, window_params = [{transform_indices = @transform_0, window_bounds = array<i64: 128, 128>}, {transform_indices = @transform_1, window_bounds = array<i64: 128, 128>}, {transform_indices = @transform_2, window_bounds = array<i64: 1, 128>}, {transform_indices = @transform_3, window_bounds = array<i64: 1, 128>}, {transform_indices = @transform_4, window_bounds = array<i64: 128, 128>}]} {
    %c0_i32 = arith.constant 0 : i32
    %0 = arith.cmpi eq, %arg2, %c0_i32 : i32
    %1 = arith.extui %0 : i1 to i32
    %c0_i32_0 = arith.constant 0 : i32
    %2 = arith.cmpi ne, %1, %c0_i32_0 : i32
    scf.if %2 {
      %cst_10 = arith.constant 0.000000e+00 : f32
      %12 = vector.broadcast %cst_10 : f32 to vector<128x128xf32>
      %c0_11 = arith.constant 0 : index
      %c0_12 = arith.constant 0 : index
      %13 = vector.load %arg8[%c0_11, %c0_12] : memref<128x128xf32, #tpu.memory_space<vmem>>, vector<128x128xf32>
      tpu.vector_store %arg8[%c0_11, %c0_12], %12 {strides = array<i32>} : memref<128x128xf32, #tpu.memory_space<vmem>>, vector<128x128xf32>,
    } else {
    }
    %c0 = arith.constant 0 : index
    %c0_1 = arith.constant 0 : index
    %3 = vector.load %arg8[%c0, %c0_1] : memref<128x128xf32, #tpu.memory_space<vmem>>, vector<128x128xf32>
    %c0_2 = arith.constant 0 : index
    %c0_3 = arith.constant 0 : index
    %4 = vector.load %arg3[%c0_2, %c0_3] : memref<128x128xbf16, #tpu.memory_space<vmem>>, vector<128x128xbf16>
    %c0_4 = arith.constant 0 : index
    %c0_5 = arith.constant 0 : index
    %5 = vector.load %arg4[%c0_4, %c0_5] : memref<128x128xbf16, #tpu.memory_space<vmem>>, vector<128x128xbf16>
    %cst = arith.constant dense<0.000000e+00> : vector<128x128xf32>
    %6 = tpu.matmul %4, %5, %cst {dimension_numbers = #tpu.dot_dimension_numbers<[1], [0], [0], [1], [0, 0, 1, 1], [], []>} : vector<128x128xbf16>, vector<128x128xbf16>, vector<128x128xf32> -> vector<128x128xf32>
    %7 = arith.addf %3, %6 : vector<128x128xf32>
    %c0_6 = arith.constant 0 : index
    %c0_7 = arith.constant 0 : index
    %8 = vector.load %arg8[%c0_6, %c0_7] : memref<128x128xf32, #tpu.memory_space<vmem>>, vector<128x128xf32>
    tpu.vector_store %arg8[%c0_6, %c0_7], %7 {strides = array<i32>} : memref<128x128xf32, #tpu.memory_space<vmem>>, vector<128x128xf32>,
    %c0_i32_8 = arith.constant 0 : i32
    %9 = arith.cmpi eq, %arg2, %c0_i32_8 : i32
    %10 = arith.extui %9 : i1 to i32
    %c0_i32_9 = arith.constant 0 : i32
    %11 = arith.cmpi ne, %10, %c0_i32_9 : i32
    scf.if %11 {
      %c0_10 = arith.constant 0 : index
      %c0_11 = arith.constant 0 : index
      %12 = vector.load %arg8[%c0_10, %c0_11] : memref<128x128xf32, #tpu.memory_space<vmem>>, vector<128x128xf32>
      %c0_12 = arith.constant 0 : index
      %c0_13 = arith.constant 0 : index
      %13 = vector.load %arg5[%c0_12, %c0_13] : memref<1x128xf32, #tpu.memory_space<vmem>>, vector<1x128xf32>
      %14 = vector.broadcast %13 : vector<1x128xf32> to vector<128x128xf32>
      %15 = arith.mulf %12, %14 : vector<128x128xf32>
      %c0_14 = arith.constant 0 : index
      %c0_15 = arith.constant 0 : index
      %16 = vector.load %arg6[%c0_14, %c0_15] : memref<1x128xf32, #tpu.memory_space<vmem>>, vector<1x128xf32>
      %17 = vector.broadcast %16 : vector<1x128xf32> to vector<128x128xf32>
      %18 = arith.addf %15, %17 : vector<128x128xf32>
      %c0_16 = arith.constant 0 : index
      %c0_17 = arith.constant 0 : index
      %19 = vector.load %arg7[%c0_16, %c0_17] : memref<128x128xf32, #tpu.memory_space<vmem>>, vector<128x128xf32>
      tpu.vector_store %arg7[%c0_16, %c0_17], %18 {strides = array<i32>} : memref<128x128xf32, #tpu.memory_space<vmem>>, vector<128x128xf32>,
    } else {
    }
    return
  }
  func.func @transform_0(%arg0: i32, %arg1: i32, %arg2: i32) -> (i32, i32) {
    %c0_i32 = arith.constant 0 : i32
    return %arg0, %arg2 : i32, i32
  }
  func.func @transform_1(%arg0: i32, %arg1: i32, %arg2: i32) -> (i32, i32) {
    %c0_i32 = arith.constant 0 : i32
    return %arg2, %arg1 : i32, i32
  }
  func.func @transform_2(%arg0: i32, %arg1: i32, %arg2: i32) -> (i32, i32) {
    %c0_i32 = arith.constant 0 : i32
    %c0_i32_0 = arith.constant 0 : i32
    return %c0_i32, %arg1 : i32, i32
  }
  func.func @transform_3(%arg0: i32, %arg1: i32, %arg2: i32) -> (i32, i32) {
    %c0_i32 = arith.constant 0 : i32
    %c0_i32_0 = arith.constant 0 : i32
    return %c0_i32, %arg1 : i32, i32
  }
  func.func @transform_4(%arg0: i32, %arg1: i32, %arg2: i32) -> (i32, i32) {
    %c0_i32 = arith.constant 0 : i32
    return %arg0, %arg1 : i32, i32
  }
}

</mosaic_0001>

<bundles_post_ra>
// kernel: erfnet_forward.78
= control target key start
LH: loop header
LB: loop body
LE: loop exit
PB: predicated region body
PF: predicated region fallthrough
CT: control target
= control target key end

     0   :  { %s245_s28 = smov 125   ;;  %vm205_vm0 = vcmask 23552   ;;  %s548_s0 = inlined_call_operand.vmem [shape: f32[16,2,8,6], index: 0, kind: input, shape index: {}]   ;;  %s549_s1 = inlined_call_operand.vmem [shape: f32[1,1,3], index: 1, kind: input, shape index: {}]   ;;  %s550_s2 = inlined_call_operand.vmem [shape: f32[1,1,3], index: 2, kind: input, shape index: {}]   ;;  %s551_s3 = inlined_call_operand.vmem [shape: f32[16,8,3], index: 3, kind: output, shape index: {}]  }
   0x1   :  { %v16_v0 = vld [vmem:[%s548_s0 + $0x20] sm:$0xff]  ;;  %v228_v1 = vld [vmem:[%s548_s0 + $0x28] sm:$0xff]  ;;  %v17_v5 = vld [vmem:[%s548_s0 + $0x30] sm:$0xff] }
   0x2   :  { %v14_v2 = vld [vmem:[%s548_s0] sm:$0xff]  ;;  %v275_v3 = vmax.f32 %v16_v0, %v228_v1  ;;  %v226_v4 = vld [vmem:[%s548_s0 + $0x8] sm:$0xff]  ;;  %v229_v6 = vld [vmem:[%s548_s0 + $0x38] sm:$0xff] }
   0x3   :  { %v286_v7 = vmax.f32 %v14_v2, %v226_v4  ;;  %v15_v8 = vld [vmem:[%s548_s0 + $0x10] sm:$0xff]  ;;  %v227_v9 = vld [vmem:[%s548_s0 + $0x18] sm:$0xff]  ;;  %v296_v10 = vmax.f32 %v17_v5, %v229_v6  ;;  %v18_v14 = vld [vmem:[%s548_s0 + $0x40] sm:$0xff] }
   0x4   :  { %83 = vrot.lane.b32.xlu1 %v275_v3, %s245_s28  ;;  %v300_v11 = vmax.f32 %v15_v8, %v227_v9  ;;  %v19_v12 = vld [vmem:[%s548_s0 + $0x50] sm:$0xff]  ;;  %v231_v13 = vld [vmem:[%s548_s0 + $0x58] sm:$0xff]  ;;  %v230_v15 = vld [vmem:[%s548_s0 + $0x48] sm:$0xff] }
   0x5   :  { %79 = vrot.lane.b32.xlu0 %v286_v7, %s245_s28  ;;  %v316_v16 = vmax.f32 %v19_v12, %v231_v13  ;;  %v320_v17 = vmax.f32 %v18_v14, %v230_v15  ;;  %v21_v18 = vld [vmem:[%s548_s0 + $0x70] sm:$0xff]  ;;  %v233_v19 = vld [vmem:[%s548_s0 + $0x78] sm:$0xff]  ;;  %v20_v20 = vld [vmem:[%s548_s0 + $0x60] sm:$0xff] }
   0x6   :  { %v232_v21 = vld [vmem:[%s548_s0 + $0x68] sm:$0xff]  ;;  %v336_v22 = vmax.f32 %v21_v18, %v233_v19  ;;  %v23_v24 = vld [vmem:[%s548_s0 + $0x90] sm:$0xff]  ;;  %v235_v25 = vld [vmem:[%s548_s0 + $0x98] sm:$0xff] }
   0x7   :  { %v340_v23 = vmax.f32 %v20_v20, %v232_v21  ;;  %v22_v26 = vld [vmem:[%s548_s0 + $0x80] sm:$0xff]  ;;  %v234_v27 = vld [vmem:[%s548_s0 + $0x88] sm:$0xff]  ;;  %v356_v28 = vmax.f32 %v23_v24, %v235_v25  ;;  %v25_v30 = vld [vmem:[%s548_s0 + $0xb0] sm:$0xff] }
   0x8   :  { %85 = vrot.lane.b32.xlu1 %v296_v10, %s245_s28  ;;  %v360_v29 = vmax.f32 %v22_v26, %v234_v27  ;;  %v237_v31 = vld [vmem:[%s548_s0 + $0xb8] sm:$0xff]  ;;  %v24_v32 = vld [vmem:[%s548_s0 + $0xa0] sm:$0xff]  ;;  %v236_v33 = vld [vmem:[%s548_s0 + $0xa8] sm:$0xff] }
   0x9   :  { %81 = vrot.lane.b32.xlu0 %v300_v11, %s245_s28  ;;  %v376_v34 = vmax.f32 %v25_v30, %v237_v31  ;;  %v380_v35 = vmax.f32 %v24_v32, %v236_v33  ;;  %v27_v36 = vld [vmem:[%s548_s0 + $0xd0] sm:$0xff]  ;;  %v239_v37 = vld [vmem:[%s548_s0 + $0xd8] sm:$0xff]  ;;  %v26_v38 = vld [vmem:[%s548_s0 + $0xc0] sm:$0xff] }
   0xa   :  { %v238_v39 = vld [vmem:[%s548_s0 + $0xc8] sm:$0xff]  ;;  %v396_v40 = vmax.f32 %v27_v36, %v239_v37  ;;  %v29_v42 = vld [vmem:[%s548_s0 + $0xf0] sm:$0xff]  ;;  %v241_v43 = vld [vmem:[%s548_s0 + $0xf8] sm:$0xff] }
   0xb   :  { %v400_v41 = vmax.f32 %v26_v38, %v238_v39  ;;  %v28_v44 = vld [vmem:[%s548_s0 + $0xe0] sm:$0xff]  ;;  %v240_v45 = vld [vmem:[%s548_s0 + $0xe8] sm:$0xff]  ;;  %v416_v46 = vmax.f32 %v29_v42, %v241_v43 }
   0xc   :  { %89 = vrot.lane.b32.xlu1 %v316_v16, %s245_s28  ;;  %v420_v47 = vmax.f32 %v28_v44, %v240_v45  ;;  %v429_v48 = vld [vmem:[%s549_s1] ss:$0 sm:$0xff] }
   0xd   :  { %87 = vrot.lane.b32.xlu0 %v320_v17, %s245_s28  ;;  %v435_v52 = vld [vmem:[%s550_s2] ss:$0 sm:$0xff] }
  0x10   :  { %93 = vrot.lane.b32.xlu1 %v336_v22, %s245_s28 }
  0x11   :  { %91 = vrot.lane.b32.xlu0 %v340_v23, %s245_s28 }
  0x14   :  { %97 = vrot.lane.b32.xlu1 %v356_v28, %s245_s28 }
  0x15   :  { %95 = vrot.lane.b32.xlu0 %v360_v29, %s245_s28 }
  0x18   :  { %101 = vrot.lane.b32.xlu1 %v376_v34, %s245_s28 }
  0x19   :  { %99 = vrot.lane.b32.xlu0 %v380_v35, %s245_s28 }
  0x1c   :  { %105 = vrot.lane.b32.xlu1 %v396_v40, %s245_s28 }
  0x1d   :  { %103 = vrot.lane.b32.xlu0 %v400_v41, %s245_s28 }
  0x20   :  { %109 = vrot.lane.b32.xlu1 %v416_v46, %s245_s28 }
  0x21   :  { %107 = vrot.lane.b32.xlu0 %v420_v47, %s245_s28 }
  0x76   :  { %v84_v49 = vpop.permute.xlu1 %83 }
  0x77   :  { %v129_v50 = vmax.f32 %v275_v3, %v84_v49  ;;  %v80_v51 = vpop.permute.xlu0 %79 }
  0x78   :  { %v127_v53 = vmax.f32 %v286_v7, %v80_v51 }
  0x79   :  { %v152_v54 = vmul.f32 %v429_v48, %v129_v50 }
  0x7a   :  { %v150_v55 = vmul.f32 %v429_v48, %v127_v53  ;;  %v86_v56 = vpop.permute.xlu1 %85 }
  0x7b   :  { %v175_v57 = vadd.f32 %v435_v52, %v152_v54  ;;  %v130_v58 = vmax.f32 %v296_v10, %v86_v56  ;;  %v82_v59 = vpop.permute.xlu0 %81 }
  0x7c   :  { %v173_v60 = vadd.f32 %v435_v52, %v150_v55  ;;  %v128_v61 = vmax.f32 %v300_v11, %v82_v59 }
  0x7d   :  { %v191_v62 = vmax.f32 %v175_v57, 0.0  ;;  %v153_v63 = vmul.f32 %v429_v48, %v130_v58 }
  0x7e   :  { %v189_v0 = vmax.f32 %v173_v60, 0.0  ;;  %v151_v1 = vmul.f32 %v429_v48, %v128_v61  ;;  %v90_v2 = vpop.permute.xlu1 %89 }
  0x7f   :  { %208 = vst.msk [vmem:[%s551_s3 + $0x10] sm:$0xff] %vm205_vm0, %v191_v62  ;;  %v176_v3 = vadd.f32 %v435_v52, %v153_v63  ;;  %v132_v4 = vmax.f32 %v316_v16, %v90_v2  ;;  %v88_v5 = vpop.permute.xlu0 %87 }
  0x80   :  { %206 = vst.msk [vmem:[%s551_s3] sm:$0xff] %vm205_vm0, %v189_v0  ;;  %v174_v6 = vadd.f32 %v435_v52, %v151_v1  ;;  %v131_v7 = vmax.f32 %v320_v17, %v88_v5 }
  0x81   :  { %v192_v8 = vmax.f32 %v176_v3, 0.0  ;;  %v155_v9 = vmul.f32 %v429_v48, %v132_v4 }
  0x82   :  { %v190_v10 = vmax.f32 %v174_v6, 0.0  ;;  %v154_v11 = vmul.f32 %v429_v48, %v131_v7  ;;  %v94_v12 = vpop.permute.xlu1 %93 }
  0x83   :  { %209 = vst.msk [vmem:[%s551_s3 + $0x18] sm:$0xff] %vm205_vm0, %v192_v8  ;;  %v178_v13 = vadd.f32 %v435_v52, %v155_v9  ;;  %v134_v14 = vmax.f32 %v336_v22, %v94_v12  ;;  %v92_v15 = vpop.permute.xlu0 %91 }
  0x84   :  { %207 = vst.msk [vmem:[%s551_s3 + $0x8] sm:$0xff] %vm205_vm0, %v190_v10  ;;  %v177_v16 = vadd.f32 %v435_v52, %v154_v11  ;;  %v133_v17 = vmax.f32 %v340_v23, %v92_v15 }
  0x85   :  { %v194_v18 = vmax.f32 %v178_v13, 0.0  ;;  %v157_v19 = vmul.f32 %v429_v48, %v134_v14 }
  0x86   :  { %v193_v20 = vmax.f32 %v177_v16, 0.0  ;;  %v156_v21 = vmul.f32 %v429_v48, %v133_v17  ;;  %v98_v24 = vpop.permute.xlu1 %97 }
  0x87   :  { %211 = vst.msk [vmem:[%s551_s3 + $0x28] sm:$0xff] %vm205_vm0, %v194_v18  ;;  %v180_v22 = vadd.f32 %v435_v52, %v157_v19  ;;  %v136_v25 = vmax.f32 %v356_v28, %v98_v24  ;;  %v96_v26 = vpop.permute.xlu0 %95 }
  0x88   :  { %210 = vst.msk [vmem:[%s551_s3 + $0x20] sm:$0xff] %vm205_vm0, %v193_v20  ;;  %v179_v23 = vadd.f32 %v435_v52, %v156_v21  ;;  %v135_v27 = vmax.f32 %v360_v29, %v96_v26 }
  0x89   :  { %v196_v30 = vmax.f32 %v180_v22, 0.0  ;;  %v159_v31 = vmul.f32 %v429_v48, %v136_v25 }
  0x8a   :  { %v195_v32 = vmax.f32 %v179_v23, 0.0  ;;  %v158_v33 = vmul.f32 %v429_v48, %v135_v27  ;;  %v102_v36 = vpop.permute.xlu1 %101 }
  0x8b   :  { %213 = vst.msk [vmem:[%s551_s3 + $0x38] sm:$0xff] %vm205_vm0, %v196_v30  ;;  %v182_v28 = vadd.f32 %v435_v52, %v159_v31  ;;  %v138_v37 = vmax.f32 %v376_v34, %v102_v36  ;;  %v100_v38 = vpop.permute.xlu0 %99 }
  0x8c   :  { %212 = vst.msk [vmem:[%s551_s3 + $0x30] sm:$0xff] %vm205_vm0, %v195_v32  ;;  %v181_v29 = vadd.f32 %v435_v52, %v158_v33  ;;  %v137_v39 = vmax.f32 %v380_v35, %v100_v38 }
  0x8d   :  { %v198_v42 = vmax.f32 %v182_v28, 0.0  ;;  %v161_v43 = vmul.f32 %v429_v48, %v138_v37 }
  0x8e   :  { %v197_v44 = vmax.f32 %v181_v29, 0.0  ;;  %v160_v45 = vmul.f32 %v429_v48, %v137_v39  ;;  %v106_v49 = vpop.permute.xlu1 %105 }
  0x8f   :  { %215 = vst.msk [vmem:[%s551_s3 + $0x48] sm:$0xff] %vm205_vm0, %v198_v42  ;;  %v184_v34 = vadd.f32 %v435_v52, %v161_v43  ;;  %v140_v50 = vmax.f32 %v396_v40, %v106_v49  ;;  %v104_v51 = vpop.permute.xlu0 %103 }
  0x90   :  { %214 = vst.msk [vmem:[%s551_s3 + $0x40] sm:$0xff] %vm205_vm0, %v197_v44  ;;  %v183_v35 = vadd.f32 %v435_v52, %v160_v45  ;;  %v139_v53 = vmax.f32 %v400_v41, %v104_v51 }
  0x91   :  { %v200_v54 = vmax.f32 %v184_v34, 0.0  ;;  %v163_v55 = vmul.f32 %v429_v48, %v140_v50 }
  0x92   :  { %v199_v56 = vmax.f32 %v183_v35, 0.0  ;;  %v162_v57 = vmul.f32 %v429_v48, %v139_v53  ;;  %v110_v58 = vpop.permute.xlu1 %109 }
  0x93   :  { %217 = vst.msk [vmem:[%s551_s3 + $0x58] sm:$0xff] %vm205_vm0, %v200_v54  ;;  %v186_v40 = vadd.f32 %v435_v52, %v163_v55  ;;  %v142_v59 = vmax.f32 %v416_v46, %v110_v58  ;;  %v108_v60 = vpop.permute.xlu0 %107 }
  0x94   :  { %216 = vst.msk [vmem:[%s551_s3 + $0x50] sm:$0xff] %vm205_vm0, %v199_v56  ;;  %v185_v41 = vadd.f32 %v435_v52, %v162_v57  ;;  %v141_v61 = vmax.f32 %v420_v47, %v108_v60 }
  0x95   :  { %v202_v62 = vmax.f32 %v186_v40, 0.0  ;;  %v165_v63 = vmul.f32 %v429_v48, %v142_v59 }
  0x96   :  { %v201_v0 = vmax.f32 %v185_v41, 0.0  ;;  %v164_v1 = vmul.f32 %v429_v48, %v141_v61 }
  0x97   :  { %219 = vst.msk [vmem:[%s551_s3 + $0x68] sm:$0xff] %vm205_vm0, %v202_v62  ;;  %v188_v46 = vadd.f32 %v435_v52, %v165_v63 }
  0x98   :  { %218 = vst.msk [vmem:[%s551_s3 + $0x60] sm:$0xff] %vm205_vm0, %v201_v0  ;;  %v187_v47 = vadd.f32 %v435_v52, %v164_v1 }
  0x99   :  { %v204_v2 = vmax.f32 %v188_v46, 0.0 }
  0x9a   :  { %v203_v3 = vmax.f32 %v187_v47, 0.0 }
  0x9b   :  { %221 = vst.msk [vmem:[%s551_s3 + $0x78] sm:$0xff] %vm205_vm0, %v204_v2 }
  0x9c   :  { %220 = vst.msk [vmem:[%s551_s3 + $0x70] sm:$0xff] %vm205_vm0, %v203_v3 }

// kernel: erfnet_forward.77
= control target key start
LH: loop header
LB: loop body
LE: loop exit
PB: predicated region body
PF: predicated region fallthrough
CT: control target
= control target key end

     0   :  { %s655_s1 = inlined_call_operand.vmem [shape: bf16[128,128], index: 1, kind: input, shape index: {}]   ;;  %s656_s0 = inlined_call_operand.vmem [shape: bf16[128,128], index: 0, kind: input, shape index: {}]   ;;  %s657_s2 = inlined_call_operand.vmem [shape: f32[1,128], index: 2, kind: input, shape index: {}]   ;;  %s658_s3 = inlined_call_operand.vmem [shape: f32[1,128], index: 3, kind: input, shape index: {}]   ;;  %s659_s4 = inlined_call_operand.vmem [shape: f32[128,128], index: 4, kind: output, shape index: {}]  }
   0x1   :  { %v494_v0 = vld [vmem:[%s655_s1] sm:$0xff]   ;;  %v495_v1 = vld [vmem:[%s655_s1 + $0x8] sm:$0xff]   ;;  %v496_v2 = vld [vmem:[%s655_s1 + $0x10] sm:$0xff]  }
   0x2   :  { %446 = vmatprep.subr.bf16.mxu0 %v494_v0  ;;  %478 = vmatprep.subr.bf16.mxu1 %v494_v0  ;;  %v497_v3 = vld [vmem:[%s655_s1 + $0x18] sm:$0xff]   ;;  %v502_v4 = vld [vmem:[%s656_s0] sm:$0xff]   ;;  %v499_v7 = vld [vmem:[%s655_s1 + $0x28] sm:$0xff]  }
   0x3   :  { %447 = vmatpush3.bf16.msra.mxu0 %v494_v0  ;;  %486 = vmatpush3.bf16.msra.mxu1 %v494_v0  ;;  %v503_v5 = vld [vmem:[%s656_s0 + $0x20] sm:$0xff]   ;;  %v500_v8 = vld [vmem:[%s655_s1 + $0x30] sm:$0xff]   ;;  %v501_v9 = vld [vmem:[%s655_s1 + $0x38] sm:$0xff]  }
   0x4   :  { %448 = vmatprep.subr.bf16.mxu0 %v495_v1  ;;  %479 = vmatprep.subr.bf16.mxu1 %v495_v1  ;;  %v498_v6 = vld [vmem:[%s655_s1 + $0x20] sm:$0xff]   ;;  %v504_v10 = vld [vmem:[%s656_s0 + $0x8] sm:$0xff]   ;;  %v506_v12 = vld [vmem:[%s656_s0 + $0x10] sm:$0xff]  }
   0x5   :  { %462 = vmatprep.mubr.bf16.mxu0 %v502_v4  ;;  %470 = vmatprep.mubr.bf16.mxu1 %v503_v5  ;;  %v505_v11 = vld [vmem:[%s656_s0 + $0x28] sm:$0xff]   ;;  %v507_v13 = vld [vmem:[%s656_s0 + $0x30] sm:$0xff]   ;;  %v508_v14 = vld [vmem:[%s656_s0 + $0x18] sm:$0xff]  }
   0x6   :  { %v509_v15 = vld [vmem:[%s656_s0 + $0x38] sm:$0xff]   ;;  %v428_v16 = vld [vmem:[%s657_s2] ss:$0 sm:$0xff] }
   0x7   :  { %449 = vmatpush3.bf16.msra.mxu0 %v495_v1  ;;  %487 = vmatpush3.bf16.msra.mxu1 %v495_v1  ;;  %v589_v18 = vld [vmem:[%s658_s3] ss:$0 sm:$0xff] }
   0x8   :  { %450 = vmatprep.subr.bf16.mxu0 %v496_v2  ;;  %480 = vmatprep.subr.bf16.mxu1 %v496_v2 }
   0xb   :  { %451 = vmatpush3.bf16.msra.mxu0 %v496_v2  ;;  %488 = vmatpush3.bf16.msra.mxu1 %v496_v2 }
   0xc   :  { %452 = vmatprep.subr.bf16.mxu0 %v497_v3  ;;  %481 = vmatprep.subr.bf16.mxu1 %v497_v3 }
   0xf   :  { %453 = vmatpush3.bf16.msra.mxu0 %v497_v3  ;;  %489 = vmatpush3.bf16.msra.mxu1 %v497_v3 }
  0x10   :  { %454 = vmatprep.subr.bf16.mxu0 %v498_v6  ;;  %482 = vmatprep.subr.bf16.mxu1 %v498_v6 }
  0x13   :  { %455 = vmatpush3.bf16.msra.mxu0 %v498_v6  ;;  %490 = vmatpush3.bf16.msra.mxu1 %v498_v6 }
  0x14   :  { %456 = vmatprep.subr.bf16.mxu0 %v499_v7  ;;  %483 = vmatprep.subr.bf16.mxu1 %v499_v7 }
  0x17   :  { %457 = vmatpush3.bf16.msra.mxu0 %v499_v7  ;;  %491 = vmatpush3.bf16.msra.mxu1 %v499_v7 }
  0x18   :  { %458 = vmatprep.subr.bf16.mxu0 %v500_v8  ;;  %484 = vmatprep.subr.bf16.mxu1 %v500_v8 }
  0x1b   :  { %459 = vmatpush3.bf16.msra.mxu0 %v500_v8  ;;  %492 = vmatpush3.bf16.msra.mxu1 %v500_v8 }
  0x1c   :  { %460 = vmatprep.subr.bf16.mxu0 %v501_v9  ;;  %485 = vmatprep.subr.bf16.mxu1 %v501_v9 }
  0x1f   :  { %461 = vmatpush3.bf16.msra.mxu0 %v501_v9  ;;  %493 = vmatpush3.bf16.msra.mxu1 %v501_v9 }
  0x22   :  { %463 = vmatmul.mubr.bf16.vlgmr.msra.gmra.mrb[0].mxu0 %v504_v10  ;;  %471 = vmatmul.mubr.bf16.vlgmr.msra.gmra.mrb[0].mxu1 %v505_v11 }
  0x23   :  { %466 = vmatprep.mubr.bf16.mxu0 %v506_v12  ;;  %474 = vmatprep.mubr.bf16.mxu1 %v507_v13 }
  0x2a   :  { %467 = vmatmul.mubr.bf16.gmra.mrb[4].mxu0 %v508_v14  ;;  %475 = vmatmul.mubr.bf16.gmra.mrb[4].mxu1 %v509_v15 }
  0xf5   :  { %v464_v17 = vpop.f32.mrb[0].mxu0  ;;  %v472_v19 = vpop.f32.mrb[0].mxu1 }
  0xf6   :  { %v339_v20 = vmul.f32 %v464_v17, %v428_v16  ;;  %v347_v21 = vmul.f32 %v472_v19, %v428_v16  ;;  %v216_v22 = vpop.f32.mrb[1].mxu0  ;;  %v248_v23 = vpop.f32.mrb[1].mxu1 }
  0xf7   :  { %v337_v24 = vmul.f32 %v428_v16, %v216_v22  ;;  %v345_v25 = vmul.f32 %v428_v16, %v248_v23  ;;  %v465_v26 = vpop.f32.mrb[2].mxu0  ;;  %v473_v27 = vpop.f32.mrb[2].mxu1 }
  0xf8   :  { %v362_v28 = vadd.f32 %v589_v18, %v339_v20  ;;  %v370_v29 = vadd.f32 %v589_v18, %v347_v21  ;;  %v340_v30 = vmul.f32 %v465_v26, %v428_v16  ;;  %v348_v31 = vmul.f32 %v473_v27, %v428_v16  ;;  %v219_v32 = vpop.f32.mrb[3].mxu0  ;;  %v251_v33 = vpop.f32.mrb[3].mxu1 }
  0xf9   :  { %v360_v34 = vadd.f32 %v589_v18, %v337_v24  ;;  %v368_v35 = vadd.f32 %v589_v18, %v345_v25  ;;  %v338_v36 = vmul.f32 %v428_v16, %v219_v32  ;;  %v346_v37 = vmul.f32 %v428_v16, %v251_v33 }
  0xfa   :  { %v378_v38 = vmax.f32 %v362_v28, 0.0  ;;  %v386_v39 = vmax.f32 %v370_v29, 0.0  ;;  %v363_v40 = vadd.f32 %v589_v18, %v340_v30  ;;  %v371_v41 = vadd.f32 %v589_v18, %v348_v31 }
  0xfb   :  { %v376_v42 = vmax.f32 %v360_v34, 0.0  ;;  %v384_v43 = vmax.f32 %v368_v35, 0.0  ;;  %v361_v44 = vadd.f32 %v589_v18, %v338_v36  ;;  %v369_v45 = vadd.f32 %v589_v18, %v346_v37 }
  0xfc   :  { %394 = vst [vmem:[%s659_s4 + $0x10] sm:$0xff] %v378_v38  ;;  %402 = vst [vmem:[%s659_s4 + $0x50] sm:$0xff] %v386_v39  ;;  %v379_v46 = vmax.f32 %v363_v40, 0.0  ;;  %v387_v47 = vmax.f32 %v371_v41, 0.0 }
  0xfd   :  { %392 = vst [vmem:[%s659_s4] sm:$0xff] %v376_v42  ;;  %400 = vst [vmem:[%s659_s4 + $0x40] sm:$0xff] %v384_v43  ;;  %v377_v48 = vmax.f32 %v361_v44, 0.0  ;;  %v385_v49 = vmax.f32 %v369_v45, 0.0  ;;  %v468_v50 = vpop.f32.mrb[4].mxu0  ;;  %v476_v51 = vpop.f32.mrb[4].mxu1 }
  0xfe   :  { %395 = vst [vmem:[%s659_s4 + $0x18] sm:$0xff] %v379_v46  ;;  %403 = vst [vmem:[%s659_s4 + $0x58] sm:$0xff] %v387_v47  ;;  %v343_v52 = vmul.f32 %v468_v50, %v428_v16  ;;  %v351_v53 = vmul.f32 %v476_v51, %v428_v16  ;;  %v232_v54 = vpop.f32.mrb[5].mxu0  ;;  %v264_v55 = vpop.f32.mrb[5].mxu1 }
  0xff   :  { %393 = vst [vmem:[%s659_s4 + $0x8] sm:$0xff] %v377_v48  ;;  %401 = vst [vmem:[%s659_s4 + $0x48] sm:$0xff] %v385_v49  ;;  %v341_v56 = vmul.f32 %v428_v16, %v232_v54  ;;  %v349_v57 = vmul.f32 %v428_v16, %v264_v55  ;;  %v469_v58 = vpop.f32.mrb[6].mxu0  ;;  %v477_v59 = vpop.f32.mrb[6].mxu1 }
 0x100   :  { %v366_v60 = vadd.f32 %v589_v18, %v343_v52  ;;  %v374_v61 = vadd.f32 %v589_v18, %v351_v53  ;;  %v344_v62 = vmul.f32 %v469_v58, %v428_v16  ;;  %v352_v63 = vmul.f32 %v477_v59, %v428_v16  ;;  %v235_v0 = vpop.f32.mrb[7].mxu0  ;;  %v267_v1 = vpop.f32.mrb[7].mxu1 }
 0x101   :  { %v364_v2 = vadd.f32 %v589_v18, %v341_v56  ;;  %v372_v3 = vadd.f32 %v589_v18, %v349_v57  ;;  %v342_v4 = vmul.f32 %v428_v16, %v235_v0  ;;  %v350_v5 = vmul.f32 %v428_v16, %v267_v1 }
 0x102   :  { %v382_v6 = vmax.f32 %v366_v60, 0.0  ;;  %v390_v7 = vmax.f32 %v374_v61, 0.0  ;;  %v367_v8 = vadd.f32 %v589_v18, %v344_v62  ;;  %v375_v9 = vadd.f32 %v589_v18, %v352_v63 }
 0x103   :  { %v380_v10 = vmax.f32 %v364_v2, 0.0  ;;  %v388_v11 = vmax.f32 %v372_v3, 0.0  ;;  %v365_v12 = vadd.f32 %v589_v18, %v342_v4  ;;  %v373_v13 = vadd.f32 %v589_v18, %v350_v5 }
 0x104   :  { %398 = vst [vmem:[%s659_s4 + $0x30] sm:$0xff] %v382_v6  ;;  %406 = vst [vmem:[%s659_s4 + $0x70] sm:$0xff] %v390_v7  ;;  %v383_v14 = vmax.f32 %v367_v8, 0.0  ;;  %v391_v15 = vmax.f32 %v375_v9, 0.0 }
 0x105   :  { %396 = vst [vmem:[%s659_s4 + $0x20] sm:$0xff] %v380_v10  ;;  %404 = vst [vmem:[%s659_s4 + $0x60] sm:$0xff] %v388_v11  ;;  %v381_v16 = vmax.f32 %v365_v12, 0.0  ;;  %v389_v17 = vmax.f32 %v373_v13, 0.0 }
 0x106   :  { %399 = vst [vmem:[%s659_s4 + $0x38] sm:$0xff] %v383_v14  ;;  %407 = vst [vmem:[%s659_s4 + $0x78] sm:$0xff] %v391_v15 }
 0x107   :  { %397 = vst [vmem:[%s659_s4 + $0x28] sm:$0xff] %v381_v16  ;;  %405 = vst [vmem:[%s659_s4 + $0x68] sm:$0xff] %v389_v17 }

// kernel: erfnet_forward.80
= control target key start
LH: loop header
LB: loop body
LE: loop exit
PB: predicated region body
PF: predicated region fallthrough
CT: control target
= control target key end

     0   :  { %s141_s28 = smov 112   ;;  %vm117_vm0 = vcmask 125952   ;;  %s248_s0 = inlined_call_operand.vmem [shape: f32[8,2,4,32], index: 0, kind: input, shape index: {}]   ;;  %s249_s1 = inlined_call_operand.vmem [shape: f32[1,1,16], index: 1, kind: input, shape index: {}]   ;;  %s250_s2 = inlined_call_operand.vmem [shape: f32[1,1,16], index: 2, kind: input, shape index: {}]   ;;  %s251_s3 = inlined_call_operand.vmem [shape: f32[8,4,16], index: 3, kind: output, shape index: {}]  }
   0x1   :  { %v16_v0 = vld [vmem:[%s248_s0 + $0x10] sm:$0xf]  ;;  %v132_v1 = vld [vmem:[%s248_s0 + $0x14] sm:$0xf]  ;;  %v14_v2 = vld [vmem:[%s248_s0] sm:$0xf] }
   0x2   :  { %v33_v3 = vmax.f32 %v16_v0, %v132_v1  ;;  %v130_v4 = vld [vmem:[%s248_s0 + $0x4] sm:$0xf]  ;;  %v17_v5 = vld [vmem:[%s248_s0 + $0x18] sm:$0xf]  ;;  %v133_v6 = vld [vmem:[%s248_s0 + $0x1c] sm:$0xf] }
   0x3   :  { %v31_v7 = vmax.f32 %v14_v2, %v130_v4  ;;  %v15_v8 = vld [vmem:[%s248_s0 + $0x8] sm:$0xf]  ;;  %v131_v9 = vld [vmem:[%s248_s0 + $0xc] sm:$0xf]  ;;  %v34_v10 = vmax.f32 %v17_v5, %v133_v6  ;;  %v18_v14 = vld [vmem:[%s248_s0 + $0x20] sm:$0xf] }
   0x4   :  { %51 = vrot.lane.b32.xlu1 %v33_v3, %s141_s28  ;;  %v32_v11 = vmax.f32 %v15_v8, %v131_v9  ;;  %v19_v12 = vld [vmem:[%s248_s0 + $0x28] sm:$0xf]  ;;  %v135_v13 = vld [vmem:[%s248_s0 + $0x2c] sm:$0xf]  ;;  %v134_v15 = vld [vmem:[%s248_s0 + $0x24] sm:$0xf] }
   0x5   :  { %47 = vrot.lane.b32.xlu0 %v31_v7, %s141_s28  ;;  %v36_v16 = vmax.f32 %v19_v12, %v135_v13  ;;  %v35_v17 = vmax.f32 %v18_v14, %v134_v15  ;;  %v21_v18 = vld [vmem:[%s248_s0 + $0x38] sm:$0xf]  ;;  %v137_v19 = vld [vmem:[%s248_s0 + $0x3c] sm:$0xf]  ;;  %v20_v20 = vld [vmem:[%s248_s0 + $0x30] sm:$0xf] }
   0x6   :  { %v136_v21 = vld [vmem:[%s248_s0 + $0x34] sm:$0xf]  ;;  %v38_v22 = vmax.f32 %v21_v18, %v137_v19  ;;  %v138_v24 = vld [vmem:[%s249_s1] ss:$0 sm:$0xff] }
   0x7   :  { %v37_v23 = vmax.f32 %v20_v20, %v136_v21  ;;  %v139_v28 = vld [vmem:[%s250_s2] ss:$0 sm:$0xff] }
   0x8   :  { %53 = vrot.lane.b32.xlu1 %v34_v10, %s141_s28 }
   0x9   :  { %49 = vrot.lane.b32.xlu0 %v32_v11, %s141_s28 }
   0xc   :  { %57 = vrot.lane.b32.xlu1 %v36_v16, %s141_s28 }
   0xd   :  { %55 = vrot.lane.b32.xlu0 %v35_v17, %s141_s28 }
  0x10   :  { %61 = vrot.lane.b32.xlu1 %v38_v22, %s141_s28 }
  0x11   :  { %59 = vrot.lane.b32.xlu0 %v37_v23, %s141_s28 }
  0x76   :  { %v52_v25 = vpop.permute.xlu1 %51 }
  0x77   :  { %v73_v26 = vmax.f32 %v33_v3, %v52_v25  ;;  %v48_v27 = vpop.permute.xlu0 %47 }
  0x78   :  { %v71_v29 = vmax.f32 %v31_v7, %v48_v27 }
  0x79   :  { %v88_v30 = vmul.f32 %v138_v24, %v73_v26 }
  0x7a   :  { %v86_v31 = vmul.f32 %v138_v24, %v71_v29  ;;  %v54_v32 = vpop.permute.xlu1 %53 }
  0x7b   :  { %v103_v33 = vadd.f32 %v139_v28, %v88_v30  ;;  %v74_v34 = vmax.f32 %v34_v10, %v54_v32  ;;  %v50_v35 = vpop.permute.xlu0 %49 }
  0x7c   :  { %v101_v36 = vadd.f32 %v139_v28, %v86_v31  ;;  %v72_v37 = vmax.f32 %v32_v11, %v50_v35 }
  0x7d   :  { %v111_v38 = vmax.f32 %v103_v33, 0.0  ;;  %v89_v39 = vmul.f32 %v138_v24, %v74_v34 }
  0x7e   :  { %v109_v40 = vmax.f32 %v101_v36, 0.0  ;;  %v87_v41 = vmul.f32 %v138_v24, %v72_v37  ;;  %v58_v42 = vpop.permute.xlu1 %57 }
  0x7f   :  { %120 = vst.msk [vmem:[%s251_s3 + $0x8] sm:$0xf] %vm117_vm0, %v111_v38  ;;  %v104_v43 = vadd.f32 %v139_v28, %v89_v39  ;;  %v76_v44 = vmax.f32 %v36_v16, %v58_v42  ;;  %v56_v45 = vpop.permute.xlu0 %55 }
  0x80   :  { %118 = vst.msk [vmem:[%s251_s3] sm:$0xf] %vm117_vm0, %v109_v40  ;;  %v102_v46 = vadd.f32 %v139_v28, %v87_v41  ;;  %v75_v47 = vmax.f32 %v35_v17, %v56_v45 }
  0x81   :  { %v112_v48 = vmax.f32 %v104_v43, 0.0  ;;  %v91_v49 = vmul.f32 %v138_v24, %v76_v44 }
  0x82   :  { %v110_v50 = vmax.f32 %v102_v46, 0.0  ;;  %v90_v51 = vmul.f32 %v138_v24, %v75_v47  ;;  %v62_v52 = vpop.permute.xlu1 %61 }
  0x83   :  { %121 = vst.msk [vmem:[%s251_s3 + $0xc] sm:$0xf] %vm117_vm0, %v112_v48  ;;  %v106_v53 = vadd.f32 %v139_v28, %v91_v49  ;;  %v78_v54 = vmax.f32 %v38_v22, %v62_v52  ;;  %v60_v55 = vpop.permute.xlu0 %59 }
  0x84   :  { %119 = vst.msk [vmem:[%s251_s3 + $0x4] sm:$0xf] %vm117_vm0, %v110_v50  ;;  %v105_v56 = vadd.f32 %v139_v28, %v90_v51  ;;  %v77_v57 = vmax.f32 %v37_v23, %v60_v55 }
  0x85   :  { %v114_v58 = vmax.f32 %v106_v53, 0.0  ;;  %v93_v59 = vmul.f32 %v138_v24, %v78_v54 }
  0x86   :  { %v113_v60 = vmax.f32 %v105_v56, 0.0  ;;  %v92_v61 = vmul.f32 %v138_v24, %v77_v57 }
  0x87   :  { %123 = vst.msk [vmem:[%s251_s3 + $0x14] sm:$0xf] %vm117_vm0, %v114_v58  ;;  %v108_v62 = vadd.f32 %v139_v28, %v93_v59 }
  0x88   :  { %122 = vst.msk [vmem:[%s251_s3 + $0x10] sm:$0xf] %vm117_vm0, %v113_v60  ;;  %v107_v63 = vadd.f32 %v139_v28, %v92_v61 }
  0x89   :  { %v116_v0 = vmax.f32 %v108_v62, 0.0 }
  0x8a   :  { %v115_v1 = vmax.f32 %v107_v63, 0.0 }
  0x8b   :  { %125 = vst.msk [vmem:[%s251_s3 + $0x1c] sm:$0xf] %vm117_vm0, %v116_v0 }
  0x8c   :  { %124 = vst.msk [vmem:[%s251_s3 + $0x18] sm:$0xf] %vm117_vm0, %v115_v1 }

// kernel: erfnet_forward.79
= control target key start
LH: loop header
LB: loop body
LE: loop exit
PB: predicated region body
PF: predicated region fallthrough
CT: control target
= control target key end

     0   :  { %s873_s1 = inlined_call_operand.vmem [shape: bf16[256,128], index: 1, kind: input, shape index: {}]   ;;  %s874_s0 = inlined_call_operand.vmem [shape: bf16[128,256], index: 0, kind: input, shape index: {}]   ;;  %s875_s2 = inlined_call_operand.vmem [shape: f32[1,128], index: 2, kind: input, shape index: {}]   ;;  %s876_s3 = inlined_call_operand.vmem [shape: f32[1,128], index: 3, kind: input, shape index: {}]   ;;  %s877_s4 = inlined_call_operand.vmem [shape: f32[128,128], index: 4, kind: output, shape index: {}]  }
   0x1   :  { %v622_v0 = vld [vmem:[%s873_s1 + $0x40] sm:$0xff]   ;;  %v624_v2 = vld [vmem:[%s873_s1 + $0x48] sm:$0xff]   ;;  %v626_v4 = vld [vmem:[%s873_s1 + $0x50] sm:$0xff]  }
   0x2   :  { %v623_v1 = vld [vmem:[%s873_s1] sm:$0xff]   ;;  %542 = vmatprep.subr.bf16.mxu0 %v622_v0  ;;  %606 = vmatprep.subr.bf16.mxu1 %v622_v0  ;;  %v625_v3 = vld [vmem:[%s873_s1 + $0x8] sm:$0xff]   ;;  %v627_v5 = vld [vmem:[%s873_s1 + $0x10] sm:$0xff]  }
   0x3   :  { %543 = vmatpush3.bf16.msra.mxu0 %v623_v1  ;;  %614 = vmatpush3.bf16.msra.mxu1 %v623_v1  ;;  %v628_v6 = vld [vmem:[%s873_s1 + $0x58] sm:$0xff]   ;;  %v630_v8 = vld [vmem:[%s873_s1 + $0x60] sm:$0xff]   ;;  %v632_v10 = vld [vmem:[%s873_s1 + $0x68] sm:$0xff]  }
   0x4   :  { %544 = vmatprep.subr.bf16.mxu0 %v624_v2  ;;  %607 = vmatprep.subr.bf16.mxu1 %v624_v2  ;;  %v629_v7 = vld [vmem:[%s873_s1 + $0x18] sm:$0xff]   ;;  %v631_v9 = vld [vmem:[%s873_s1 + $0x20] sm:$0xff]   ;;  %v633_v13 = vld [vmem:[%s873_s1 + $0x28] sm:$0xff]  }
   0x5   :  { %v640_v11 = vld [vmem:[%s874_s0 + $0x4] ss:$8 sps:$4 sm:$0xff]   ;;  %v634_v14 = vld [vmem:[%s873_s1 + $0x70] sm:$0xff]   ;;  %v636_v16 = vld [vmem:[%s873_s1 + $0x78] sm:$0xff]  }
   0x6   :  { %v643_v12 = vld [vmem:[%s874_s0 + $0x44] ss:$8 sps:$4 sm:$0xff]   ;;  %310 = vmatprep.mubr.bf16.mxu0 %v640_v11  ;;  %v635_v15 = vld [vmem:[%s873_s1 + $0x30] sm:$0xff]   ;;  %v637_v17 = vld [vmem:[%s873_s1 + $0x38] sm:$0xff]  }
   0x7   :  { %545 = vmatpush3.bf16.msra.mxu0 %v625_v3  ;;  %615 = vmatpush3.bf16.msra.mxu1 %v625_v3  ;;  %v638_v18 = vld [vmem:[%s874_s0] ss:$8 sps:$4 sm:$0xff]   ;;  %v644_v20 = vld [vmem:[%s874_s0 + $0x14] ss:$8 sps:$4 sm:$0xff]   ;;  %v648_v22 = vld [vmem:[%s874_s0 + $0x10] ss:$8 sps:$4 sm:$0xff]  }
   0x8   :  { %546 = vmatprep.subr.bf16.mxu0 %v626_v4  ;;  %608 = vmatprep.subr.bf16.mxu1 %v626_v4  ;;  %v641_v19 = vld [vmem:[%s874_s0 + $0x40] ss:$8 sps:$4 sm:$0xff]   ;;  %v646_v21 = vld [vmem:[%s874_s0 + $0x54] ss:$8 sps:$4 sm:$0xff]   ;;  %v649_v23 = vld [vmem:[%s874_s0 + $0x50] ss:$8 sps:$4 sm:$0xff]  }
   0x9   :  { %342 = vmatprep.mubr.bf16.mxu1 %v643_v12  ;;  %v650_v24 = vld [vmem:[%s874_s0 + $0x24] ss:$8 sps:$4 sm:$0xff]   ;;  %v654_v26 = vld [vmem:[%s874_s0 + $0x20] ss:$8 sps:$4 sm:$0xff]   ;;  %v656_v28 = vld [vmem:[%s874_s0 + $0x34] ss:$8 sps:$4 sm:$0xff]  }
   0xa   :  { %v652_v25 = vld [vmem:[%s874_s0 + $0x64] ss:$8 sps:$4 sm:$0xff]   ;;  %v655_v27 = vld [vmem:[%s874_s0 + $0x60] ss:$8 sps:$4 sm:$0xff]   ;;  %v658_v29 = vld [vmem:[%s874_s0 + $0x74] ss:$8 sps:$4 sm:$0xff]  }
   0xb   :  { %547 = vmatpush3.bf16.msra.mxu0 %v627_v5  ;;  %616 = vmatpush3.bf16.msra.mxu1 %v627_v5  ;;  %v660_v30 = vld [vmem:[%s874_s0 + $0x30] ss:$8 sps:$4 sm:$0xff]   ;;  %v786_v35 = vld [vmem:[%s875_s2] ss:$0 sm:$0xff] }
   0xc   :  { %548 = vmatprep.subr.bf16.mxu0 %v628_v6  ;;  %609 = vmatprep.subr.bf16.mxu1 %v628_v6  ;;  %v661_v31 = vld [vmem:[%s874_s0 + $0x70] ss:$8 sps:$4 sm:$0xff]   ;;  %v791_v41 = vld [vmem:[%s876_s3] ss:$0 sm:$0xff] }
   0xf   :  { %549 = vmatpush3.bf16.msra.mxu0 %v629_v7  ;;  %617 = vmatpush3.bf16.msra.mxu1 %v629_v7 }
  0x10   :  { %550 = vmatprep.subr.bf16.mxu0 %v630_v8  ;;  %610 = vmatprep.subr.bf16.mxu1 %v630_v8 }
  0x13   :  { %551 = vmatpush3.bf16.msra.mxu0 %v631_v9  ;;  %618 = vmatpush3.bf16.msra.mxu1 %v631_v9 }
  0x14   :  { %552 = vmatprep.subr.bf16.mxu0 %v632_v10  ;;  %611 = vmatprep.subr.bf16.mxu1 %v632_v10 }
  0x17   :  { %553 = vmatpush3.bf16.msra.mxu0 %v633_v13  ;;  %619 = vmatpush3.bf16.msra.mxu1 %v633_v13 }
  0x18   :  { %554 = vmatprep.subr.bf16.mxu0 %v634_v14  ;;  %612 = vmatprep.subr.bf16.mxu1 %v634_v14 }
  0x1b   :  { %555 = vmatpush3.bf16.msra.mxu0 %v635_v15  ;;  %620 = vmatpush3.bf16.msra.mxu1 %v635_v15 }
  0x1c   :  { %556 = vmatprep.subr.bf16.mxu0 %v636_v16  ;;  %613 = vmatprep.subr.bf16.mxu1 %v636_v16 }
  0x1f   :  { %557 = vmatpush3.bf16.msra.mxu0 %v637_v17  ;;  %621 = vmatpush3.bf16.msra.mxu1 %v637_v17 }
  0x22   :  { %311 = vmatmul.mubr.bf16.vlgmr.msra.gmra.mrb[0].mxu0 %v638_v18  ;;  %343 = vmatmul.mubr.bf16.vlgmr.msra.gmra.mrb[0].mxu1 %v641_v19 }
  0x23   :  { %318 = vmatprep.mubr.bf16.mxu0 %v644_v20  ;;  %350 = vmatprep.mubr.bf16.mxu1 %v646_v21 }
  0x2a   :  { %319 = vmatmul.mubr.bf16.gmra.mrb[4].mxu0 %v648_v22  ;;  %351 = vmatmul.mubr.bf16.gmra.mrb[4].mxu1 %v649_v23 }
  0x2b   :  { %326 = vmatprep.mubr.bf16.mxu0 %v650_v24  ;;  %358 = vmatprep.mubr.bf16.mxu1 %v652_v25 }
  0x32   :  { %327 = vmatmul.mubr.bf16.gmra.mrb[8].mxu0 %v654_v26  ;;  %359 = vmatmul.mubr.bf16.gmra.mrb[8].mxu1 %v655_v27 }
  0x33   :  { %334 = vmatprep.mubr.bf16.mxu0 %v656_v28  ;;  %366 = vmatprep.mubr.bf16.mxu1 %v658_v29 }
  0x3a   :  { %335 = vmatmul.mubr.bf16.gmra.mrb[12].mxu0 %v660_v30  ;;  %367 = vmatmul.mubr.bf16.gmra.mrb[12].mxu1 %v661_v31 }
  0xf5   :  { %v558_v32 = vpop.f32.mrb[0].mxu0  ;;  %v582_v33 = vpop.f32.mrb[0].mxu1 }
  0xf6   :  { %v559_v34 = vpop.f32.mrb[1].mxu0  ;;  %v583_v36 = vpop.f32.mrb[1].mxu1 }
  0xf7   :  { %v560_v37 = vadd.f32 %v559_v34, %v558_v32  ;;  %v584_v38 = vadd.f32 %v583_v36, %v582_v33  ;;  %v561_v39 = vpop.f32.mrb[2].mxu0  ;;  %v585_v40 = vpop.f32.mrb[2].mxu1 }
  0xf8   :  { %v562_v42 = vpop.f32.mrb[3].mxu0  ;;  %v586_v43 = vpop.f32.mrb[3].mxu1 }
  0xf9   :  { %v433_v44 = vmul.f32 %v560_v37, %v786_v35  ;;  %v441_v45 = vmul.f32 %v584_v38, %v786_v35  ;;  %v563_v46 = vadd.f32 %v562_v42, %v561_v39  ;;  %v587_v47 = vadd.f32 %v586_v43, %v585_v40 }
  0xfb   :  { %v456_v48 = vadd.f32 %v791_v41, %v433_v44  ;;  %v464_v49 = vadd.f32 %v791_v41, %v441_v45  ;;  %v434_v50 = vmul.f32 %v563_v46, %v786_v35  ;;  %v442_v51 = vmul.f32 %v587_v47, %v786_v35 }
  0xfd   :  { %v472_v52 = vmax.f32 %v456_v48, 0.0  ;;  %v480_v53 = vmax.f32 %v464_v49, 0.0  ;;  %v457_v54 = vadd.f32 %v791_v41, %v434_v50  ;;  %v465_v55 = vadd.f32 %v791_v41, %v442_v51  ;;  %v564_v56 = vpop.f32.mrb[4].mxu0  ;;  %v588_v57 = vpop.f32.mrb[4].mxu1 }
  0xfe   :  { %v565_v58 = vpop.f32.mrb[5].mxu0  ;;  %v589_v59 = vpop.f32.mrb[5].mxu1 }
  0xff   :  { %488 = vst [vmem:[%s877_s4] sm:$0xff] %v472_v52  ;;  %496 = vst [vmem:[%s877_s4 + $0x40] sm:$0xff] %v480_v53  ;;  %v473_v60 = vmax.f32 %v457_v54, 0.0  ;;  %v481_v61 = vmax.f32 %v465_v55, 0.0  ;;  %v566_v62 = vadd.f32 %v565_v58, %v564_v56  ;;  %v590_v63 = vadd.f32 %v589_v59, %v588_v57  ;;  %v567_v0 = vpop.f32.mrb[6].mxu0  ;;  %v591_v1 = vpop.f32.mrb[6].mxu1 }
 0x100   :  { %v568_v2 = vpop.f32.mrb[7].mxu0  ;;  %v592_v3 = vpop.f32.mrb[7].mxu1 }
 0x101   :  { %489 = vst [vmem:[%s877_s4 + $0x8] sm:$0xff] %v473_v60  ;;  %497 = vst [vmem:[%s877_s4 + $0x48] sm:$0xff] %v481_v61  ;;  %v435_v4 = vmul.f32 %v566_v62, %v786_v35  ;;  %v443_v5 = vmul.f32 %v590_v63, %v786_v35  ;;  %v569_v6 = vadd.f32 %v568_v2, %v567_v0 }
 0x102   :  { %v593_v7 = vadd.f32 %v592_v3, %v591_v1 }
 0x103   :  { %v458_v8 = vadd.f32 %v791_v41, %v435_v4  ;;  %v466_v9 = vadd.f32 %v791_v41, %v443_v5  ;;  %v436_v10 = vmul.f32 %v569_v6, %v786_v35 }
 0x104   :  { %v444_v11 = vmul.f32 %v593_v7, %v786_v35 }
 0x105   :  { %v474_v12 = vmax.f32 %v458_v8, 0.0  ;;  %v482_v13 = vmax.f32 %v466_v9, 0.0  ;;  %v459_v14 = vadd.f32 %v791_v41, %v436_v10  ;;  %v570_v16 = vpop.f32.mrb[8].mxu0  ;;  %v594_v17 = vpop.f32.mrb[8].mxu1 }
 0x106   :  { %v467_v15 = vadd.f32 %v791_v41, %v444_v11  ;;  %v571_v18 = vpop.f32.mrb[9].mxu0  ;;  %v595_v19 = vpop.f32.mrb[9].mxu1 }
 0x107   :  { %490 = vst [vmem:[%s877_s4 + $0x10] sm:$0xff] %v474_v12  ;;  %498 = vst [vmem:[%s877_s4 + $0x50] sm:$0xff] %v482_v13  ;;  %v475_v20 = vmax.f32 %v459_v14, 0.0  ;;  %v572_v22 = vadd.f32 %v571_v18, %v570_v16  ;;  %v596_v23 = vadd.f32 %v595_v19, %v594_v17  ;;  %v573_v24 = vpop.f32.mrb[10].mxu0  ;;  %v597_v25 = vpop.f32.mrb[10].mxu1 }
 0x108   :  { %v483_v21 = vmax.f32 %v467_v15, 0.0  ;;  %v574_v26 = vpop.f32.mrb[11].mxu0  ;;  %v598_v27 = vpop.f32.mrb[11].mxu1 }
 0x109   :  { %491 = vst [vmem:[%s877_s4 + $0x18] sm:$0xff] %v475_v20  ;;  %v437_v28 = vmul.f32 %v572_v22, %v786_v35  ;;  %v445_v29 = vmul.f32 %v596_v23, %v786_v35  ;;  %v575_v30 = vadd.f32 %v574_v26, %v573_v24  ;;  %v599_v31 = vadd.f32 %v598_v27, %v597_v25 }
 0x10a   :  { %499 = vst [vmem:[%s877_s4 + $0x58] sm:$0xff] %v483_v21 }
 0x10b   :  { %v460_v32 = vadd.f32 %v791_v41, %v437_v28  ;;  %v468_v33 = vadd.f32 %v791_v41, %v445_v29  ;;  %v438_v34 = vmul.f32 %v575_v30, %v786_v35  ;;  %v446_v36 = vmul.f32 %v599_v31, %v786_v35 }
 0x10d   :  { %v476_v37 = vmax.f32 %v460_v32, 0.0  ;;  %v484_v38 = vmax.f32 %v468_v33, 0.0  ;;  %v461_v39 = vadd.f32 %v791_v41, %v438_v34  ;;  %v469_v40 = vadd.f32 %v791_v41, %v446_v36  ;;  %v576_v42 = vpop.f32.mrb[12].mxu0  ;;  %v600_v43 = vpop.f32.mrb[12].mxu1 }
 0x10e   :  { %v577_v44 = vpop.f32.mrb[13].mxu0  ;;  %v601_v45 = vpop.f32.mrb[13].mxu1 }
 0x10f   :  { %492 = vst [vmem:[%s877_s4 + $0x20] sm:$0xff] %v476_v37  ;;  %500 = vst [vmem:[%s877_s4 + $0x60] sm:$0xff] %v484_v38  ;;  %v477_v46 = vmax.f32 %v461_v39, 0.0  ;;  %v485_v47 = vmax.f32 %v469_v40, 0.0  ;;  %v578_v48 = vadd.f32 %v577_v44, %v576_v42  ;;  %v602_v49 = vadd.f32 %v601_v45, %v600_v43  ;;  %v579_v50 = vpop.f32.mrb[14].mxu0  ;;  %v603_v51 = vpop.f32.mrb[14].mxu1 }
 0x110   :  { %v580_v52 = vpop.f32.mrb[15].mxu0  ;;  %v604_v53 = vpop.f32.mrb[15].mxu1 }
 0x111   :  { %493 = vst [vmem:[%s877_s4 + $0x28] sm:$0xff] %v477_v46  ;;  %501 = vst [vmem:[%s877_s4 + $0x68] sm:$0xff] %v485_v47  ;;  %v439_v54 = vmul.f32 %v578_v48, %v786_v35  ;;  %v447_v55 = vmul.f32 %v602_v49, %v786_v35  ;;  %v581_v56 = vadd.f32 %v580_v52, %v579_v50 }
 0x112   :  { %v605_v57 = vadd.f32 %v604_v53, %v603_v51 }
 0x113   :  { %v462_v58 = vadd.f32 %v791_v41, %v439_v54  ;;  %v470_v59 = vadd.f32 %v791_v41, %v447_v55  ;;  %v440_v60 = vmul.f32 %v581_v56, %v786_v35 }
 0x114   :  { %v448_v61 = vmul.f32 %v605_v57, %v786_v35 }
 0x115   :  { %v478_v62 = vmax.f32 %v462_v58, 0.0  ;;  %v486_v63 = vmax.f32 %v470_v59, 0.0  ;;  %v463_v0 = vadd.f32 %v791_v41, %v440_v60 }
 0x116   :  { %v471_v1 = vadd.f32 %v791_v41, %v448_v61 }
 0x117   :  { %494 = vst [vmem:[%s877_s4 + $0x30] sm:$0xff] %v478_v62  ;;  %502 = vst [vmem:[%s877_s4 + $0x70] sm:$0xff] %v486_v63  ;;  %v479_v2 = vmax.f32 %v463_v0, 0.0 }
 0x118   :  { %v487_v3 = vmax.f32 %v471_v1, 0.0 }
 0x119   :  { %495 = vst [vmem:[%s877_s4 + $0x38] sm:$0xff] %v479_v2 }
 0x11a   :  { %503 = vst [vmem:[%s877_s4 + $0x78] sm:$0xff] %v487_v3 }

// kernel: erfnet_forward.84
= control target key start
LH: loop header
LB: loop body
LE: loop exit
PB: predicated region body
PF: predicated region fallthrough
CT: control target
= control target key end

     0   :  { %s961_s1 = inlined_call_operand.vmem [shape: bf16[256,128], index: 1, kind: input, shape index: {}]   ;;  %s962_s0 = inlined_call_operand.vmem [shape: bf16[128,256], index: 0, kind: input, shape index: {}]   ;;  %s963_s2 = inlined_call_operand.vmem [shape: f32[1,128], index: 2, kind: input, shape index: {}]   ;;  %s964_s3 = inlined_call_operand.vmem [shape: f32[1,128], index: 3, kind: input, shape index: {}]   ;;  %s965_s4 = inlined_call_operand.vmem [shape: f32[128,128], index: 4, kind: input, shape index: {}]   ;;  %s966_s5 = inlined_call_operand.vmem [shape: f32[128,128], index: 5, kind: output, shape index: {}]  }
   0x1   :  { %v657_v0 = vld [vmem:[%s961_s1 + $0x40] sm:$0xff]   ;;  %v659_v2 = vld [vmem:[%s961_s1 + $0x48] sm:$0xff]   ;;  %v661_v4 = vld [vmem:[%s961_s1 + $0x50] sm:$0xff]  }
   0x2   :  { %v658_v1 = vld [vmem:[%s961_s1] sm:$0xff]   ;;  %577 = vmatprep.subr.bf16.mxu0 %v657_v0  ;;  %641 = vmatprep.subr.bf16.mxu1 %v657_v0  ;;  %v660_v3 = vld [vmem:[%s961_s1 + $0x8] sm:$0xff]   ;;  %v662_v5 = vld [vmem:[%s961_s1 + $0x10] sm:$0xff]  }
   0x3   :  { %578 = vmatpush3.bf16.msra.mxu0 %v658_v1  ;;  %649 = vmatpush3.bf16.msra.mxu1 %v658_v1  ;;  %v663_v6 = vld [vmem:[%s961_s1 + $0x58] sm:$0xff]   ;;  %v665_v8 = vld [vmem:[%s961_s1 + $0x60] sm:$0xff]   ;;  %v667_v10 = vld [vmem:[%s961_s1 + $0x68] sm:$0xff]  }
   0x4   :  { %579 = vmatprep.subr.bf16.mxu0 %v659_v2  ;;  %642 = vmatprep.subr.bf16.mxu1 %v659_v2  ;;  %v664_v7 = vld [vmem:[%s961_s1 + $0x18] sm:$0xff]   ;;  %v666_v9 = vld [vmem:[%s961_s1 + $0x20] sm:$0xff]   ;;  %v668_v13 = vld [vmem:[%s961_s1 + $0x28] sm:$0xff]  }
   0x5   :  { %v675_v11 = vld [vmem:[%s962_s0 + $0x4] ss:$8 sps:$4 sm:$0xff]   ;;  %v669_v14 = vld [vmem:[%s961_s1 + $0x70] sm:$0xff]   ;;  %v671_v16 = vld [vmem:[%s961_s1 + $0x78] sm:$0xff]  }
   0x6   :  { %v678_v12 = vld [vmem:[%s962_s0 + $0x44] ss:$8 sps:$4 sm:$0xff]   ;;  %313 = vmatprep.mubr.bf16.mxu0 %v675_v11  ;;  %v670_v15 = vld [vmem:[%s961_s1 + $0x30] sm:$0xff]   ;;  %v672_v17 = vld [vmem:[%s961_s1 + $0x38] sm:$0xff]  }
   0x7   :  { %580 = vmatpush3.bf16.msra.mxu0 %v660_v3  ;;  %650 = vmatpush3.bf16.msra.mxu1 %v660_v3  ;;  %v673_v18 = vld [vmem:[%s962_s0] ss:$8 sps:$4 sm:$0xff]   ;;  %v679_v20 = vld [vmem:[%s962_s0 + $0x14] ss:$8 sps:$4 sm:$0xff]   ;;  %v683_v22 = vld [vmem:[%s962_s0 + $0x10] ss:$8 sps:$4 sm:$0xff]  }
   0x8   :  { %581 = vmatprep.subr.bf16.mxu0 %v661_v4  ;;  %643 = vmatprep.subr.bf16.mxu1 %v661_v4  ;;  %v676_v19 = vld [vmem:[%s962_s0 + $0x40] ss:$8 sps:$4 sm:$0xff]   ;;  %v681_v21 = vld [vmem:[%s962_s0 + $0x54] ss:$8 sps:$4 sm:$0xff]   ;;  %v684_v23 = vld [vmem:[%s962_s0 + $0x50] ss:$8 sps:$4 sm:$0xff]  }
   0x9   :  { %345 = vmatprep.mubr.bf16.mxu1 %v678_v12  ;;  %v685_v24 = vld [vmem:[%s962_s0 + $0x24] ss:$8 sps:$4 sm:$0xff]   ;;  %v689_v26 = vld [vmem:[%s962_s0 + $0x20] ss:$8 sps:$4 sm:$0xff]   ;;  %v691_v28 = vld [vmem:[%s962_s0 + $0x34] ss:$8 sps:$4 sm:$0xff]  }
   0xa   :  { %v687_v25 = vld [vmem:[%s962_s0 + $0x64] ss:$8 sps:$4 sm:$0xff]   ;;  %v690_v27 = vld [vmem:[%s962_s0 + $0x60] ss:$8 sps:$4 sm:$0xff]   ;;  %v693_v29 = vld [vmem:[%s962_s0 + $0x74] ss:$8 sps:$4 sm:$0xff]  }
   0xb   :  { %582 = vmatpush3.bf16.msra.mxu0 %v662_v5  ;;  %651 = vmatpush3.bf16.msra.mxu1 %v662_v5  ;;  %v695_v30 = vld [vmem:[%s962_s0 + $0x30] ss:$8 sps:$4 sm:$0xff]   ;;  %v826_v35 = vld [vmem:[%s963_s2] ss:$0 sm:$0xff]  ;;  %v476_v54 = vld [vmem:[%s965_s4 + $0x8] sm:$0xff] }
   0xc   :  { %583 = vmatprep.subr.bf16.mxu0 %v663_v6  ;;  %644 = vmatprep.subr.bf16.mxu1 %v663_v6  ;;  %v696_v31 = vld [vmem:[%s962_s0 + $0x70] ss:$8 sps:$4 sm:$0xff]   ;;  %v831_v41 = vld [vmem:[%s964_s3] ss:$0 sm:$0xff]  ;;  %v484_v55 = vld [vmem:[%s965_s4 + $0x48] sm:$0xff] }
   0xd   :  { %v475_v48 = vld [vmem:[%s965_s4] sm:$0xff] }
   0xe   :  { %v483_v49 = vld [vmem:[%s965_s4 + $0x40] sm:$0xff] }
   0xf   :  { %584 = vmatpush3.bf16.msra.mxu0 %v664_v7  ;;  %652 = vmatpush3.bf16.msra.mxu1 %v664_v7 }
  0x10   :  { %585 = vmatprep.subr.bf16.mxu0 %v665_v8  ;;  %645 = vmatprep.subr.bf16.mxu1 %v665_v8 }
  0x13   :  { %586 = vmatpush3.bf16.msra.mxu0 %v666_v9  ;;  %653 = vmatpush3.bf16.msra.mxu1 %v666_v9 }
  0x14   :  { %587 = vmatprep.subr.bf16.mxu0 %v667_v10  ;;  %646 = vmatprep.subr.bf16.mxu1 %v667_v10 }
  0x17   :  { %588 = vmatpush3.bf16.msra.mxu0 %v668_v13  ;;  %654 = vmatpush3.bf16.msra.mxu1 %v668_v13 }
  0x18   :  { %589 = vmatprep.subr.bf16.mxu0 %v669_v14  ;;  %647 = vmatprep.subr.bf16.mxu1 %v669_v14 }
  0x1b   :  { %590 = vmatpush3.bf16.msra.mxu0 %v670_v15  ;;  %655 = vmatpush3.bf16.msra.mxu1 %v670_v15 }
  0x1c   :  { %591 = vmatprep.subr.bf16.mxu0 %v671_v16  ;;  %648 = vmatprep.subr.bf16.mxu1 %v671_v16  ;;  %v477_v16 = vld [vmem:[%s965_s4 + $0x10] sm:$0xff] }
  0x1f   :  { %592 = vmatpush3.bf16.msra.mxu0 %v672_v17  ;;  %656 = vmatpush3.bf16.msra.mxu1 %v672_v17  ;;  %v485_v17 = vld [vmem:[%s965_s4 + $0x50] sm:$0xff] }
  0x22   :  { %314 = vmatmul.mubr.bf16.vlgmr.msra.gmra.mrb[0].mxu0 %v673_v18  ;;  %346 = vmatmul.mubr.bf16.vlgmr.msra.gmra.mrb[0].mxu1 %v676_v19 }
  0x23   :  { %321 = vmatprep.mubr.bf16.mxu0 %v679_v20  ;;  %353 = vmatprep.mubr.bf16.mxu1 %v681_v21 }
  0x2a   :  { %322 = vmatmul.mubr.bf16.gmra.mrb[4].mxu0 %v683_v22  ;;  %354 = vmatmul.mubr.bf16.gmra.mrb[4].mxu1 %v684_v23  ;;  %v478_v22 = vld [vmem:[%s965_s4 + $0x18] sm:$0xff] }
  0x2b   :  { %329 = vmatprep.mubr.bf16.mxu0 %v685_v24  ;;  %361 = vmatprep.mubr.bf16.mxu1 %v687_v25  ;;  %v486_v23 = vld [vmem:[%s965_s4 + $0x58] sm:$0xff] }
  0x32   :  { %330 = vmatmul.mubr.bf16.gmra.mrb[8].mxu0 %v689_v26  ;;  %362 = vmatmul.mubr.bf16.gmra.mrb[8].mxu1 %v690_v27 }
  0x33   :  { %337 = vmatprep.mubr.bf16.mxu0 %v691_v28  ;;  %369 = vmatprep.mubr.bf16.mxu1 %v693_v29 }
  0x3a   :  { %338 = vmatmul.mubr.bf16.gmra.mrb[12].mxu0 %v695_v30  ;;  %370 = vmatmul.mubr.bf16.gmra.mrb[12].mxu1 %v696_v31 }
  0xf5   :  { %v593_v32 = vpop.f32.mrb[0].mxu0  ;;  %v617_v33 = vpop.f32.mrb[0].mxu1 }
  0xf6   :  { %v594_v34 = vpop.f32.mrb[1].mxu0  ;;  %v618_v36 = vpop.f32.mrb[1].mxu1 }
  0xf7   :  { %v595_v37 = vadd.f32 %v594_v34, %v593_v32  ;;  %v619_v38 = vadd.f32 %v618_v36, %v617_v33  ;;  %v596_v39 = vpop.f32.mrb[2].mxu0  ;;  %v620_v40 = vpop.f32.mrb[2].mxu1 }
  0xf8   :  { %v597_v42 = vpop.f32.mrb[3].mxu0  ;;  %v621_v43 = vpop.f32.mrb[3].mxu1 }
  0xf9   :  { %v436_v44 = vmul.f32 %v595_v37, %v826_v35  ;;  %v444_v45 = vmul.f32 %v619_v38, %v826_v35  ;;  %v598_v46 = vadd.f32 %v597_v42, %v596_v39  ;;  %v622_v47 = vadd.f32 %v621_v43, %v620_v40 }
  0xfb   :  { %v459_v50 = vadd.f32 %v831_v41, %v436_v44  ;;  %v467_v51 = vadd.f32 %v831_v41, %v444_v45  ;;  %v437_v52 = vmul.f32 %v598_v46, %v826_v35  ;;  %v445_v53 = vmul.f32 %v622_v47, %v826_v35 }
  0xfd   :  { %v491_v56 = vadd.f32 %v475_v48, %v459_v50  ;;  %v499_v57 = vadd.f32 %v483_v49, %v467_v51  ;;  %v460_v58 = vadd.f32 %v831_v41, %v437_v52  ;;  %v468_v59 = vadd.f32 %v831_v41, %v445_v53  ;;  %v599_v60 = vpop.f32.mrb[4].mxu0  ;;  %v623_v61 = vpop.f32.mrb[4].mxu1  ;;  %v479_v48 = vld [vmem:[%s965_s4 + $0x20] sm:$0xff] }
  0xfe   :  { %v600_v62 = vpop.f32.mrb[5].mxu0  ;;  %v624_v63 = vpop.f32.mrb[5].mxu1  ;;  %v487_v49 = vld [vmem:[%s965_s4 + $0x60] sm:$0xff] }
  0xff   :  { %v507_v0 = vmax.f32 %v491_v56, 0.0  ;;  %v515_v1 = vmax.f32 %v499_v57, 0.0  ;;  %v492_v2 = vadd.f32 %v476_v54, %v460_v58  ;;  %v500_v3 = vadd.f32 %v484_v55, %v468_v59  ;;  %v602_v4 = vpop.f32.mrb[6].mxu0  ;;  %v626_v5 = vpop.f32.mrb[6].mxu1  ;;  %v480_v58 = vld [vmem:[%s965_s4 + $0x28] sm:$0xff] }
 0x100   :  { %v601_v6 = vadd.f32 %v600_v62, %v599_v60  ;;  %v625_v7 = vadd.f32 %v624_v63, %v623_v61  ;;  %v603_v8 = vpop.f32.mrb[7].mxu0  ;;  %v627_v9 = vpop.f32.mrb[7].mxu1  ;;  %v488_v59 = vld [vmem:[%s965_s4 + $0x68] sm:$0xff] }
 0x101   :  { %523 = vst [vmem:[%s966_s5] sm:$0xff] %v507_v0  ;;  %531 = vst [vmem:[%s966_s5 + $0x40] sm:$0xff] %v515_v1  ;;  %v508_v10 = vmax.f32 %v492_v2, 0.0  ;;  %v516_v11 = vmax.f32 %v500_v3, 0.0  ;;  %v604_v12 = vadd.f32 %v603_v8, %v602_v4  ;;  %v628_v13 = vadd.f32 %v627_v9, %v626_v5 }
 0x102   :  { %v438_v14 = vmul.f32 %v601_v6, %v826_v35  ;;  %v446_v15 = vmul.f32 %v625_v7, %v826_v35 }
 0x103   :  { %524 = vst [vmem:[%s966_s5 + $0x8] sm:$0xff] %v508_v10  ;;  %532 = vst [vmem:[%s966_s5 + $0x48] sm:$0xff] %v516_v11  ;;  %v439_v18 = vmul.f32 %v604_v12, %v826_v35  ;;  %v447_v19 = vmul.f32 %v628_v13, %v826_v35 }
 0x104   :  { %v461_v20 = vadd.f32 %v831_v41, %v438_v14  ;;  %v469_v21 = vadd.f32 %v831_v41, %v446_v15 }
 0x105   :  { %v462_v24 = vadd.f32 %v831_v41, %v439_v18  ;;  %v470_v25 = vadd.f32 %v831_v41, %v447_v19  ;;  %v605_v26 = vpop.f32.mrb[8].mxu0  ;;  %v629_v27 = vpop.f32.mrb[8].mxu1  ;;  %v481_v18 = vld [vmem:[%s965_s4 + $0x30] sm:$0xff] }
 0x106   :  { %v493_v28 = vadd.f32 %v477_v16, %v461_v20  ;;  %v501_v29 = vadd.f32 %v485_v17, %v469_v21  ;;  %v606_v30 = vpop.f32.mrb[9].mxu0  ;;  %v630_v31 = vpop.f32.mrb[9].mxu1  ;;  %v489_v19 = vld [vmem:[%s965_s4 + $0x70] sm:$0xff] }
 0x107   :  { %v494_v32 = vadd.f32 %v478_v22, %v462_v24  ;;  %v502_v33 = vadd.f32 %v486_v23, %v470_v25  ;;  %v607_v34 = vadd.f32 %v606_v30, %v605_v26  ;;  %v631_v36 = vadd.f32 %v630_v31, %v629_v27  ;;  %v608_v37 = vpop.f32.mrb[10].mxu0  ;;  %v632_v38 = vpop.f32.mrb[10].mxu1  ;;  %v482_v24 = vld [vmem:[%s965_s4 + $0x38] sm:$0xff] }
 0x108   :  { %v509_v39 = vmax.f32 %v493_v28, 0.0  ;;  %v517_v40 = vmax.f32 %v501_v29, 0.0  ;;  %v609_v42 = vpop.f32.mrb[11].mxu0  ;;  %v633_v43 = vpop.f32.mrb[11].mxu1  ;;  %v490_v25 = vld [vmem:[%s965_s4 + $0x78] sm:$0xff] }
 0x109   :  { %v510_v44 = vmax.f32 %v494_v32, 0.0  ;;  %v518_v45 = vmax.f32 %v502_v33, 0.0  ;;  %v440_v46 = vmul.f32 %v607_v34, %v826_v35  ;;  %v448_v47 = vmul.f32 %v631_v36, %v826_v35 }
 0x10a   :  { %525 = vst [vmem:[%s966_s5 + $0x10] sm:$0xff] %v509_v39  ;;  %533 = vst [vmem:[%s966_s5 + $0x50] sm:$0xff] %v517_v40  ;;  %v610_v50 = vadd.f32 %v609_v42, %v608_v37  ;;  %v634_v51 = vadd.f32 %v633_v43, %v632_v38 }
 0x10b   :  { %526 = vst [vmem:[%s966_s5 + $0x18] sm:$0xff] %v510_v44  ;;  %534 = vst [vmem:[%s966_s5 + $0x58] sm:$0xff] %v518_v45  ;;  %v463_v52 = vadd.f32 %v831_v41, %v440_v46  ;;  %v471_v53 = vadd.f32 %v831_v41, %v448_v47 }
 0x10c   :  { %v441_v54 = vmul.f32 %v610_v50, %v826_v35  ;;  %v449_v55 = vmul.f32 %v634_v51, %v826_v35 }
 0x10d   :  { %v495_v56 = vadd.f32 %v479_v48, %v463_v52  ;;  %v503_v57 = vadd.f32 %v487_v49, %v471_v53  ;;  %v611_v60 = vpop.f32.mrb[12].mxu0  ;;  %v635_v61 = vpop.f32.mrb[12].mxu1 }
 0x10e   :  { %v464_v62 = vadd.f32 %v831_v41, %v441_v54  ;;  %v472_v63 = vadd.f32 %v831_v41, %v449_v55  ;;  %v612_v0 = vpop.f32.mrb[13].mxu0  ;;  %v636_v1 = vpop.f32.mrb[13].mxu1 }
 0x10f   :  { %v511_v2 = vmax.f32 %v495_v56, 0.0  ;;  %v519_v3 = vmax.f32 %v503_v57, 0.0  ;;  %v613_v4 = vadd.f32 %v612_v0, %v611_v60  ;;  %v637_v5 = vadd.f32 %v636_v1, %v635_v61  ;;  %v614_v6 = vpop.f32.mrb[14].mxu0  ;;  %v638_v7 = vpop.f32.mrb[14].mxu1 }
 0x110   :  { %v496_v8 = vadd.f32 %v480_v58, %v464_v62  ;;  %v504_v9 = vadd.f32 %v488_v59, %v472_v63  ;;  %v615_v10 = vpop.f32.mrb[15].mxu0  ;;  %v639_v11 = vpop.f32.mrb[15].mxu1 }
 0x111   :  { %527 = vst [vmem:[%s966_s5 + $0x20] sm:$0xff] %v511_v2  ;;  %535 = vst [vmem:[%s966_s5 + $0x60] sm:$0xff] %v519_v3  ;;  %v442_v12 = vmul.f32 %v613_v4, %v826_v35  ;;  %v450_v13 = vmul.f32 %v637_v5, %v826_v35  ;;  %v616_v14 = vadd.f32 %v615_v10, %v614_v6 }
 0x112   :  { %v640_v15 = vadd.f32 %v639_v11, %v638_v7  ;;  %v512_v16 = vmax.f32 %v496_v8, 0.0  ;;  %v520_v17 = vmax.f32 %v504_v9, 0.0 }
 0x113   :  { %v465_v20 = vadd.f32 %v831_v41, %v442_v12  ;;  %v473_v21 = vadd.f32 %v831_v41, %v450_v13  ;;  %v443_v22 = vmul.f32 %v616_v14, %v826_v35 }
 0x114   :  { %v451_v23 = vmul.f32 %v640_v15, %v826_v35  ;;  %528 = vst [vmem:[%s966_s5 + $0x28] sm:$0xff] %v512_v16  ;;  %536 = vst [vmem:[%s966_s5 + $0x68] sm:$0xff] %v520_v17 }
 0x115   :  { %v497_v26 = vadd.f32 %v481_v18, %v465_v20  ;;  %v505_v27 = vadd.f32 %v489_v19, %v473_v21  ;;  %v466_v35 = vadd.f32 %v831_v41, %v443_v22 }
 0x116   :  { %v474_v28 = vadd.f32 %v831_v41, %v451_v23 }
 0x117   :  { %v513_v29 = vmax.f32 %v497_v26, 0.0  ;;  %v521_v30 = vmax.f32 %v505_v27, 0.0  ;;  %v498_v31 = vadd.f32 %v482_v24, %v466_v35 }
 0x118   :  { %v506_v32 = vadd.f32 %v490_v25, %v474_v28 }
 0x119   :  { %529 = vst [vmem:[%s966_s5 + $0x30] sm:$0xff] %v513_v29  ;;  %537 = vst [vmem:[%s966_s5 + $0x70] sm:$0xff] %v521_v30  ;;  %v514_v33 = vmax.f32 %v498_v31, 0.0 }
 0x11a   :  { %v522_v34 = vmax.f32 %v506_v32, 0.0 }
 0x11b   :  { %530 = vst [vmem:[%s966_s5 + $0x38] sm:$0xff] %v514_v33 }
 0x11c   :  { %538 = vst [vmem:[%s966_s5 + $0x78] sm:$0xff] %v522_v34 }

// kernel: erfnet_forward.102
= control target key start
LH: loop header
LB: loop body
LE: loop exit
PB: predicated region body
PF: predicated region fallthrough
CT: control target
= control target key end

     0   :  { %s89_s28 = smov 64   ;;  %vm73_vm0 = vcmask 517120   ;;  %s152_s0 = inlined_call_operand.vmem [shape: f32[4,2,2,128], index: 0, kind: input, shape index: {}]   ;;  %s153_s1 = inlined_call_operand.vmem [shape: f32[1,1,64], index: 1, kind: input, shape index: {}]   ;;  %s154_s2 = inlined_call_operand.vmem [shape: f32[1,1,64], index: 2, kind: input, shape index: {}]   ;;  %s155_s3 = inlined_call_operand.vmem [shape: f32[4,2,64], index: 3, kind: output, shape index: {}]  }
   0x1   :  { %v16_v0 = vld [vmem:[%s152_s0 + $0x8] sm:$0x3]  ;;  %v84_v1 = vld [vmem:[%s152_s0 + $0xa] sm:$0x3]  ;;  %v14_v2 = vld [vmem:[%s152_s0] sm:$0x3] }
   0x2   :  { %v25_v3 = vmax.f32 %v16_v0, %v84_v1  ;;  %v82_v4 = vld [vmem:[%s152_s0 + $0x2] sm:$0x3]  ;;  %v17_v5 = vld [vmem:[%s152_s0 + $0xc] sm:$0x3]  ;;  %v85_v6 = vld [vmem:[%s152_s0 + $0xe] sm:$0x3] }
   0x3   :  { %v23_v7 = vmax.f32 %v14_v2, %v82_v4  ;;  %v15_v8 = vld [vmem:[%s152_s0 + $0x4] sm:$0x3]  ;;  %v83_v9 = vld [vmem:[%s152_s0 + $0x6] sm:$0x3]  ;;  %v26_v10 = vmax.f32 %v17_v5, %v85_v6  ;;  %v86_v12 = vld [vmem:[%s153_s1] ss:$0 sm:$0xff] }
   0x4   :  { %35 = vrot.lane.b32.xlu1 %v25_v3, %s89_s28  ;;  %v24_v11 = vmax.f32 %v15_v8, %v83_v9  ;;  %v87_v16 = vld [vmem:[%s154_s2] ss:$0 sm:$0xff] }
   0x5   :  { %31 = vrot.lane.b32.xlu0 %v23_v7, %s89_s28 }
   0x8   :  { %37 = vrot.lane.b32.xlu1 %v26_v10, %s89_s28 }
   0x9   :  { %33 = vrot.lane.b32.xlu0 %v24_v11, %s89_s28 }
  0x76   :  { %v36_v13 = vpop.permute.xlu1 %35 }
  0x77   :  { %v45_v14 = vmax.f32 %v25_v3, %v36_v13  ;;  %v32_v15 = vpop.permute.xlu0 %31 }
  0x78   :  { %v43_v17 = vmax.f32 %v23_v7, %v32_v15 }
  0x79   :  { %v56_v18 = vmul.f32 %v86_v12, %v45_v14 }
  0x7a   :  { %v54_v19 = vmul.f32 %v86_v12, %v43_v17  ;;  %v38_v20 = vpop.permute.xlu1 %37 }
  0x7b   :  { %v67_v21 = vadd.f32 %v87_v16, %v56_v18  ;;  %v46_v22 = vmax.f32 %v26_v10, %v38_v20  ;;  %v34_v23 = vpop.permute.xlu0 %33 }
  0x7c   :  { %v65_v24 = vadd.f32 %v87_v16, %v54_v19  ;;  %v44_v25 = vmax.f32 %v24_v11, %v34_v23 }
  0x7d   :  { %v71_v26 = vmax.f32 %v67_v21, 0.0  ;;  %v57_v27 = vmul.f32 %v86_v12, %v46_v22 }
  0x7e   :  { %v69_v28 = vmax.f32 %v65_v24, 0.0  ;;  %v55_v29 = vmul.f32 %v86_v12, %v44_v25 }
  0x7f   :  { %76 = vst.msk [vmem:[%s155_s3 + $0x4] sm:$0x3] %vm73_vm0, %v71_v26  ;;  %v68_v30 = vadd.f32 %v87_v16, %v57_v27 }
  0x80   :  { %74 = vst.msk [vmem:[%s155_s3] sm:$0x3] %vm73_vm0, %v69_v28  ;;  %v66_v31 = vadd.f32 %v87_v16, %v55_v29 }
  0x81   :  { %v72_v32 = vmax.f32 %v68_v30, 0.0 }
  0x82   :  { %v70_v33 = vmax.f32 %v66_v31, 0.0 }
  0x83   :  { %77 = vst.msk [vmem:[%s155_s3 + $0x6] sm:$0x3] %vm73_vm0, %v72_v32 }
  0x84   :  { %75 = vst.msk [vmem:[%s155_s3 + $0x2] sm:$0x3] %vm73_vm0, %v70_v33 }

// kernel: erfnet_forward.101
= control target key start
LH: loop header
LB: loop body
LE: loop exit
PB: predicated region body
PF: predicated region fallthrough
CT: control target
= control target key end

     0   :  { %s1130_s15 = smov 0   ;;  %s1132_s16 = smov 0   ;;  %s1307_s0 = inlined_call_operand.vmem [shape: bf16[128,640], index: 0, kind: input, shape index: {}]   ;;  %s1308_s1 = inlined_call_operand.vmem [shape: bf16[640,128], index: 1, kind: input, shape index: {}]   ;;  %s1309_s2 = inlined_call_operand.vmem [shape: f32[1,128], index: 2, kind: input, shape index: {}]   ;;  %s1310_s3 = inlined_call_operand.vmem [shape: f32[1,128], index: 3, kind: input, shape index: {}]   ;;  %s1311_s4 = inlined_call_operand.vmem [shape: f32[128,128], index: 4, kind: output, shape index: {}]  }
   0x1   :  { %s1134_s17 = smov 0   ;;  %s1136_s18 = smov 0  }
   0x2   :  { %s1138_s19 = smov 0  }
   0x3 LB: > { %s26_s20 = sadd.s32 1, %s1098_s18  ;;  %p49_p1 = scmp.ne.s32.totalorder %s1090_s16, %s1086_s15  ;;  %s1102_s19 = sphi %s1138_s19, %s14_s19   ;;  %s1098_s18 = sphi %s1136_s18, %s1315_s18   ;;  %s1094_s17 = sphi %s1134_s17, %s1314_s17   ;;  %s1090_s16 = sphi %s1132_s16, %s1313_s16   ;;  %s1086_s15 = sphi %s1130_s15, %s1312_s15  }
   0x4   : > { %p27_p0 = scmp.ge.s32.totalorder %s26_s20, 5  ;;  %p50_p2 = scmp.eq.s32.totalorder %s1102_s19, 0 }
   0x5   : > { %s42_s22 = sadd.s32 1, %s1090_s16  ;;  %p912_p5 = scmp.ge.s32.totalorder %s1102_s19, 5 }
   0x6   : > { %s1317_s20 = smov (%p27_p0, %s26_s20), 0  ;;  %p51_p3 = por %p50_p2, %p49_p1 }
   0x7   : > { %s38_s21 = ssub.s32 %s1098_s18, %s1317_s20  ;;  %195 = sbr.rel (%p912_p5) target bundleno = 28 (0x1c), region = 24 }
   0x8   : > { %p40_p4 = scmp.eq.s32.totalorder %s38_s21, 0 }
   0xa   : > { %s1165_s23 = scalar_select %p40_p4, %s1090_s16, %s42_s22  }
   0xe   : > { %198 = sbr.rel (!%p51_p3) target bundleno = 28 (0x1c), region = 28  ;;  %s200_s24 = sand.u32 (%p51_p3), 1, %s1090_s16  }
   0xf   : > { %s914_s25 = sshll.u32 (%p51_p3), %s1098_s18, 2  ;;  %s913_s26 = sshll.u32 (%p51_p3), %s200_s24, 6 }
  0x10   : > { %s1173_s29 = scalar_lea.vmem (%p51_p3), %s1307_s0, %s914_s25  ;;  %s202_s30 = scalar_lea.vmem (%p51_p3), [#allocation3], %s913_s26 }
  0x11   : > { %v223_v0 = vld [vmem:[%s1173_s29] sm:$0xf] (%p51_p3)  ;;  %v225_v1 = vld [vmem:[%s1173_s29 + $0x14] sm:$0xf] (%p51_p3)  ;;  %v227_v2 = vld [vmem:[%s1173_s29 + $0x28] sm:$0xf] (%p51_p3) }
  0x12   : > { %224 = vst [vmem:[%s202_s30] sm:$0xf] (%p51_p3), %v223_v0  ;;  %226 = vst [vmem:[%s202_s30 + $0x4] sm:$0xf] (%p51_p3), %v225_v1  ;;  %v229_v3 = vld [vmem:[%s1173_s29 + $0x3c] sm:$0xf] (%p51_p3) }
  0x13   : > { %v231_v4 = vld [vmem:[%s1173_s29 + $0x50] sm:$0xf] (%p51_p3)  ;;  %228 = vst [vmem:[%s202_s30 + $0x8] sm:$0xf] (%p51_p3), %v227_v2  ;;  %230 = vst [vmem:[%s202_s30 + $0xc] sm:$0xf] (%p51_p3), %v229_v3 }
  0x14   : > { %232 = vst [vmem:[%s202_s30 + $0x10] sm:$0xf] (%p51_p3), %v231_v4  ;;  %v233_v5 = vld [vmem:[%s1173_s29 + $0x64] sm:$0xf] (%p51_p3)  ;;  %v235_v6 = vld [vmem:[%s1173_s29 + $0x78] sm:$0xf] (%p51_p3) }
  0x15   : > { %v237_v7 = vld [vmem:[%s1173_s29 + $0x8c] sm:$0xf]  ;;  %234 = vst [vmem:[%s202_s30 + $0x14] sm:$0xf] %v233_v5  ;;  %236 = vst [vmem:[%s202_s30 + $0x18] sm:$0xf] %v235_v6 }
  0x16   : > { %238 = vst [vmem:[%s202_s30 + $0x1c] sm:$0xf] %v237_v7  ;;  %v239_v8 = vld [vmem:[%s1173_s29 + $0xa0] sm:$0xf]  ;;  %v241_v9 = vld [vmem:[%s1173_s29 + $0xb4] sm:$0xf] }
  0x17   : > { %v243_v10 = vld [vmem:[%s1173_s29 + $0xc8] sm:$0xf]  ;;  %240 = vst [vmem:[%s202_s30 + $0x20] sm:$0xf] %v239_v8  ;;  %242 = vst [vmem:[%s202_s30 + $0x24] sm:$0xf] %v241_v9 }
  0x18   : > { %244 = vst [vmem:[%s202_s30 + $0x28] sm:$0xf] %v243_v10  ;;  %v245_v11 = vld [vmem:[%s1173_s29 + $0xdc] sm:$0xf]  ;;  %v247_v12 = vld [vmem:[%s1173_s29 + $0xf0] sm:$0xf] }
  0x19   : > { %v249_v13 = vld [vmem:[%s1173_s29 + $0x104] sm:$0xf]  ;;  %246 = vst [vmem:[%s202_s30 + $0x2c] sm:$0xf] %v245_v11  ;;  %248 = vst [vmem:[%s202_s30 + $0x30] sm:$0xf] %v247_v12 }
  0x1a   : > { %250 = vst [vmem:[%s202_s30 + $0x34] sm:$0xf] %v249_v13  ;;  %v251_v14 = vld [vmem:[%s1173_s29 + $0x118] sm:$0xf]  ;;  %v253_v15 = vld [vmem:[%s1173_s29 + $0x12c] sm:$0xf] }
  0x1b   : > { %252 = vst [vmem:[%s202_s30 + $0x38] sm:$0xf] %v251_v14  ;;  %254 = vst [vmem:[%s202_s30 + $0x3c] sm:$0xf] %v253_v15 }
  0x1c PF: > { %p915_p6 = scmp.ge.s32.totalorder %s1102_s19, 1  ;;  %p320_p7 = scmp.lt.s32.totalorder %s1102_s19, 6 }
  0x1e   : > { %p321_p8 = pnand %p915_p6, %p320_p7 }
  0x1f   : > { %s327_s5 = sand.u32 (!%p321_p8), 1, %s1086_s15   ;;  %s917_s6 = sshll.u32 (!%p321_p8), %s1094_s17, 4 }
  0x20   : > { %324 = sbr.rel (%p321_p8) target bundleno = 323 (0x143), region = 73  ;;  %s916_s7 = sshll.u32 (!%p321_p8), %s327_s5, 6 }
  0x21   : > { %p371_p9 = scmp.lt.s32.totalorder (!%p321_p8), %s917_s6, 79  ;;  %s1200_s12 = scalar_lea.vmem (!%p321_p8), [#allocation3], %s916_s7 }
  0x22   : > { %p919_p10 = scmp.ne.s32.totalorder (!%p321_p8), %s1094_s17, 0 }
  0x27   : > { %s1319_s6 = smov (!%p371_p9, %s917_s6), 79  ;;  %398 = sbr.rel (%p919_p10) target bundleno = 49 (0x31), region = 81 }
  0x28   : > { %s918_s8 = sshll.u32 %s1319_s6, 2  ;;  %v1104_v16 = vmov (!%p919_p10), 0.0  }
  0x29   : > { %s1198_s11 = scalar_lea.vmem %s1308_s1, %s918_s8  ;;  %399 = vst [vmem:[#allocation2] sm:$0xff] (!%p919_p10), %v1104_v16  ;;  %400 = vst [vmem:[#allocation2 + $0x8] sm:$0xff] (!%p919_p10), %v1104_v16 }
  0x2a   : > { %401 = vst [vmem:[#allocation2 + $0x10] sm:$0xff] (!%p919_p10), %v1104_v16  ;;  %402 = vst [vmem:[#allocation2 + $0x18] sm:$0xff] (!%p919_p10), %v1104_v16 }
  0x2b   : > { %403 = vst [vmem:[#allocation2 + $0x20] sm:$0xff] (!%p919_p10), %v1104_v16  ;;  %404 = vst [vmem:[#allocation2 + $0x28] sm:$0xff] (!%p919_p10), %v1104_v16 }
  0x2c   : > { %405 = vst [vmem:[#allocation2 + $0x30] sm:$0xff] (!%p919_p10), %v1104_v16  ;;  %406 = vst [vmem:[#allocation2 + $0x38] sm:$0xff] (!%p919_p10), %v1104_v16 }
  0x2d   : > { %407 = vst [vmem:[#allocation2 + $0x40] sm:$0xff] (!%p919_p10), %v1104_v16  ;;  %408 = vst [vmem:[#allocation2 + $0x48] sm:$0xff] (!%p919_p10), %v1104_v16 }
  0x2e   : > { %409 = vst [vmem:[#allocation2 + $0x50] sm:$0xff] %v1104_v16  ;;  %410 = vst [vmem:[#allocation2 + $0x58] sm:$0xff] %v1104_v16 }
  0x2f   : > { %411 = vst [vmem:[#allocation2 + $0x60] sm:$0xff] %v1104_v16  ;;  %412 = vst [vmem:[#allocation2 + $0x68] sm:$0xff] %v1104_v16 }
  0x30   : > { %413 = vst [vmem:[#allocation2 + $0x70] sm:$0xff] %v1104_v16  ;;  %414 = vst [vmem:[#allocation2 + $0x78] sm:$0xff] %v1104_v16 }
  0x31 PF: > { %v1048_v17 = vld [vmem:[%s1198_s11] sm:$0xff]   ;;  %v1049_v18 = vld [vmem:[%s1198_s11 + $0x8] sm:$0xff]   ;;  %v1050_v19 = vld [vmem:[%s1198_s11 + $0x10] sm:$0xff]   ;;  %p936_p11 = scmp.ne.s32.totalorder %s1094_s17, 4 }
  0x32   : > { %959 = vmatprep.subr.bf16.mxu0 %v1048_v17  ;;  %991 = vmatprep.subr.bf16.mxu1 %v1048_v17  ;;  %v1051_v20 = vld [vmem:[%s1198_s11 + $0x18] sm:$0xff]   ;;  %v1056_v21 = vld [vmem:[%s1200_s12] sm:$0xff]   ;;  %v1052_v23 = vld [vmem:[%s1198_s11 + $0x20] sm:$0xff]  }
  0x33   : > { %960 = vmatpush3.bf16.msra.mxu0 %v1048_v17  ;;  %999 = vmatpush3.bf16.msra.mxu1 %v1048_v17  ;;  %v1057_v22 = vld [vmem:[%s1200_s12 + $0x20] sm:$0xff]   ;;  %v1054_v25 = vld [vmem:[%s1198_s11 + $0x30] sm:$0xff]   ;;  %v1055_v26 = vld [vmem:[%s1198_s11 + $0x38] sm:$0xff]  }
  0x34   : > { %961 = vmatprep.subr.bf16.mxu0 %v1049_v18  ;;  %992 = vmatprep.subr.bf16.mxu1 %v1049_v18  ;;  %v1053_v24 = vld [vmem:[%s1198_s11 + $0x28] sm:$0xff]   ;;  %v1058_v27 = vld [vmem:[%s1200_s12 + $0x8] sm:$0xff]   ;;  %v1060_v29 = vld [vmem:[%s1200_s12 + $0x10] sm:$0xff]  }
  0x35   : > { %975 = vmatprep.mubr.bf16.mxu0 %v1056_v21  ;;  %983 = vmatprep.mubr.bf16.mxu1 %v1057_v22  ;;  %v1059_v28 = vld [vmem:[%s1200_s12 + $0x28] sm:$0xff]   ;;  %v1061_v30 = vld [vmem:[%s1200_s12 + $0x30] sm:$0xff]   ;;  %v1062_v31 = vld [vmem:[%s1200_s12 + $0x18] sm:$0xff]  }
  0x36   : > { %v1063_v32 = vld [vmem:[%s1200_s12 + $0x38] sm:$0xff]   ;;  %v417_v33 = vld [vmem:[#allocation2 + $0x10] sm:$0xff]  ;;  %v415_v35 = vld [vmem:[#allocation2] sm:$0xff] }
  0x37   : > { %962 = vmatpush3.bf16.msra.mxu0 %v1049_v18  ;;  %1000 = vmatpush3.bf16.msra.mxu1 %v1049_v18  ;;  %v425_v34 = vld [vmem:[#allocation2 + $0x50] sm:$0xff]  ;;  %v423_v36 = vld [vmem:[#allocation2 + $0x40] sm:$0xff]  ;;  %v418_v39 = vld [vmem:[#allocation2 + $0x18] sm:$0xff] }
  0x38   : > { %963 = vmatprep.subr.bf16.mxu0 %v1050_v19  ;;  %993 = vmatprep.subr.bf16.mxu1 %v1050_v19  ;;  %v426_v40 = vld [vmem:[#allocation2 + $0x58] sm:$0xff]  ;;  %v416_v45 = vld [vmem:[#allocation2 + $0x8] sm:$0xff]  ;;  %v421_v57 = vld [vmem:[#allocation2 + $0x30] sm:$0xff] }
  0x39   : > { %v424_v46 = vld [vmem:[#allocation2 + $0x48] sm:$0xff]  ;;  %v429_v58 = vld [vmem:[#allocation2 + $0x70] sm:$0xff]  ;;  %v419_v59 = vld [vmem:[#allocation2 + $0x20] sm:$0xff] }
  0x3a   : > { %v427_v60 = vld [vmem:[#allocation2 + $0x60] sm:$0xff]  ;;  %v422_v63 = vld [vmem:[#allocation2 + $0x38] sm:$0xff]  ;;  %v420_v5 = vld [vmem:[#allocation2 + $0x28] sm:$0xff] }
  0x3b   : > { %964 = vmatpush3.bf16.msra.mxu0 %v1050_v19  ;;  %1001 = vmatpush3.bf16.msra.mxu1 %v1050_v19  ;;  %v430_v0 = vld [vmem:[#allocation2 + $0x78] sm:$0xff]  ;;  %v428_v6 = vld [vmem:[#allocation2 + $0x68] sm:$0xff] }
  0x3c   : > { %965 = vmatprep.subr.bf16.mxu0 %v1051_v20  ;;  %994 = vmatprep.subr.bf16.mxu1 %v1051_v20  ;;  %v937_v18 = vld [vmem:[%s1309_s2] ss:$0 sm:$0xff] (!%p936_p11) }
  0x3d   : > { %v1226_v19 = vld [vmem:[%s1310_s3] ss:$0 sm:$0xff] (!%p936_p11) }
  0x3f   : > { %966 = vmatpush3.bf16.msra.mxu0 %v1051_v20  ;;  %1002 = vmatpush3.bf16.msra.mxu1 %v1051_v20 }
  0x40   : > { %967 = vmatprep.subr.bf16.mxu0 %v1052_v23  ;;  %995 = vmatprep.subr.bf16.mxu1 %v1052_v23 }
  0x43   : > { %968 = vmatpush3.bf16.msra.mxu0 %v1052_v23  ;;  %1003 = vmatpush3.bf16.msra.mxu1 %v1052_v23 }
  0x44   : > { %969 = vmatprep.subr.bf16.mxu0 %v1053_v24  ;;  %996 = vmatprep.subr.bf16.mxu1 %v1053_v24 }
  0x47   : > { %970 = vmatpush3.bf16.msra.mxu0 %v1053_v24  ;;  %1004 = vmatpush3.bf16.msra.mxu1 %v1053_v24 }
  0x48   : > { %971 = vmatprep.subr.bf16.mxu0 %v1054_v25  ;;  %997 = vmatprep.subr.bf16.mxu1 %v1054_v25 }
  0x4b   : > { %972 = vmatpush3.bf16.msra.mxu0 %v1054_v25  ;;  %1005 = vmatpush3.bf16.msra.mxu1 %v1054_v25 }
  0x4c   : > { %973 = vmatprep.subr.bf16.mxu0 %v1055_v26  ;;  %998 = vmatprep.subr.bf16.mxu1 %v1055_v26 }
  0x4f   : > { %974 = vmatpush3.bf16.msra.mxu0 %v1055_v26  ;;  %1006 = vmatpush3.bf16.msra.mxu1 %v1055_v26 }
  0x52   : > { %976 = vmatmul.mubr.bf16.vlgmr.msra.gmra.mrb[0].mxu0 %v1058_v27  ;;  %984 = vmatmul.mubr.bf16.vlgmr.msra.gmra.mrb[0].mxu1 %v1059_v28 }
  0x53   : > { %979 = vmatprep.mubr.bf16.mxu0 %v1060_v29  ;;  %987 = vmatprep.mubr.bf16.mxu1 %v1061_v30 }
  0x5a   : > { %980 = vmatmul.mubr.bf16.gmra.mrb[4].mxu0 %v1062_v31  ;;  %988 = vmatmul.mubr.bf16.gmra.mrb[4].mxu1 %v1063_v32 }
 0x125   : > { %v977_v37 = vpop.f32.mrb[0].mxu0  ;;  %v985_v38 = vpop.f32.mrb[0].mxu1 }
 0x126   : > { %v658_v41 = vadd.f32 %v977_v37, %v417_v33  ;;  %v666_v42 = vadd.f32 %v985_v38, %v425_v34  ;;  %v593_v43 = vpop.f32.mrb[1].mxu0  ;;  %v625_v44 = vpop.f32.mrb[1].mxu1 }
 0x127   : > { %v656_v47 = vadd.f32 %v593_v43, %v415_v35  ;;  %v664_v48 = vadd.f32 %v625_v44, %v423_v36  ;;  %v978_v49 = vpop.f32.mrb[2].mxu0  ;;  %v986_v50 = vpop.f32.mrb[2].mxu1 }
 0x128   : > { %674 = vst [vmem:[#allocation2 + $0x10] sm:$0xff] %v658_v41  ;;  %682 = vst [vmem:[#allocation2 + $0x50] sm:$0xff] %v666_v42  ;;  %v659_v51 = vadd.f32 %v978_v49, %v418_v39  ;;  %v667_v52 = vadd.f32 %v986_v50, %v426_v40  ;;  %v596_v53 = vpop.f32.mrb[3].mxu0  ;;  %v628_v54 = vpop.f32.mrb[3].mxu1 }
 0x129   : > { %672 = vst [vmem:[#allocation2] sm:$0xff] %v656_v47  ;;  %680 = vst [vmem:[#allocation2 + $0x40] sm:$0xff] %v664_v48  ;;  %v657_v55 = vadd.f32 %v596_v53, %v416_v45  ;;  %v665_v56 = vadd.f32 %v628_v54, %v424_v46 }
 0x12a   : > { %675 = vst [vmem:[#allocation2 + $0x18] sm:$0xff] %v659_v51  ;;  %683 = vst [vmem:[#allocation2 + $0x58] sm:$0xff] %v667_v52 }
 0x12b   : > { %673 = vst [vmem:[#allocation2 + $0x8] sm:$0xff] %v657_v55  ;;  %681 = vst [vmem:[#allocation2 + $0x48] sm:$0xff] %v665_v56 }
 0x12d   : > { %v981_v61 = vpop.f32.mrb[4].mxu0  ;;  %v989_v62 = vpop.f32.mrb[4].mxu1  ;;  %691 = sbr.rel (%p936_p11) target bundleno = 323 (0x143), region = 85 }
 0x12e   : > { %v662_v1 = vadd.f32 %v981_v61, %v421_v57  ;;  %v670_v2 = vadd.f32 %v989_v62, %v429_v58  ;;  %v609_v3 = vpop.f32.mrb[5].mxu0  ;;  %v641_v4 = vpop.f32.mrb[5].mxu1 }
 0x12f   : > { %v660_v7 = vadd.f32 %v609_v3, %v419_v59  ;;  %v668_v8 = vadd.f32 %v641_v4, %v427_v60  ;;  %v982_v9 = vpop.f32.mrb[6].mxu0  ;;  %v990_v10 = vpop.f32.mrb[6].mxu1  ;;  %v694_v22 = vld [vmem:[#allocation2 + $0x10] sm:$0xff] (!%p936_p11) }
 0x130   : > { %678 = vst [vmem:[#allocation2 + $0x30] sm:$0xff] %v662_v1  ;;  %686 = vst [vmem:[#allocation2 + $0x70] sm:$0xff] %v670_v2  ;;  %v663_v11 = vadd.f32 %v982_v9, %v422_v63  ;;  %v671_v12 = vadd.f32 %v990_v10, %v430_v0  ;;  %v612_v13 = vpop.f32.mrb[7].mxu0  ;;  %v644_v14 = vpop.f32.mrb[7].mxu1  ;;  %v692_v17 = vld [vmem:[#allocation2] sm:$0xff] (!%p936_p11)  ;;  %v717_v25 = vmul.f32 (!%p936_p11), %v937_v18, %v694_v22  ;;  %v702_v45 = vld [vmem:[#allocation2 + $0x50] sm:$0xff] (!%p936_p11) }
 0x131   : > { %676 = vst [vmem:[#allocation2 + $0x20] sm:$0xff] %v660_v7  ;;  %684 = vst [vmem:[#allocation2 + $0x60] sm:$0xff] %v668_v8  ;;  %v661_v15 = vadd.f32 %v612_v13, %v420_v5  ;;  %v669_v16 = vadd.f32 %v644_v14, %v428_v6  ;;  %v715_v20 = vmul.f32 (!%p936_p11), %v937_v18, %v692_v17  ;;  %v695_v23 = vld [vmem:[#allocation2 + $0x18] sm:$0xff] (!%p936_p11)  ;;  %v700_v39 = vld [vmem:[#allocation2 + $0x40] sm:$0xff] (!%p936_p11) }
 0x132   : > { %679 = vst [vmem:[#allocation2 + $0x38] sm:$0xff] %v663_v11  ;;  %687 = vst [vmem:[#allocation2 + $0x78] sm:$0xff] %v671_v12  ;;  %v693_v21 = vld [vmem:[#allocation2 + $0x8] sm:$0xff] (!%p936_p11)  ;;  %v718_v26 = vmul.f32 (!%p936_p11), %v937_v18, %v695_v23  ;;  %v740_v36 = vadd.f32 (!%p936_p11), %v1226_v19, %v717_v25  ;;  %v703_v46 = vld [vmem:[#allocation2 + $0x58] sm:$0xff] (!%p936_p11)  ;;  %v723_v57 = vmul.f32 (!%p936_p11), %v937_v18, %v700_v39 }
 0x133   : > { %677 = vst [vmem:[#allocation2 + $0x28] sm:$0xff] %v661_v15  ;;  %685 = vst [vmem:[#allocation2 + $0x68] sm:$0xff] %v669_v16  ;;  %v716_v24 = vmul.f32 (!%p936_p11), %v937_v18, %v693_v21  ;;  %v738_v30 = vadd.f32 (!%p936_p11), %v1226_v19, %v715_v20  ;;  %v701_v44 = vld [vmem:[#allocation2 + $0x48] sm:$0xff] (!%p936_p11)  ;;  %v725_v61 = vmul.f32 (!%p936_p11), %v937_v18, %v702_v45 }
 0x134   : > { %v741_v37 = vadd.f32 %v1226_v19, %v718_v26  ;;  %v756_v48 = vmax.f32 %v740_v36, 0.0  ;;  %v724_v60 = vmul.f32 %v937_v18, %v701_v44  ;;  %v726_v62 = vmul.f32 %v937_v18, %v703_v46 }
 0x135   : > { %v739_v35 = vadd.f32 %v1226_v19, %v716_v24  ;;  %v754_v40 = vmax.f32 %v738_v30, 0.0  ;;  %v746_v63 = vadd.f32 %v1226_v19, %v723_v57  ;;  %v748_v4 = vadd.f32 %v1226_v19, %v725_v61 }
 0x136   : > { %v757_v49 = vmax.f32 %v741_v37, 0.0  ;;  %772 = vst [vmem:[%s1311_s4 + $0x10] sm:$0xff] %v756_v48  ;;  %v747_v3 = vadd.f32 %v1226_v19, %v724_v60  ;;  %v749_v5 = vadd.f32 %v1226_v19, %v726_v62 }
 0x137   : > { %v698_v29 = vld [vmem:[#allocation2 + $0x30] sm:$0xff]  ;;  %v755_v47 = vmax.f32 %v739_v35, 0.0  ;;  %770 = vst [vmem:[%s1311_s4] sm:$0xff] %v754_v40  ;;  %v762_v7 = vmax.f32 %v746_v63, 0.0  ;;  %v764_v12 = vmax.f32 %v748_v4, 0.0 }
 0x138   : > { %v696_v27 = vld [vmem:[#allocation2 + $0x20] sm:$0xff]  ;;  %v721_v33 = vmul.f32 %v937_v18, %v698_v29  ;;  %v706_v53 = vld [vmem:[#allocation2 + $0x70] sm:$0xff]  ;;  %773 = vst [vmem:[%s1311_s4 + $0x18] sm:$0xff] %v757_v49  ;;  %v763_v11 = vmax.f32 %v747_v3, 0.0  ;;  %v765_v13 = vmax.f32 %v749_v5, 0.0 }
 0x139   : > { %v719_v31 = vmul.f32 %v937_v18, %v696_v27  ;;  %v699_v34 = vld [vmem:[#allocation2 + $0x38] sm:$0xff]  ;;  %v704_v51 = vld [vmem:[#allocation2 + $0x60] sm:$0xff]  ;;  %771 = vst [vmem:[%s1311_s4 + $0x8] sm:$0xff] %v755_v47  ;;  %v729_v2 = vmul.f32 %v937_v18, %v706_v53  ;;  %778 = vst [vmem:[%s1311_s4 + $0x40] sm:$0xff] %v762_v7 }
 0x13a   : > { %v697_v28 = vld [vmem:[#allocation2 + $0x28] sm:$0xff]  ;;  %v722_v38 = vmul.f32 %v937_v18, %v699_v34  ;;  %v744_v43 = vadd.f32 %v1226_v19, %v721_v33  ;;  %v707_v58 = vld [vmem:[#allocation2 + $0x78] sm:$0xff]  ;;  %v727_v0 = vmul.f32 %v937_v18, %v704_v51  ;;  %779 = vst [vmem:[%s1311_s4 + $0x48] sm:$0xff] %v763_v11  ;;  %780 = vst [vmem:[%s1311_s4 + $0x50] sm:$0xff] %v764_v12 }
 0x13b   : > { %v720_v32 = vmul.f32 %v937_v18, %v697_v28  ;;  %v742_v41 = vadd.f32 %v1226_v19, %v719_v31  ;;  %v705_v52 = vld [vmem:[#allocation2 + $0x68] sm:$0xff]  ;;  %v730_v6 = vmul.f32 %v937_v18, %v707_v58  ;;  %v752_v10 = vadd.f32 %v1226_v19, %v729_v2  ;;  %781 = vst [vmem:[%s1311_s4 + $0x58] sm:$0xff] %v765_v13 }
 0x13c   : > { %v745_v50 = vadd.f32 %v1226_v19, %v722_v38  ;;  %v760_v56 = vmax.f32 %v744_v43, 0.0  ;;  %v728_v1 = vmul.f32 %v937_v18, %v705_v52  ;;  %v750_v8 = vadd.f32 %v1226_v19, %v727_v0 }
 0x13d   : > { %v743_v42 = vadd.f32 %v1226_v19, %v720_v32  ;;  %v758_v54 = vmax.f32 %v742_v41, 0.0  ;;  %v753_v14 = vadd.f32 %v1226_v19, %v730_v6  ;;  %v768_v17 = vmax.f32 %v752_v10, 0.0 }
 0x13e   : > { %v761_v59 = vmax.f32 %v745_v50, 0.0  ;;  %776 = vst [vmem:[%s1311_s4 + $0x30] sm:$0xff] %v760_v56  ;;  %v751_v9 = vadd.f32 %v1226_v19, %v728_v1  ;;  %v766_v15 = vmax.f32 %v750_v8, 0.0 }
 0x13f   : > { %v759_v55 = vmax.f32 %v743_v42, 0.0  ;;  %774 = vst [vmem:[%s1311_s4 + $0x20] sm:$0xff] %v758_v54  ;;  %v769_v18 = vmax.f32 %v753_v14, 0.0  ;;  %784 = vst [vmem:[%s1311_s4 + $0x70] sm:$0xff] %v768_v17 }
 0x140   : > { %777 = vst [vmem:[%s1311_s4 + $0x38] sm:$0xff] %v761_v59  ;;  %v767_v16 = vmax.f32 %v751_v9, 0.0  ;;  %782 = vst [vmem:[%s1311_s4 + $0x60] sm:$0xff] %v766_v15 }
 0x141   : > { %775 = vst [vmem:[%s1311_s4 + $0x28] sm:$0xff] %v759_v55  ;;  %785 = vst [vmem:[%s1311_s4 + $0x78] sm:$0xff] %v769_v18 }
 0x142   : > { %783 = vst [vmem:[%s1311_s4 + $0x68] sm:$0xff] %v767_v16 }
 0x143 PF: > { %s14_s19 = sadd.s32 1, %s1102_s19   ;;  %s1312_s15 = smov %s1090_s16 }
 0x144   : > { %p11_p12 = scmp.ge.s32.totalorder %s14_s19, 7   ;;  %s1313_s16 = smov %s1165_s23 }
 0x145   : > { %s1314_s17 = smov %s1098_s18  ;;  %s1315_s18 = smov %s1317_s20 }
 0x146   :  { %13 = sbr.rel (!%p11_p12) target bundleno = 3 (0x3), region = 129 }

// kernel: erfnet_forward.103
= control target key start
LH: loop header
LB: loop body
LE: loop exit
PB: predicated region body
PF: predicated region fallthrough
CT: control target
= control target key end

     0   :  { %s1130_s15 = smov 0   ;;  %s1132_s16 = smov 0   ;;  %s1307_s0 = inlined_call_operand.vmem [shape: bf16[128,384], index: 0, kind: input, shape index: {}]   ;;  %s1308_s1 = inlined_call_operand.vmem [shape: bf16[384,128], index: 1, kind: input, shape index: {}]   ;;  %s1309_s2 = inlined_call_operand.vmem [shape: f32[1,128], index: 2, kind: input, shape index: {}]   ;;  %s1310_s3 = inlined_call_operand.vmem [shape: f32[1,128], index: 3, kind: input, shape index: {}]   ;;  %s1311_s4 = inlined_call_operand.vmem [shape: f32[128,128], index: 4, kind: output, shape index: {}]  }
   0x1   :  { %s1134_s17 = smov 0   ;;  %s1136_s18 = smov 0  }
   0x2   :  { %s1138_s19 = smov 0  }
   0x3 LB: > { %s26_s20 = sadd.s32 1, %s1098_s18  ;;  %p49_p1 = scmp.ne.s32.totalorder %s1090_s16, %s1086_s15  ;;  %s1102_s19 = sphi %s1138_s19, %s14_s19   ;;  %s1098_s18 = sphi %s1136_s18, %s1315_s18   ;;  %s1094_s17 = sphi %s1134_s17, %s1314_s17   ;;  %s1090_s16 = sphi %s1132_s16, %s1313_s16   ;;  %s1086_s15 = sphi %s1130_s15, %s1312_s15  }
   0x4   : > { %p27_p0 = scmp.ge.s32.totalorder %s26_s20, 3  ;;  %p50_p2 = scmp.eq.s32.totalorder %s1102_s19, 0 }
   0x5   : > { %s42_s22 = sadd.s32 1, %s1090_s16  ;;  %p912_p5 = scmp.ge.s32.totalorder %s1102_s19, 3 }
   0x6   : > { %s1317_s20 = smov (%p27_p0, %s26_s20), 0  ;;  %p51_p3 = por %p50_p2, %p49_p1 }
   0x7   : > { %s38_s21 = ssub.s32 %s1098_s18, %s1317_s20  ;;  %195 = sbr.rel (%p912_p5) target bundleno = 28 (0x1c), region = 24 }
   0x8   : > { %p40_p4 = scmp.eq.s32.totalorder %s38_s21, 0 }
   0xa   : > { %s1165_s23 = scalar_select %p40_p4, %s1090_s16, %s42_s22  }
   0xe   : > { %198 = sbr.rel (!%p51_p3) target bundleno = 28 (0x1c), region = 28  ;;  %s200_s24 = sand.u32 (%p51_p3), 1, %s1090_s16  }
   0xf   : > { %s914_s25 = sshll.u32 (%p51_p3), %s1098_s18, 2  ;;  %s913_s26 = sshll.u32 (%p51_p3), %s200_s24, 6 }
  0x10   : > { %s1173_s29 = scalar_lea.vmem (%p51_p3), %s1307_s0, %s914_s25  ;;  %s202_s30 = scalar_lea.vmem (%p51_p3), [#allocation3], %s913_s26 }
  0x11   : > { %v223_v0 = vld [vmem:[%s1173_s29] sm:$0xf] (%p51_p3)  ;;  %v225_v1 = vld [vmem:[%s1173_s29 + $0xc] sm:$0xf] (%p51_p3)  ;;  %v227_v2 = vld [vmem:[%s1173_s29 + $0x18] sm:$0xf] (%p51_p3) }
  0x12   : > { %224 = vst [vmem:[%s202_s30] sm:$0xf] (%p51_p3), %v223_v0  ;;  %226 = vst [vmem:[%s202_s30 + $0x4] sm:$0xf] (%p51_p3), %v225_v1  ;;  %v229_v3 = vld [vmem:[%s1173_s29 + $0x24] sm:$0xf] (%p51_p3) }
  0x13   : > { %v231_v4 = vld [vmem:[%s1173_s29 + $0x30] sm:$0xf] (%p51_p3)  ;;  %228 = vst [vmem:[%s202_s30 + $0x8] sm:$0xf] (%p51_p3), %v227_v2  ;;  %230 = vst [vmem:[%s202_s30 + $0xc] sm:$0xf] (%p51_p3), %v229_v3 }
  0x14   : > { %232 = vst [vmem:[%s202_s30 + $0x10] sm:$0xf] (%p51_p3), %v231_v4  ;;  %v233_v5 = vld [vmem:[%s1173_s29 + $0x3c] sm:$0xf] (%p51_p3)  ;;  %v235_v6 = vld [vmem:[%s1173_s29 + $0x48] sm:$0xf] (%p51_p3) }
  0x15   : > { %v237_v7 = vld [vmem:[%s1173_s29 + $0x54] sm:$0xf]  ;;  %234 = vst [vmem:[%s202_s30 + $0x14] sm:$0xf] %v233_v5  ;;  %236 = vst [vmem:[%s202_s30 + $0x18] sm:$0xf] %v235_v6 }
  0x16   : > { %238 = vst [vmem:[%s202_s30 + $0x1c] sm:$0xf] %v237_v7  ;;  %v239_v8 = vld [vmem:[%s1173_s29 + $0x60] sm:$0xf]  ;;  %v241_v9 = vld [vmem:[%s1173_s29 + $0x6c] sm:$0xf] }
  0x17   : > { %v243_v10 = vld [vmem:[%s1173_s29 + $0x78] sm:$0xf]  ;;  %240 = vst [vmem:[%s202_s30 + $0x20] sm:$0xf] %v239_v8  ;;  %242 = vst [vmem:[%s202_s30 + $0x24] sm:$0xf] %v241_v9 }
  0x18   : > { %244 = vst [vmem:[%s202_s30 + $0x28] sm:$0xf] %v243_v10  ;;  %v245_v11 = vld [vmem:[%s1173_s29 + $0x84] sm:$0xf]  ;;  %v247_v12 = vld [vmem:[%s1173_s29 + $0x90] sm:$0xf] }
  0x19   : > { %v249_v13 = vld [vmem:[%s1173_s29 + $0x9c] sm:$0xf]  ;;  %246 = vst [vmem:[%s202_s30 + $0x2c] sm:$0xf] %v245_v11  ;;  %248 = vst [vmem:[%s202_s30 + $0x30] sm:$0xf] %v247_v12 }
  0x1a   : > { %250 = vst [vmem:[%s202_s30 + $0x34] sm:$0xf] %v249_v13  ;;  %v251_v14 = vld [vmem:[%s1173_s29 + $0xa8] sm:$0xf]  ;;  %v253_v15 = vld [vmem:[%s1173_s29 + $0xb4] sm:$0xf] }
  0x1b   : > { %252 = vst [vmem:[%s202_s30 + $0x38] sm:$0xf] %v251_v14  ;;  %254 = vst [vmem:[%s202_s30 + $0x3c] sm:$0xf] %v253_v15 }
  0x1c PF: > { %p915_p6 = scmp.ge.s32.totalorder %s1102_s19, 1  ;;  %p320_p7 = scmp.lt.s32.totalorder %s1102_s19, 4 }
  0x1e   : > { %p321_p8 = pnand %p915_p6, %p320_p7 }
  0x1f   : > { %s327_s5 = sand.u32 (!%p321_p8), 1, %s1086_s15   ;;  %s917_s6 = sshll.u32 (!%p321_p8), %s1094_s17, 4 }
  0x20   : > { %324 = sbr.rel (%p321_p8) target bundleno = 323 (0x143), region = 73  ;;  %s916_s7 = sshll.u32 (!%p321_p8), %s327_s5, 6 }
  0x21   : > { %p371_p9 = scmp.lt.s32.totalorder (!%p321_p8), %s917_s6, 47  ;;  %s1200_s12 = scalar_lea.vmem (!%p321_p8), [#allocation3], %s916_s7 }
  0x22   : > { %p919_p10 = scmp.ne.s32.totalorder (!%p321_p8), %s1094_s17, 0 }
  0x27   : > { %s1319_s6 = smov (!%p371_p9, %s917_s6), 47  ;;  %398 = sbr.rel (%p919_p10) target bundleno = 49 (0x31), region = 81 }
  0x28   : > { %s918_s8 = sshll.u32 %s1319_s6, 2  ;;  %v1104_v16 = vmov (!%p919_p10), 0.0  }
  0x29   : > { %s1198_s11 = scalar_lea.vmem %s1308_s1, %s918_s8  ;;  %399 = vst [vmem:[#allocation2] sm:$0xff] (!%p919_p10), %v1104_v16  ;;  %400 = vst [vmem:[#allocation2 + $0x8] sm:$0xff] (!%p919_p10), %v1104_v16 }
  0x2a   : > { %401 = vst [vmem:[#allocation2 + $0x10] sm:$0xff] (!%p919_p10), %v1104_v16  ;;  %402 = vst [vmem:[#allocation2 + $0x18] sm:$0xff] (!%p919_p10), %v1104_v16 }
  0x2b   : > { %403 = vst [vmem:[#allocation2 + $0x20] sm:$0xff] (!%p919_p10), %v1104_v16  ;;  %404 = vst [vmem:[#allocation2 + $0x28] sm:$0xff] (!%p919_p10), %v1104_v16 }
  0x2c   : > { %405 = vst [vmem:[#allocation2 + $0x30] sm:$0xff] (!%p919_p10), %v1104_v16  ;;  %406 = vst [vmem:[#allocation2 + $0x38] sm:$0xff] (!%p919_p10), %v1104_v16 }
  0x2d   : > { %407 = vst [vmem:[#allocation2 + $0x40] sm:$0xff] (!%p919_p10), %v1104_v16  ;;  %408 = vst [vmem:[#allocation2 + $0x48] sm:$0xff] (!%p919_p10), %v1104_v16 }
  0x2e   : > { %409 = vst [vmem:[#allocation2 + $0x50] sm:$0xff] %v1104_v16  ;;  %410 = vst [vmem:[#allocation2 + $0x58] sm:$0xff] %v1104_v16 }
  0x2f   : > { %411 = vst [vmem:[#allocation2 + $0x60] sm:$0xff] %v1104_v16  ;;  %412 = vst [vmem:[#allocation2 + $0x68] sm:$0xff] %v1104_v16 }
  0x30   : > { %413 = vst [vmem:[#allocation2 + $0x70] sm:$0xff] %v1104_v16  ;;  %414 = vst [vmem:[#allocation2 + $0x78] sm:$0xff] %v1104_v16 }
  0x31 PF: > { %v1048_v17 = vld [vmem:[%s1198_s11] sm:$0xff]   ;;  %v1049_v18 = vld [vmem:[%s1198_s11 + $0x8] sm:$0xff]   ;;  %v1050_v19 = vld [vmem:[%s1198_s11 + $0x10] sm:$0xff]   ;;  %p936_p11 = scmp.ne.s32.totalorder %s1094_s17, 2 }
  0x32   : > { %959 = vmatprep.subr.bf16.mxu0 %v1048_v17  ;;  %991 = vmatprep.subr.bf16.mxu1 %v1048_v17  ;;  %v1051_v20 = vld [vmem:[%s1198_s11 + $0x18] sm:$0xff]   ;;  %v1056_v21 = vld [vmem:[%s1200_s12] sm:$0xff]   ;;  %v1052_v23 = vld [vmem:[%s1198_s11 + $0x20] sm:$0xff]  }
  0x33   : > { %960 = vmatpush3.bf16.msra.mxu0 %v1048_v17  ;;  %999 = vmatpush3.bf16.msra.mxu1 %v1048_v17  ;;  %v1057_v22 = vld [vmem:[%s1200_s12 + $0x20] sm:$0xff]   ;;  %v1054_v25 = vld [vmem:[%s1198_s11 + $0x30] sm:$0xff]   ;;  %v1055_v26 = vld [vmem:[%s1198_s11 + $0x38] sm:$0xff]  }
  0x34   : > { %961 = vmatprep.subr.bf16.mxu0 %v1049_v18  ;;  %992 = vmatprep.subr.bf16.mxu1 %v1049_v18  ;;  %v1053_v24 = vld [vmem:[%s1198_s11 + $0x28] sm:$0xff]   ;;  %v1058_v27 = vld [vmem:[%s1200_s12 + $0x8] sm:$0xff]   ;;  %v1060_v29 = vld [vmem:[%s1200_s12 + $0x10] sm:$0xff]  }
  0x35   : > { %975 = vmatprep.mubr.bf16.mxu0 %v1056_v21  ;;  %983 = vmatprep.mubr.bf16.mxu1 %v1057_v22  ;;  %v1059_v28 = vld [vmem:[%s1200_s12 + $0x28] sm:$0xff]   ;;  %v1061_v30 = vld [vmem:[%s1200_s12 + $0x30] sm:$0xff]   ;;  %v1062_v31 = vld [vmem:[%s1200_s12 + $0x18] sm:$0xff]  }
  0x36   : > { %v1063_v32 = vld [vmem:[%s1200_s12 + $0x38] sm:$0xff]   ;;  %v417_v33 = vld [vmem:[#allocation2 + $0x10] sm:$0xff]  ;;  %v415_v35 = vld [vmem:[#allocation2] sm:$0xff] }
  0x37   : > { %962 = vmatpush3.bf16.msra.mxu0 %v1049_v18  ;;  %1000 = vmatpush3.bf16.msra.mxu1 %v1049_v18  ;;  %v425_v34 = vld [vmem:[#allocation2 + $0x50] sm:$0xff]  ;;  %v423_v36 = vld [vmem:[#allocation2 + $0x40] sm:$0xff]  ;;  %v418_v39 = vld [vmem:[#allocation2 + $0x18] sm:$0xff] }
  0x38   : > { %963 = vmatprep.subr.bf16.mxu0 %v1050_v19  ;;  %993 = vmatprep.subr.bf16.mxu1 %v1050_v19  ;;  %v426_v40 = vld [vmem:[#allocation2 + $0x58] sm:$0xff]  ;;  %v416_v45 = vld [vmem:[#allocation2 + $0x8] sm:$0xff]  ;;  %v421_v57 = vld [vmem:[#allocation2 + $0x30] sm:$0xff] }
  0x39   : > { %v424_v46 = vld [vmem:[#allocation2 + $0x48] sm:$0xff]  ;;  %v429_v58 = vld [vmem:[#allocation2 + $0x70] sm:$0xff]  ;;  %v419_v59 = vld [vmem:[#allocation2 + $0x20] sm:$0xff] }
  0x3a   : > { %v427_v60 = vld [vmem:[#allocation2 + $0x60] sm:$0xff]  ;;  %v422_v63 = vld [vmem:[#allocation2 + $0x38] sm:$0xff]  ;;  %v420_v5 = vld [vmem:[#allocation2 + $0x28] sm:$0xff] }
  0x3b   : > { %964 = vmatpush3.bf16.msra.mxu0 %v1050_v19  ;;  %1001 = vmatpush3.bf16.msra.mxu1 %v1050_v19  ;;  %v430_v0 = vld [vmem:[#allocation2 + $0x78] sm:$0xff]  ;;  %v428_v6 = vld [vmem:[#allocation2 + $0x68] sm:$0xff] }
  0x3c   : > { %965 = vmatprep.subr.bf16.mxu0 %v1051_v20  ;;  %994 = vmatprep.subr.bf16.mxu1 %v1051_v20  ;;  %v937_v18 = vld [vmem:[%s1309_s2] ss:$0 sm:$0xff] (!%p936_p11) }
  0x3d   : > { %v1226_v19 = vld [vmem:[%s1310_s3] ss:$0 sm:$0xff] (!%p936_p11) }
  0x3f   : > { %966 = vmatpush3.bf16.msra.mxu0 %v1051_v20  ;;  %1002 = vmatpush3.bf16.msra.mxu1 %v1051_v20 }
  0x40   : > { %967 = vmatprep.subr.bf16.mxu0 %v1052_v23  ;;  %995 = vmatprep.subr.bf16.mxu1 %v1052_v23 }
  0x43   : > { %968 = vmatpush3.bf16.msra.mxu0 %v1052_v23  ;;  %1003 = vmatpush3.bf16.msra.mxu1 %v1052_v23 }
  0x44   : > { %969 = vmatprep.subr.bf16.mxu0 %v1053_v24  ;;  %996 = vmatprep.subr.bf16.mxu1 %v1053_v24 }
  0x47   : > { %970 = vmatpush3.bf16.msra.mxu0 %v1053_v24  ;;  %1004 = vmatpush3.bf16.msra.mxu1 %v1053_v24 }
  0x48   : > { %971 = vmatprep.subr.bf16.mxu0 %v1054_v25  ;;  %997 = vmatprep.subr.bf16.mxu1 %v1054_v25 }
  0x4b   : > { %972 = vmatpush3.bf16.msra.mxu0 %v1054_v25  ;;  %1005 = vmatpush3.bf16.msra.mxu1 %v1054_v25 }
  0x4c   : > { %973 = vmatprep.subr.bf16.mxu0 %v1055_v26  ;;  %998 = vmatprep.subr.bf16.mxu1 %v1055_v26 }
  0x4f   : > { %974 = vmatpush3.bf16.msra.mxu0 %v1055_v26  ;;  %1006 = vmatpush3.bf16.msra.mxu1 %v1055_v26 }
  0x52   : > { %976 = vmatmul.mubr.bf16.vlgmr.msra.gmra.mrb[0].mxu0 %v1058_v27  ;;  %984 = vmatmul.mubr.bf16.vlgmr.msra.gmra.mrb[0].mxu1 %v1059_v28 }
  0x53   : > { %979 = vmatprep.mubr.bf16.mxu0 %v1060_v29  ;;  %987 = vmatprep.mubr.bf16.mxu1 %v1061_v30 }
  0x5a   : > { %980 = vmatmul.mubr.bf16.gmra.mrb[4].mxu0 %v1062_v31  ;;  %988 = vmatmul.mubr.bf16.gmra.mrb[4].mxu1 %v1063_v32 }
 0x125   : > { %v977_v37 = vpop.f32.mrb[0].mxu0  ;;  %v985_v38 = vpop.f32.mrb[0].mxu1 }
 0x126   : > { %v658_v41 = vadd.f32 %v977_v37, %v417_v33  ;;  %v666_v42 = vadd.f32 %v985_v38, %v425_v34  ;;  %v593_v43 = vpop.f32.mrb[1].mxu0  ;;  %v625_v44 = vpop.f32.mrb[1].mxu1 }
 0x127   : > { %v656_v47 = vadd.f32 %v593_v43, %v415_v35  ;;  %v664_v48 = vadd.f32 %v625_v44, %v423_v36  ;;  %v978_v49 = vpop.f32.mrb[2].mxu0  ;;  %v986_v50 = vpop.f32.mrb[2].mxu1 }
 0x128   : > { %674 = vst [vmem:[#allocation2 + $0x10] sm:$0xff] %v658_v41  ;;  %682 = vst [vmem:[#allocation2 + $0x50] sm:$0xff] %v666_v42  ;;  %v659_v51 = vadd.f32 %v978_v49, %v418_v39  ;;  %v667_v52 = vadd.f32 %v986_v50, %v426_v40  ;;  %v596_v53 = vpop.f32.mrb[3].mxu0  ;;  %v628_v54 = vpop.f32.mrb[3].mxu1 }
 0x129   : > { %672 = vst [vmem:[#allocation2] sm:$0xff] %v656_v47  ;;  %680 = vst [vmem:[#allocation2 + $0x40] sm:$0xff] %v664_v48  ;;  %v657_v55 = vadd.f32 %v596_v53, %v416_v45  ;;  %v665_v56 = vadd.f32 %v628_v54, %v424_v46 }
 0x12a   : > { %675 = vst [vmem:[#allocation2 + $0x18] sm:$0xff] %v659_v51  ;;  %683 = vst [vmem:[#allocation2 + $0x58] sm:$0xff] %v667_v52 }
 0x12b   : > { %673 = vst [vmem:[#allocation2 + $0x8] sm:$0xff] %v657_v55  ;;  %681 = vst [vmem:[#allocation2 + $0x48] sm:$0xff] %v665_v56 }
 0x12d   : > { %v981_v61 = vpop.f32.mrb[4].mxu0  ;;  %v989_v62 = vpop.f32.mrb[4].mxu1  ;;  %691 = sbr.rel (%p936_p11) target bundleno = 323 (0x143), region = 85 }
 0x12e   : > { %v662_v1 = vadd.f32 %v981_v61, %v421_v57  ;;  %v670_v2 = vadd.f32 %v989_v62, %v429_v58  ;;  %v609_v3 = vpop.f32.mrb[5].mxu0  ;;  %v641_v4 = vpop.f32.mrb[5].mxu1 }
 0x12f   : > { %v660_v7 = vadd.f32 %v609_v3, %v419_v59  ;;  %v668_v8 = vadd.f32 %v641_v4, %v427_v60  ;;  %v982_v9 = vpop.f32.mrb[6].mxu0  ;;  %v990_v10 = vpop.f32.mrb[6].mxu1  ;;  %v694_v22 = vld [vmem:[#allocation2 + $0x10] sm:$0xff] (!%p936_p11) }
 0x130   : > { %678 = vst [vmem:[#allocation2 + $0x30] sm:$0xff] %v662_v1  ;;  %686 = vst [vmem:[#allocation2 + $0x70] sm:$0xff] %v670_v2  ;;  %v663_v11 = vadd.f32 %v982_v9, %v422_v63  ;;  %v671_v12 = vadd.f32 %v990_v10, %v430_v0  ;;  %v612_v13 = vpop.f32.mrb[7].mxu0  ;;  %v644_v14 = vpop.f32.mrb[7].mxu1  ;;  %v692_v17 = vld [vmem:[#allocation2] sm:$0xff] (!%p936_p11)  ;;  %v717_v25 = vmul.f32 (!%p936_p11), %v937_v18, %v694_v22  ;;  %v702_v45 = vld [vmem:[#allocation2 + $0x50] sm:$0xff] (!%p936_p11) }
 0x131   : > { %676 = vst [vmem:[#allocation2 + $0x20] sm:$0xff] %v660_v7  ;;  %684 = vst [vmem:[#allocation2 + $0x60] sm:$0xff] %v668_v8  ;;  %v661_v15 = vadd.f32 %v612_v13, %v420_v5  ;;  %v669_v16 = vadd.f32 %v644_v14, %v428_v6  ;;  %v715_v20 = vmul.f32 (!%p936_p11), %v937_v18, %v692_v17  ;;  %v695_v23 = vld [vmem:[#allocation2 + $0x18] sm:$0xff] (!%p936_p11)  ;;  %v700_v39 = vld [vmem:[#allocation2 + $0x40] sm:$0xff] (!%p936_p11) }
 0x132   : > { %679 = vst [vmem:[#allocation2 + $0x38] sm:$0xff] %v663_v11  ;;  %687 = vst [vmem:[#allocation2 + $0x78] sm:$0xff] %v671_v12  ;;  %v693_v21 = vld [vmem:[#allocation2 + $0x8] sm:$0xff] (!%p936_p11)  ;;  %v718_v26 = vmul.f32 (!%p936_p11), %v937_v18, %v695_v23  ;;  %v740_v36 = vadd.f32 (!%p936_p11), %v1226_v19, %v717_v25  ;;  %v703_v46 = vld [vmem:[#allocation2 + $0x58] sm:$0xff] (!%p936_p11)  ;;  %v723_v57 = vmul.f32 (!%p936_p11), %v937_v18, %v700_v39 }
 0x133   : > { %677 = vst [vmem:[#allocation2 + $0x28] sm:$0xff] %v661_v15  ;;  %685 = vst [vmem:[#allocation2 + $0x68] sm:$0xff] %v669_v16  ;;  %v716_v24 = vmul.f32 (!%p936_p11), %v937_v18, %v693_v21  ;;  %v738_v30 = vadd.f32 (!%p936_p11), %v1226_v19, %v715_v20  ;;  %v701_v44 = vld [vmem:[#allocation2 + $0x48] sm:$0xff] (!%p936_p11)  ;;  %v725_v61 = vmul.f32 (!%p936_p11), %v937_v18, %v702_v45 }
 0x134   : > { %v741_v37 = vadd.f32 %v1226_v19, %v718_v26  ;;  %v756_v48 = vmax.f32 %v740_v36, 0.0  ;;  %v724_v60 = vmul.f32 %v937_v18, %v701_v44  ;;  %v726_v62 = vmul.f32 %v937_v18, %v703_v46 }
 0x135   : > { %v739_v35 = vadd.f32 %v1226_v19, %v716_v24  ;;  %v754_v40 = vmax.f32 %v738_v30, 0.0  ;;  %v746_v63 = vadd.f32 %v1226_v19, %v723_v57  ;;  %v748_v4 = vadd.f32 %v1226_v19, %v725_v61 }
 0x136   : > { %v757_v49 = vmax.f32 %v741_v37, 0.0  ;;  %772 = vst [vmem:[%s1311_s4 + $0x10] sm:$0xff] %v756_v48  ;;  %v747_v3 = vadd.f32 %v1226_v19, %v724_v60  ;;  %v749_v5 = vadd.f32 %v1226_v19, %v726_v62 }
 0x137   : > { %v698_v29 = vld [vmem:[#allocation2 + $0x30] sm:$0xff]  ;;  %v755_v47 = vmax.f32 %v739_v35, 0.0  ;;  %770 = vst [vmem:[%s1311_s4] sm:$0xff] %v754_v40  ;;  %v762_v7 = vmax.f32 %v746_v63, 0.0  ;;  %v764_v12 = vmax.f32 %v748_v4, 0.0 }
 0x138   : > { %v696_v27 = vld [vmem:[#allocation2 + $0x20] sm:$0xff]  ;;  %v721_v33 = vmul.f32 %v937_v18, %v698_v29  ;;  %v706_v53 = vld [vmem:[#allocation2 + $0x70] sm:$0xff]  ;;  %773 = vst [vmem:[%s1311_s4 + $0x18] sm:$0xff] %v757_v49  ;;  %v763_v11 = vmax.f32 %v747_v3, 0.0  ;;  %v765_v13 = vmax.f32 %v749_v5, 0.0 }
 0x139   : > { %v719_v31 = vmul.f32 %v937_v18, %v696_v27  ;;  %v699_v34 = vld [vmem:[#allocation2 + $0x38] sm:$0xff]  ;;  %v704_v51 = vld [vmem:[#allocation2 + $0x60] sm:$0xff]  ;;  %771 = vst [vmem:[%s1311_s4 + $0x8] sm:$0xff] %v755_v47  ;;  %v729_v2 = vmul.f32 %v937_v18, %v706_v53  ;;  %778 = vst [vmem:[%s1311_s4 + $0x40] sm:$0xff] %v762_v7 }
 0x13a   : > { %v697_v28 = vld [vmem:[#allocation2 + $0x28] sm:$0xff]  ;;  %v722_v38 = vmul.f32 %v937_v18, %v699_v34  ;;  %v744_v43 = vadd.f32 %v1226_v19, %v721_v33  ;;  %v707_v58 = vld [vmem:[#allocation2 + $0x78] sm:$0xff]  ;;  %v727_v0 = vmul.f32 %v937_v18, %v704_v51  ;;  %779 = vst [vmem:[%s1311_s4 + $0x48] sm:$0xff] %v763_v11  ;;  %780 = vst [vmem:[%s1311_s4 + $0x50] sm:$0xff] %v764_v12 }
 0x13b   : > { %v720_v32 = vmul.f32 %v937_v18, %v697_v28  ;;  %v742_v41 = vadd.f32 %v1226_v19, %v719_v31  ;;  %v705_v52 = vld [vmem:[#allocation2 + $0x68] sm:$0xff]  ;;  %v730_v6 = vmul.f32 %v937_v18, %v707_v58  ;;  %v752_v10 = vadd.f32 %v1226_v19, %v729_v2  ;;  %781 = vst [vmem:[%s1311_s4 + $0x58] sm:$0xff] %v765_v13 }
 0x13c   : > { %v745_v50 = vadd.f32 %v1226_v19, %v722_v38  ;;  %v760_v56 = vmax.f32 %v744_v43, 0.0  ;;  %v728_v1 = vmul.f32 %v937_v18, %v705_v52  ;;  %v750_v8 = vadd.f32 %v1226_v19, %v727_v0 }
 0x13d   : > { %v743_v42 = vadd.f32 %v1226_v19, %v720_v32  ;;  %v758_v54 = vmax.f32 %v742_v41, 0.0  ;;  %v753_v14 = vadd.f32 %v1226_v19, %v730_v6  ;;  %v768_v17 = vmax.f32 %v752_v10, 0.0 }
 0x13e   : > { %v761_v59 = vmax.f32 %v745_v50, 0.0  ;;  %776 = vst [vmem:[%s1311_s4 + $0x30] sm:$0xff] %v760_v56  ;;  %v751_v9 = vadd.f32 %v1226_v19, %v728_v1  ;;  %v766_v15 = vmax.f32 %v750_v8, 0.0 }
 0x13f   : > { %v759_v55 = vmax.f32 %v743_v42, 0.0  ;;  %774 = vst [vmem:[%s1311_s4 + $0x20] sm:$0xff] %v758_v54  ;;  %v769_v18 = vmax.f32 %v753_v14, 0.0  ;;  %784 = vst [vmem:[%s1311_s4 + $0x70] sm:$0xff] %v768_v17 }
 0x140   : > { %777 = vst [vmem:[%s1311_s4 + $0x38] sm:$0xff] %v761_v59  ;;  %v767_v16 = vmax.f32 %v751_v9, 0.0  ;;  %782 = vst [vmem:[%s1311_s4 + $0x60] sm:$0xff] %v766_v15 }
 0x141   : > { %775 = vst [vmem:[%s1311_s4 + $0x28] sm:$0xff] %v759_v55  ;;  %785 = vst [vmem:[%s1311_s4 + $0x78] sm:$0xff] %v769_v18 }
 0x142   : > { %783 = vst [vmem:[%s1311_s4 + $0x68] sm:$0xff] %v767_v16 }
 0x143 PF: > { %s14_s19 = sadd.s32 1, %s1102_s19   ;;  %s1312_s15 = smov %s1090_s16 }
 0x144   : > { %p11_p12 = scmp.ge.s32.totalorder %s14_s19, 5   ;;  %s1313_s16 = smov %s1165_s23 }
 0x145   : > { %s1314_s17 = smov %s1098_s18  ;;  %s1315_s18 = smov %s1317_s20 }
 0x146   :  { %13 = sbr.rel (!%p11_p12) target bundleno = 3 (0x3), region = 129 }

// kernel: erfnet_forward.106
= control target key start
LH: loop header
LB: loop body
LE: loop exit
PB: predicated region body
PF: predicated region fallthrough
CT: control target
= control target key end

     0   :  { %s1246_s18 = smov 0   ;;  %s1248_s19 = smov 0   ;;  %s1489_s0 = inlined_call_operand.vmem [shape: bf16[128,384], index: 0, kind: input, shape index: {}]   ;;  %s1490_s1 = inlined_call_operand.vmem [shape: bf16[384,128], index: 1, kind: input, shape index: {}]   ;;  %s1491_s2 = inlined_call_operand.vmem [shape: f32[1,128], index: 2, kind: input, shape index: {}]   ;;  %s1492_s3 = inlined_call_operand.vmem [shape: f32[1,128], index: 3, kind: input, shape index: {}]   ;;  %s1493_s4 = inlined_call_operand.vmem [shape: f32[128,128], index: 4, kind: input, shape index: {}]   ;;  %s1494_s5 = inlined_call_operand.vmem [shape: f32[128,128], index: 5, kind: output, shape index: {}]  }
   0x1   :  { %s1250_s20 = smov 0   ;;  %s1252_s21 = smov 0  }
   0x2   :  { %s1254_s22 = smov 0  }
   0x3 LB: > { %s27_s23 = sadd.s32 1, %s1209_s21  ;;  %p50_p1 = scmp.ne.s32.totalorder %s1201_s19, %s1197_s18  ;;  %s1213_s22 = sphi %s1254_s22, %s15_s22   ;;  %s1209_s21 = sphi %s1252_s21, %s1498_s21   ;;  %s1205_s20 = sphi %s1250_s20, %s1497_s20   ;;  %s1201_s19 = sphi %s1248_s19, %s1496_s19   ;;  %s1197_s18 = sphi %s1246_s18, %s1495_s18  }
   0x4   : > { %p28_p0 = scmp.ge.s32.totalorder %s27_s23, 3  ;;  %p51_p2 = scmp.eq.s32.totalorder %s1213_s22, 0 }
   0x5   : > { %s43_s25 = sadd.s32 1, %s1201_s19  ;;  %p1023_p5 = scmp.ge.s32.totalorder %s1213_s22, 3 }
   0x6   : > { %s1500_s23 = smov (%p28_p0, %s27_s23), 0  ;;  %p52_p3 = por %p51_p2, %p50_p1 }
   0x7   : > { %s39_s24 = ssub.s32 %s1209_s21, %s1500_s23  ;;  %236 = sbr.rel (%p1023_p5) target bundleno = 28 (0x1c), region = 28 }
   0x8   : > { %p41_p4 = scmp.eq.s32.totalorder %s39_s24, 0 }
   0xa   : > { %s1281_s26 = scalar_select %p41_p4, %s1201_s19, %s43_s25  }
   0xe   : > { %239 = sbr.rel (!%p52_p3) target bundleno = 28 (0x1c), region = 32  ;;  %s241_s27 = sand.u32 (%p52_p3), 1, %s1201_s19  }
   0xf   : > { %s1025_s28 = sshll.u32 (%p52_p3), %s1209_s21, 2  ;;  %s1024_s29 = sshll.u32 (%p52_p3), %s241_s27, 6 }
  0x10   : > { %s1289_s7 = scalar_lea.vmem (%p52_p3), %s1489_s0, %s1025_s28  ;;  %s243_s8 = scalar_lea.vmem (%p52_p3), [#allocation3], %s1024_s29 }
  0x11   : > { %v264_v0 = vld [vmem:[%s1289_s7] sm:$0xf] (%p52_p3)  ;;  %v266_v1 = vld [vmem:[%s1289_s7 + $0xc] sm:$0xf] (%p52_p3)  ;;  %v268_v2 = vld [vmem:[%s1289_s7 + $0x18] sm:$0xf] (%p52_p3) }
  0x12   : > { %265 = vst [vmem:[%s243_s8] sm:$0xf] (%p52_p3), %v264_v0  ;;  %267 = vst [vmem:[%s243_s8 + $0x4] sm:$0xf] (%p52_p3), %v266_v1  ;;  %v270_v3 = vld [vmem:[%s1289_s7 + $0x24] sm:$0xf] (%p52_p3) }
  0x13   : > { %v272_v4 = vld [vmem:[%s1289_s7 + $0x30] sm:$0xf] (%p52_p3)  ;;  %269 = vst [vmem:[%s243_s8 + $0x8] sm:$0xf] (%p52_p3), %v268_v2  ;;  %271 = vst [vmem:[%s243_s8 + $0xc] sm:$0xf] (%p52_p3), %v270_v3 }
  0x14   : > { %273 = vst [vmem:[%s243_s8 + $0x10] sm:$0xf] (%p52_p3), %v272_v4  ;;  %v274_v5 = vld [vmem:[%s1289_s7 + $0x3c] sm:$0xf] (%p52_p3)  ;;  %v276_v6 = vld [vmem:[%s1289_s7 + $0x48] sm:$0xf] (%p52_p3) }
  0x15   : > { %v278_v7 = vld [vmem:[%s1289_s7 + $0x54] sm:$0xf]  ;;  %275 = vst [vmem:[%s243_s8 + $0x14] sm:$0xf] %v274_v5  ;;  %277 = vst [vmem:[%s243_s8 + $0x18] sm:$0xf] %v276_v6 }
  0x16   : > { %279 = vst [vmem:[%s243_s8 + $0x1c] sm:$0xf] %v278_v7  ;;  %v280_v8 = vld [vmem:[%s1289_s7 + $0x60] sm:$0xf]  ;;  %v282_v9 = vld [vmem:[%s1289_s7 + $0x6c] sm:$0xf] }
  0x17   : > { %v284_v10 = vld [vmem:[%s1289_s7 + $0x78] sm:$0xf]  ;;  %281 = vst [vmem:[%s243_s8 + $0x20] sm:$0xf] %v280_v8  ;;  %283 = vst [vmem:[%s243_s8 + $0x24] sm:$0xf] %v282_v9 }
  0x18   : > { %285 = vst [vmem:[%s243_s8 + $0x28] sm:$0xf] %v284_v10  ;;  %v286_v11 = vld [vmem:[%s1289_s7 + $0x84] sm:$0xf]  ;;  %v288_v12 = vld [vmem:[%s1289_s7 + $0x90] sm:$0xf] }
  0x19   : > { %v290_v13 = vld [vmem:[%s1289_s7 + $0x9c] sm:$0xf]  ;;  %287 = vst [vmem:[%s243_s8 + $0x2c] sm:$0xf] %v286_v11  ;;  %289 = vst [vmem:[%s243_s8 + $0x30] sm:$0xf] %v288_v12 }
  0x1a   : > { %291 = vst [vmem:[%s243_s8 + $0x34] sm:$0xf] %v290_v13  ;;  %v292_v14 = vld [vmem:[%s1289_s7 + $0xa8] sm:$0xf]  ;;  %v294_v15 = vld [vmem:[%s1289_s7 + $0xb4] sm:$0xf] }
  0x1b   : > { %293 = vst [vmem:[%s243_s8 + $0x38] sm:$0xf] %v292_v14  ;;  %295 = vst [vmem:[%s243_s8 + $0x3c] sm:$0xf] %v294_v15 }
  0x1c PF: > { %p1026_p6 = scmp.ge.s32.totalorder %s1213_s22, 1  ;;  %p361_p7 = scmp.lt.s32.totalorder %s1213_s22, 4 }
  0x1e   : > { %p362_p8 = pnand %p1026_p6, %p361_p7 }
  0x1f   : > { %s368_s9 = sand.u32 (!%p362_p8), 1, %s1197_s18   ;;  %s1028_s10 = sshll.u32 (!%p362_p8), %s1205_s20, 4 }
  0x20   : > { %365 = sbr.rel (%p362_p8) target bundleno = 326 (0x146), region = 77  ;;  %s1027_s11 = sshll.u32 (!%p362_p8), %s368_s9, 6 }
  0x21   : > { %p422_p9 = scmp.lt.s32.totalorder (!%p362_p8), %s1028_s10, 47  ;;  %s1316_s16 = scalar_lea.vmem (!%p362_p8), [#allocation3], %s1027_s11 }
  0x22   : > { %p1030_p10 = scmp.ne.s32.totalorder (!%p362_p8), %s1205_s20, 0 }
  0x27   : > { %s1502_s10 = smov (!%p422_p9, %s1028_s10), 47  ;;  %458 = sbr.rel (%p1030_p10) target bundleno = 49 (0x31), region = 85 }
  0x28   : > { %s1029_s12 = sshll.u32 %s1502_s10, 2  ;;  %v1215_v16 = vmov (!%p1030_p10), 0.0  }
  0x29   : > { %s1314_s15 = scalar_lea.vmem %s1490_s1, %s1029_s12  ;;  %459 = vst [vmem:[#allocation2] sm:$0xff] (!%p1030_p10), %v1215_v16  ;;  %460 = vst [vmem:[#allocation2 + $0x8] sm:$0xff] (!%p1030_p10), %v1215_v16 }
  0x2a   : > { %461 = vst [vmem:[#allocation2 + $0x10] sm:$0xff] (!%p1030_p10), %v1215_v16  ;;  %462 = vst [vmem:[#allocation2 + $0x18] sm:$0xff] (!%p1030_p10), %v1215_v16 }
  0x2b   : > { %463 = vst [vmem:[#allocation2 + $0x20] sm:$0xff] (!%p1030_p10), %v1215_v16  ;;  %464 = vst [vmem:[#allocation2 + $0x28] sm:$0xff] (!%p1030_p10), %v1215_v16 }
  0x2c   : > { %465 = vst [vmem:[#allocation2 + $0x30] sm:$0xff] (!%p1030_p10), %v1215_v16  ;;  %466 = vst [vmem:[#allocation2 + $0x38] sm:$0xff] (!%p1030_p10), %v1215_v16 }
  0x2d   : > { %467 = vst [vmem:[#allocation2 + $0x40] sm:$0xff] (!%p1030_p10), %v1215_v16  ;;  %468 = vst [vmem:[#allocation2 + $0x48] sm:$0xff] (!%p1030_p10), %v1215_v16 }
  0x2e   : > { %469 = vst [vmem:[#allocation2 + $0x50] sm:$0xff] %v1215_v16  ;;  %470 = vst [vmem:[#allocation2 + $0x58] sm:$0xff] %v1215_v16 }
  0x2f   : > { %471 = vst [vmem:[#allocation2 + $0x60] sm:$0xff] %v1215_v16  ;;  %472 = vst [vmem:[#allocation2 + $0x68] sm:$0xff] %v1215_v16 }
  0x30   : > { %473 = vst [vmem:[#allocation2 + $0x70] sm:$0xff] %v1215_v16  ;;  %474 = vst [vmem:[#allocation2 + $0x78] sm:$0xff] %v1215_v16 }
  0x31 PF: > { %v1159_v17 = vld [vmem:[%s1314_s15] sm:$0xff]   ;;  %v1160_v18 = vld [vmem:[%s1314_s15 + $0x8] sm:$0xff]   ;;  %v1161_v19 = vld [vmem:[%s1314_s15 + $0x10] sm:$0xff]   ;;  %p1047_p11 = scmp.ne.s32.totalorder %s1205_s20, 2 }
  0x32   : > { %1070 = vmatprep.subr.bf16.mxu0 %v1159_v17  ;;  %1102 = vmatprep.subr.bf16.mxu1 %v1159_v17  ;;  %v1162_v20 = vld [vmem:[%s1314_s15 + $0x18] sm:$0xff]   ;;  %v1167_v21 = vld [vmem:[%s1316_s16] sm:$0xff]   ;;  %v1163_v23 = vld [vmem:[%s1314_s15 + $0x20] sm:$0xff]  }
  0x33   : > { %1071 = vmatpush3.bf16.msra.mxu0 %v1159_v17  ;;  %1110 = vmatpush3.bf16.msra.mxu1 %v1159_v17  ;;  %v1168_v22 = vld [vmem:[%s1316_s16 + $0x20] sm:$0xff]   ;;  %v1165_v25 = vld [vmem:[%s1314_s15 + $0x30] sm:$0xff]   ;;  %v1166_v26 = vld [vmem:[%s1314_s15 + $0x38] sm:$0xff]  }
  0x34   : > { %1072 = vmatprep.subr.bf16.mxu0 %v1160_v18  ;;  %1103 = vmatprep.subr.bf16.mxu1 %v1160_v18  ;;  %v1164_v24 = vld [vmem:[%s1314_s15 + $0x28] sm:$0xff]   ;;  %v1169_v27 = vld [vmem:[%s1316_s16 + $0x8] sm:$0xff]   ;;  %v1171_v29 = vld [vmem:[%s1316_s16 + $0x10] sm:$0xff]  }
  0x35   : > { %1086 = vmatprep.mubr.bf16.mxu0 %v1167_v21  ;;  %1094 = vmatprep.mubr.bf16.mxu1 %v1168_v22  ;;  %v1170_v28 = vld [vmem:[%s1316_s16 + $0x28] sm:$0xff]   ;;  %v1172_v30 = vld [vmem:[%s1316_s16 + $0x30] sm:$0xff]   ;;  %v1173_v31 = vld [vmem:[%s1316_s16 + $0x18] sm:$0xff]  }
  0x36   : > { %v1174_v32 = vld [vmem:[%s1316_s16 + $0x38] sm:$0xff]   ;;  %v477_v33 = vld [vmem:[#allocation2 + $0x10] sm:$0xff]  ;;  %v475_v35 = vld [vmem:[#allocation2] sm:$0xff] }
  0x37   : > { %1073 = vmatpush3.bf16.msra.mxu0 %v1160_v18  ;;  %1111 = vmatpush3.bf16.msra.mxu1 %v1160_v18  ;;  %v485_v34 = vld [vmem:[#allocation2 + $0x50] sm:$0xff]  ;;  %v483_v36 = vld [vmem:[#allocation2 + $0x40] sm:$0xff]  ;;  %v478_v39 = vld [vmem:[#allocation2 + $0x18] sm:$0xff] }
  0x38   : > { %1074 = vmatprep.subr.bf16.mxu0 %v1161_v19  ;;  %1104 = vmatprep.subr.bf16.mxu1 %v1161_v19  ;;  %v486_v40 = vld [vmem:[#allocation2 + $0x58] sm:$0xff]  ;;  %v476_v45 = vld [vmem:[#allocation2 + $0x8] sm:$0xff]  ;;  %v481_v57 = vld [vmem:[#allocation2 + $0x30] sm:$0xff] }
  0x39   : > { %v484_v46 = vld [vmem:[#allocation2 + $0x48] sm:$0xff]  ;;  %v489_v58 = vld [vmem:[#allocation2 + $0x70] sm:$0xff]  ;;  %v479_v59 = vld [vmem:[#allocation2 + $0x20] sm:$0xff] }
  0x3a   : > { %v487_v60 = vld [vmem:[#allocation2 + $0x60] sm:$0xff]  ;;  %v482_v63 = vld [vmem:[#allocation2 + $0x38] sm:$0xff]  ;;  %v480_v5 = vld [vmem:[#allocation2 + $0x28] sm:$0xff] }
  0x3b   : > { %1075 = vmatpush3.bf16.msra.mxu0 %v1161_v19  ;;  %1112 = vmatpush3.bf16.msra.mxu1 %v1161_v19  ;;  %v490_v0 = vld [vmem:[#allocation2 + $0x78] sm:$0xff]  ;;  %v488_v6 = vld [vmem:[#allocation2 + $0x68] sm:$0xff] }
  0x3c   : > { %1076 = vmatprep.subr.bf16.mxu0 %v1162_v20  ;;  %1105 = vmatprep.subr.bf16.mxu1 %v1162_v20  ;;  %v1339_v18 = vld [vmem:[%s1491_s2] ss:$0 sm:$0xff] (!%p1047_p11) }
  0x3d   : > { %v1344_v19 = vld [vmem:[%s1492_s3] ss:$0 sm:$0xff] (!%p1047_p11) }
  0x3e   : > { %v814_v22 = vld [vmem:[%s1493_s4] sm:$0xff] (!%p1047_p11) }
  0x3f   : > { %1077 = vmatpush3.bf16.msra.mxu0 %v1162_v20  ;;  %1113 = vmatpush3.bf16.msra.mxu1 %v1162_v20 }
  0x40   : > { %1078 = vmatprep.subr.bf16.mxu0 %v1163_v23  ;;  %1106 = vmatprep.subr.bf16.mxu1 %v1163_v23 }
  0x43   : > { %1079 = vmatpush3.bf16.msra.mxu0 %v1163_v23  ;;  %1114 = vmatpush3.bf16.msra.mxu1 %v1163_v23 }
  0x44   : > { %1080 = vmatprep.subr.bf16.mxu0 %v1164_v24  ;;  %1107 = vmatprep.subr.bf16.mxu1 %v1164_v24 }
  0x47   : > { %1081 = vmatpush3.bf16.msra.mxu0 %v1164_v24  ;;  %1115 = vmatpush3.bf16.msra.mxu1 %v1164_v24 }
  0x48   : > { %1082 = vmatprep.subr.bf16.mxu0 %v1165_v25  ;;  %1108 = vmatprep.subr.bf16.mxu1 %v1165_v25 }
  0x4b   : > { %1083 = vmatpush3.bf16.msra.mxu0 %v1165_v25  ;;  %1116 = vmatpush3.bf16.msra.mxu1 %v1165_v25 }
  0x4c   : > { %1084 = vmatprep.subr.bf16.mxu0 %v1166_v26  ;;  %1109 = vmatprep.subr.bf16.mxu1 %v1166_v26 }
  0x4f   : > { %1085 = vmatpush3.bf16.msra.mxu0 %v1166_v26  ;;  %1117 = vmatpush3.bf16.msra.mxu1 %v1166_v26 }
  0x52   : > { %1087 = vmatmul.mubr.bf16.vlgmr.msra.gmra.mrb[0].mxu0 %v1169_v27  ;;  %1095 = vmatmul.mubr.bf16.vlgmr.msra.gmra.mrb[0].mxu1 %v1170_v28  ;;  %v815_v27 = vld [vmem:[%s1493_s4 + $0x8] sm:$0xff] (!%p1047_p11) }
  0x53   : > { %1090 = vmatprep.mubr.bf16.mxu0 %v1171_v29  ;;  %1098 = vmatprep.mubr.bf16.mxu1 %v1172_v30  ;;  %v816_v29 = vld [vmem:[%s1493_s4 + $0x10] sm:$0xff] (!%p1047_p11) }
  0x5a   : > { %1091 = vmatmul.mubr.bf16.gmra.mrb[4].mxu0 %v1173_v31  ;;  %1099 = vmatmul.mubr.bf16.gmra.mrb[4].mxu1 %v1174_v32 }
 0x125   : > { %v1088_v37 = vpop.f32.mrb[0].mxu0  ;;  %v1096_v38 = vpop.f32.mrb[0].mxu1 }
 0x126   : > { %v718_v41 = vadd.f32 %v1088_v37, %v477_v33  ;;  %v726_v42 = vadd.f32 %v1096_v38, %v485_v34  ;;  %v653_v43 = vpop.f32.mrb[1].mxu0  ;;  %v685_v44 = vpop.f32.mrb[1].mxu1  ;;  %v817_v33 = vld [vmem:[%s1493_s4 + $0x18] sm:$0xff] (!%p1047_p11) }
 0x127   : > { %v716_v47 = vadd.f32 %v653_v43, %v475_v35  ;;  %v724_v48 = vadd.f32 %v685_v44, %v483_v36  ;;  %v1089_v49 = vpop.f32.mrb[2].mxu0  ;;  %v1097_v50 = vpop.f32.mrb[2].mxu1 }
 0x128   : > { %734 = vst [vmem:[#allocation2 + $0x10] sm:$0xff] %v718_v41  ;;  %742 = vst [vmem:[#allocation2 + $0x50] sm:$0xff] %v726_v42  ;;  %v719_v51 = vadd.f32 %v1089_v49, %v478_v39  ;;  %v727_v52 = vadd.f32 %v1097_v50, %v486_v40  ;;  %v656_v53 = vpop.f32.mrb[3].mxu0  ;;  %v688_v54 = vpop.f32.mrb[3].mxu1  ;;  %v818_v40 = vld [vmem:[%s1493_s4 + $0x20] sm:$0xff] (!%p1047_p11) }
 0x129   : > { %732 = vst [vmem:[#allocation2] sm:$0xff] %v716_v47  ;;  %740 = vst [vmem:[#allocation2 + $0x40] sm:$0xff] %v724_v48  ;;  %v717_v55 = vadd.f32 %v656_v53, %v476_v45  ;;  %v725_v56 = vadd.f32 %v688_v54, %v484_v46  ;;  %v819_v45 = vld [vmem:[%s1493_s4 + $0x28] sm:$0xff] (!%p1047_p11)  ;;  %v820_v53 = vld [vmem:[%s1493_s4 + $0x30] sm:$0xff] (!%p1047_p11) }
 0x12a   : > { %735 = vst [vmem:[#allocation2 + $0x18] sm:$0xff] %v719_v51  ;;  %743 = vst [vmem:[#allocation2 + $0x58] sm:$0xff] %v727_v52  ;;  %v821_v54 = vld [vmem:[%s1493_s4 + $0x38] sm:$0xff] (!%p1047_p11) }
 0x12b   : > { %733 = vst [vmem:[#allocation2 + $0x8] sm:$0xff] %v717_v55  ;;  %741 = vst [vmem:[#allocation2 + $0x48] sm:$0xff] %v725_v56 }
 0x12d   : > { %v1092_v61 = vpop.f32.mrb[4].mxu0  ;;  %v1100_v62 = vpop.f32.mrb[4].mxu1  ;;  %751 = sbr.rel (%p1047_p11) target bundleno = 326 (0x146), region = 89 }
 0x12e   : > { %v722_v1 = vadd.f32 %v1092_v61, %v481_v57  ;;  %v730_v2 = vadd.f32 %v1100_v62, %v489_v58  ;;  %v669_v3 = vpop.f32.mrb[5].mxu0  ;;  %v701_v4 = vpop.f32.mrb[5].mxu1 }
 0x12f   : > { %v720_v7 = vadd.f32 %v669_v3, %v479_v59  ;;  %v728_v8 = vadd.f32 %v701_v4, %v487_v60  ;;  %v1093_v9 = vpop.f32.mrb[6].mxu0  ;;  %v1101_v10 = vpop.f32.mrb[6].mxu1  ;;  %v754_v24 = vld [vmem:[#allocation2 + $0x10] sm:$0xff] (!%p1047_p11) }
 0x130   : > { %738 = vst [vmem:[#allocation2 + $0x30] sm:$0xff] %v722_v1  ;;  %746 = vst [vmem:[#allocation2 + $0x70] sm:$0xff] %v730_v2  ;;  %v723_v11 = vadd.f32 %v1093_v9, %v482_v63  ;;  %v731_v12 = vadd.f32 %v1101_v10, %v490_v0  ;;  %v672_v13 = vpop.f32.mrb[7].mxu0  ;;  %v704_v14 = vpop.f32.mrb[7].mxu1  ;;  %v752_v17 = vld [vmem:[#allocation2] sm:$0xff] (!%p1047_p11)  ;;  %v777_v28 = vmul.f32 (!%p1047_p11), %v1339_v18, %v754_v24  ;;  %v762_v60 = vld [vmem:[#allocation2 + $0x50] sm:$0xff] (!%p1047_p11) }
 0x131   : > { %736 = vst [vmem:[#allocation2 + $0x20] sm:$0xff] %v720_v7  ;;  %744 = vst [vmem:[#allocation2 + $0x60] sm:$0xff] %v728_v8  ;;  %v721_v15 = vadd.f32 %v672_v13, %v480_v5  ;;  %v729_v16 = vadd.f32 %v704_v14, %v488_v6  ;;  %v775_v20 = vmul.f32 (!%p1047_p11), %v1339_v18, %v752_v17  ;;  %v755_v25 = vld [vmem:[#allocation2 + $0x18] sm:$0xff] (!%p1047_p11)  ;;  %v760_v48 = vld [vmem:[#allocation2 + $0x40] sm:$0xff] (!%p1047_p11) }
 0x132   : > { %739 = vst [vmem:[#allocation2 + $0x38] sm:$0xff] %v723_v11  ;;  %747 = vst [vmem:[#allocation2 + $0x78] sm:$0xff] %v731_v12  ;;  %v753_v21 = vld [vmem:[#allocation2 + $0x8] sm:$0xff] (!%p1047_p11)  ;;  %v778_v30 = vmul.f32 (!%p1047_p11), %v1339_v18, %v755_v25  ;;  %v800_v38 = vadd.f32 (!%p1047_p11), %v1344_v19, %v777_v28  ;;  %v763_v61 = vld [vmem:[#allocation2 + $0x58] sm:$0xff] (!%p1047_p11)  ;;  %v783_v1 = vmul.f32 (!%p1047_p11), %v1339_v18, %v760_v48 }
 0x133   : > { %737 = vst [vmem:[#allocation2 + $0x28] sm:$0xff] %v721_v15  ;;  %745 = vst [vmem:[#allocation2 + $0x68] sm:$0xff] %v729_v16  ;;  %v776_v23 = vmul.f32 (!%p1047_p11), %v1339_v18, %v753_v21  ;;  %v798_v26 = vadd.f32 (!%p1047_p11), %v1344_v19, %v775_v20  ;;  %v761_v55 = vld [vmem:[#allocation2 + $0x48] sm:$0xff] (!%p1047_p11)  ;;  %v822_v6 = vld [vmem:[%s1493_s4 + $0x40] sm:$0xff] (!%p1047_p11)  ;;  %v785_v12 = vmul.f32 (!%p1047_p11), %v1339_v18, %v762_v60 }
 0x134   : > { %v801_v39 = vadd.f32 %v1344_v19, %v778_v30  ;;  %v832_v50 = vadd.f32 %v816_v29, %v800_v38  ;;  %v784_v7 = vmul.f32 %v1339_v18, %v761_v55  ;;  %v806_v10 = vadd.f32 %v1344_v19, %v783_v1  ;;  %v823_v11 = vld [vmem:[%s1493_s4 + $0x48] sm:$0xff]  ;;  %v824_v21 = vld [vmem:[%s1493_s4 + $0x50] sm:$0xff] }
 0x135   : > { %v799_v32 = vadd.f32 %v1344_v19, %v776_v23  ;;  %v830_v37 = vadd.f32 %v814_v22, %v798_v26  ;;  %v786_v13 = vmul.f32 %v1339_v18, %v763_v61  ;;  %v825_v22 = vld [vmem:[%s1493_s4 + $0x58] sm:$0xff]  ;;  %v808_v25 = vadd.f32 %v1344_v19, %v785_v12  ;;  %v828_v38 = vld [vmem:[%s1493_s4 + $0x70] sm:$0xff] }
 0x136   : > { %v833_v51 = vadd.f32 %v817_v33, %v801_v39  ;;  %v848_v62 = vmax.f32 %v832_v50, 0.0  ;;  %v807_v20 = vadd.f32 %v1344_v19, %v784_v7  ;;  %v838_v24 = vadd.f32 %v822_v6, %v806_v10  ;;  %v829_v39 = vld [vmem:[%s1493_s4 + $0x78] sm:$0xff] }
 0x137   : > { %v758_v36 = vld [vmem:[#allocation2 + $0x30] sm:$0xff]  ;;  %v831_v43 = vadd.f32 %v815_v27, %v799_v32  ;;  %v846_v49 = vmax.f32 %v830_v37, 0.0  ;;  %v809_v26 = vadd.f32 %v1344_v19, %v786_v13  ;;  %v826_v27 = vld [vmem:[%s1493_s4 + $0x60] sm:$0xff] }
 0x138   : > { %v756_v31 = vld [vmem:[#allocation2 + $0x20] sm:$0xff]  ;;  %v781_v46 = vmul.f32 %v1339_v18, %v758_v36  ;;  %v849_v63 = vmax.f32 %v833_v51, 0.0  ;;  %864 = vst [vmem:[%s1494_s5 + $0x10] sm:$0xff] %v848_v62  ;;  %v766_v14 = vld [vmem:[#allocation2 + $0x70] sm:$0xff]  ;;  %v839_v29 = vadd.f32 %v823_v11, %v807_v20 }
 0x139   : > { %v779_v34 = vmul.f32 %v1339_v18, %v756_v31  ;;  %v759_v42 = vld [vmem:[#allocation2 + $0x38] sm:$0xff]  ;;  %v847_v56 = vmax.f32 %v831_v43, 0.0  ;;  %862 = vst [vmem:[%s1494_s5] sm:$0xff] %v846_v49  ;;  %v764_v2 = vld [vmem:[#allocation2 + $0x60] sm:$0xff]  ;;  %v789_v32 = vmul.f32 %v1339_v18, %v766_v14  ;;  %v841_v36 = vadd.f32 %v825_v22, %v809_v26 }
 0x13a   : > { %v757_v35 = vld [vmem:[#allocation2 + $0x28] sm:$0xff]  ;;  %v782_v47 = vmul.f32 %v1339_v18, %v759_v42  ;;  %v804_v58 = vadd.f32 %v1344_v19, %v781_v46  ;;  %865 = vst [vmem:[%s1494_s5 + $0x18] sm:$0xff] %v849_v63  ;;  %v767_v15 = vld [vmem:[#allocation2 + $0x78] sm:$0xff]  ;;  %v787_v23 = vmul.f32 %v1339_v18, %v764_v2  ;;  %v827_v31 = vld [vmem:[%s1493_s4 + $0x68] sm:$0xff] }
 0x13b   : > { %v780_v41 = vmul.f32 %v1339_v18, %v757_v35  ;;  %v802_v44 = vadd.f32 %v1344_v19, %v779_v34  ;;  %863 = vst [vmem:[%s1494_s5 + $0x8] sm:$0xff] %v847_v56  ;;  %v765_v8 = vld [vmem:[#allocation2 + $0x68] sm:$0xff]  ;;  %v790_v33 = vmul.f32 %v1339_v18, %v767_v15  ;;  %v854_v34 = vmax.f32 %v838_v24, 0.0 }
 0x13c   : > { %v805_v59 = vadd.f32 %v1344_v19, %v782_v47  ;;  %v836_v4 = vadd.f32 %v820_v53, %v804_v58  ;;  %v788_v28 = vmul.f32 %v1339_v18, %v765_v8  ;;  %v810_v30 = vadd.f32 %v1344_v19, %v787_v23 }
 0x13d   : > { %v803_v52 = vadd.f32 %v1344_v19, %v780_v41  ;;  %v834_v57 = vadd.f32 %v818_v40, %v802_v44  ;;  %v840_v35 = vadd.f32 %v824_v21, %v808_v25  ;;  %v855_v40 = vmax.f32 %v839_v29, 0.0  ;;  %870 = vst [vmem:[%s1494_s5 + $0x40] sm:$0xff] %v854_v34 }
 0x13e   : > { %v837_v5 = vadd.f32 %v821_v54, %v805_v59  ;;  %v852_v16 = vmax.f32 %v836_v4, 0.0  ;;  %v811_v37 = vadd.f32 %v1344_v19, %v788_v28  ;;  %v842_v41 = vadd.f32 %v826_v27, %v810_v30 }
 0x13f   : > { %v835_v0 = vadd.f32 %v819_v45, %v803_v52  ;;  %v850_v3 = vmax.f32 %v834_v57, 0.0  ;;  %v812_v42 = vadd.f32 %v1344_v19, %v789_v32  ;;  %v813_v43 = vadd.f32 %v1344_v19, %v790_v33  ;;  %871 = vst [vmem:[%s1494_s5 + $0x48] sm:$0xff] %v855_v40 }
 0x140   : > { %v853_v17 = vmax.f32 %v837_v5, 0.0  ;;  %868 = vst [vmem:[%s1494_s5 + $0x30] sm:$0xff] %v852_v16  ;;  %v856_v18 = vmax.f32 %v840_v35, 0.0  ;;  %v857_v44 = vmax.f32 %v841_v36, 0.0  ;;  %v843_v45 = vadd.f32 %v827_v31, %v811_v37 }
 0x141   : > { %v851_v9 = vmax.f32 %v835_v0, 0.0  ;;  %866 = vst [vmem:[%s1494_s5 + $0x20] sm:$0xff] %v850_v3  ;;  %v858_v46 = vmax.f32 %v842_v41, 0.0  ;;  %v844_v47 = vadd.f32 %v828_v38, %v812_v42  ;;  %v845_v48 = vadd.f32 %v829_v39, %v813_v43 }
 0x142   : > { %869 = vst [vmem:[%s1494_s5 + $0x38] sm:$0xff] %v853_v17  ;;  %872 = vst [vmem:[%s1494_s5 + $0x50] sm:$0xff] %v856_v18  ;;  %v859_v19 = vmax.f32 %v843_v45, 0.0 }
 0x143   : > { %867 = vst [vmem:[%s1494_s5 + $0x28] sm:$0xff] %v851_v9  ;;  %873 = vst [vmem:[%s1494_s5 + $0x58] sm:$0xff] %v857_v44  ;;  %v860_v49 = vmax.f32 %v844_v47, 0.0  ;;  %v861_v50 = vmax.f32 %v845_v48, 0.0 }
 0x144   : > { %874 = vst [vmem:[%s1494_s5 + $0x60] sm:$0xff] %v858_v46  ;;  %875 = vst [vmem:[%s1494_s5 + $0x68] sm:$0xff] %v859_v19 }
 0x145   : > { %876 = vst [vmem:[%s1494_s5 + $0x70] sm:$0xff] %v860_v49  ;;  %877 = vst [vmem:[%s1494_s5 + $0x78] sm:$0xff] %v861_v50 }
 0x146 PF: > { %s15_s22 = sadd.s32 1, %s1213_s22   ;;  %s1495_s18 = smov %s1201_s19 }
 0x147   : > { %p12_p12 = scmp.ge.s32.totalorder %s15_s22, 5   ;;  %s1496_s19 = smov %s1281_s26 }
 0x148   : > { %s1497_s20 = smov %s1209_s21  ;;  %s1498_s21 = smov %s1500_s23 }
 0x149   :  { %14 = sbr.rel (!%p12_p12) target bundleno = 3 (0x3), region = 136 }

// kernel: erfnet_forward.135
= control target key start
LH: loop header
LB: loop body
LE: loop exit
PB: predicated region body
PF: predicated region fallthrough
CT: control target
= control target key end

     0   :  { %s1998_s15 = smov 0   ;;  %s2000_s16 = smov 0   ;;  %s2414_s0 = inlined_call_operand.vmem [shape: bf16[128,512], index: 0, kind: input, shape index: {}]   ;;  %s2415_s1 = inlined_call_operand.vmem [shape: bf16[512,256], index: 1, kind: input, shape index: {}]   ;;  %s2416_s2 = inlined_call_operand.vmem [shape: f32[1,256], index: 2, kind: input, shape index: {}]   ;;  %s2417_s3 = inlined_call_operand.vmem [shape: f32[1,256], index: 3, kind: input, shape index: {}]   ;;  %s2418_s4 = inlined_call_operand.vmem [shape: f32[128,256], index: 4, kind: output, shape index: {}]  }
   0x1   :  { %s2002_s17 = smov 0   ;;  %s2004_s18 = smov 0  }
   0x2   :  { %s2006_s19 = smov 0  }
   0x3 LB: > { %s29_s20 = sadd.s32 1, %s1967_s18  ;;  %s1605_s21 = sadd.s32 4294967295, %s1971_s19   ;;  %s1971_s19 = sphi %s2006_s19, %s14_s19   ;;  %s1967_s18 = sphi %s2004_s18, %s2423_s18   ;;  %s1963_s17 = sphi %s2002_s17, %s2422_s17   ;;  %s1959_s16 = sphi %s2000_s16, %s2421_s16   ;;  %s1955_s15 = sphi %s1998_s15, %s2420_s15  }
   0x4   : > { %p31_p0 = scmp.ge.s32.totalorder %s29_s20, 2  ;;  %p77_p1 = scmp.ne.s32.totalorder %s1959_s16, %s1955_s15 }
   0x5   : > { %p78_p2 = scmp.eq.s32.totalorder %s1971_s19, 0  ;;  %p161_p4 = scmp.eq.s32.totalorder %s1605_s21, 1 }
   0x6   : > { %s2425_s20 = smov (%p31_p0, %s29_s20), 0  ;;  %s70_s23 = sadd.s32 1, %s1959_s16 }
   0x7   : > { %p79_p3 = por %p78_p2, %p77_p1  ;;  %s66_s22 = ssub.s32 %s1967_s18, %s2425_s20 }
   0x8   : > { %p68_p5 = scmp.eq.s32.totalorder %s66_s22, 0  ;;  %p2033_p6 = por %p161_p4, %p77_p1 }
   0x9   : > { %p1609_p7 = scmp.ge.s32.totalorder %s1971_s19, 2 }
   0xa   : > { %s2038_s25 = scalar_select %p68_p5, %s1959_s16, %s70_s23  }
   0xb   : > { %198 = sbr.rel (%p1609_p7) target bundleno = 64 (0x40), region = 20 }
  0x12   : > { %201 = sbr.rel (!%p79_p3) target bundleno = 64 (0x40), region = 24  ;;  %s203_s26 = sand.u32 (%p79_p3), 1, %s1959_s16  }
  0x13   : > { %s1611_s27 = sshll.u32 (%p79_p3), %s1967_s18, 2  ;;  %s1610_s28 = sshll.u32 (%p79_p3), %s203_s26, 8 }
  0x14   : > { %s2046_s5 = scalar_lea.vmem (%p79_p3), %s2415_s1, %s1611_s27  ;;  %s2050_s6 = scalar_lea.vmem (%p79_p3), [#allocation3], %s1610_s28 }
  0x15   : > { %v226_v0 = vld [vmem:[%s2046_s5] sm:$0xf] (%p79_p3)  ;;  %v228_v1 = vld [vmem:[%s2046_s5 + $0x8] sm:$0xf] (%p79_p3)  ;;  %v230_v2 = vld [vmem:[%s2046_s5 + $0x10] sm:$0xf] (%p79_p3) }
  0x16   : > { %227 = vst [vmem:[%s2050_s6] sm:$0xf] (%p79_p3), %v226_v0  ;;  %229 = vst [vmem:[%s2050_s6 + $0x4] sm:$0xf] (%p79_p3), %v228_v1  ;;  %v232_v3 = vld [vmem:[%s2046_s5 + $0x18] sm:$0xf] (%p79_p3) }
  0x17   : > { %v234_v4 = vld [vmem:[%s2046_s5 + $0x20] sm:$0xf] (%p79_p3)  ;;  %231 = vst [vmem:[%s2050_s6 + $0x8] sm:$0xf] (%p79_p3), %v230_v2  ;;  %233 = vst [vmem:[%s2050_s6 + $0xc] sm:$0xf] (%p79_p3), %v232_v3 }
  0x18   : > { %235 = vst [vmem:[%s2050_s6 + $0x10] sm:$0xf] (%p79_p3), %v234_v4  ;;  %v236_v5 = vld [vmem:[%s2046_s5 + $0x28] sm:$0xf] (%p79_p3)  ;;  %v238_v6 = vld [vmem:[%s2046_s5 + $0x30] sm:$0xf] (%p79_p3) }
  0x19   : > { %v240_v7 = vld [vmem:[%s2046_s5 + $0x38] sm:$0xf]  ;;  %237 = vst [vmem:[%s2050_s6 + $0x14] sm:$0xf] %v236_v5  ;;  %239 = vst [vmem:[%s2050_s6 + $0x18] sm:$0xf] %v238_v6 }
  0x1a   : > { %241 = vst [vmem:[%s2050_s6 + $0x1c] sm:$0xf] %v240_v7  ;;  %v242_v8 = vld [vmem:[%s2046_s5 + $0x40] sm:$0xf]  ;;  %v244_v9 = vld [vmem:[%s2046_s5 + $0x48] sm:$0xf] }
  0x1b   : > { %v246_v10 = vld [vmem:[%s2046_s5 + $0x50] sm:$0xf]  ;;  %243 = vst [vmem:[%s2050_s6 + $0x20] sm:$0xf] %v242_v8  ;;  %245 = vst [vmem:[%s2050_s6 + $0x24] sm:$0xf] %v244_v9 }
  0x1c   : > { %247 = vst [vmem:[%s2050_s6 + $0x28] sm:$0xf] %v246_v10  ;;  %v248_v11 = vld [vmem:[%s2046_s5 + $0x58] sm:$0xf]  ;;  %v250_v12 = vld [vmem:[%s2046_s5 + $0x60] sm:$0xf] }
  0x1d   : > { %v252_v13 = vld [vmem:[%s2046_s5 + $0x68] sm:$0xf]  ;;  %249 = vst [vmem:[%s2050_s6 + $0x2c] sm:$0xf] %v248_v11  ;;  %251 = vst [vmem:[%s2050_s6 + $0x30] sm:$0xf] %v250_v12 }
  0x1e   : > { %253 = vst [vmem:[%s2050_s6 + $0x34] sm:$0xf] %v252_v13  ;;  %v254_v14 = vld [vmem:[%s2046_s5 + $0x70] sm:$0xf]  ;;  %v256_v15 = vld [vmem:[%s2046_s5 + $0x78] sm:$0xf] }
  0x1f   : > { %v258_v16 = vld [vmem:[%s2046_s5 + $0x80] sm:$0xf]  ;;  %255 = vst [vmem:[%s2050_s6 + $0x38] sm:$0xf] %v254_v14  ;;  %257 = vst [vmem:[%s2050_s6 + $0x3c] sm:$0xf] %v256_v15 }
  0x20   : > { %259 = vst [vmem:[%s2050_s6 + $0x40] sm:$0xf] %v258_v16  ;;  %v260_v17 = vld [vmem:[%s2046_s5 + $0x88] sm:$0xf]  ;;  %v262_v18 = vld [vmem:[%s2046_s5 + $0x90] sm:$0xf] }
  0x21   : > { %v264_v19 = vld [vmem:[%s2046_s5 + $0x98] sm:$0xf]  ;;  %261 = vst [vmem:[%s2050_s6 + $0x44] sm:$0xf] %v260_v17  ;;  %263 = vst [vmem:[%s2050_s6 + $0x48] sm:$0xf] %v262_v18 }
  0x22   : > { %265 = vst [vmem:[%s2050_s6 + $0x4c] sm:$0xf] %v264_v19  ;;  %v266_v20 = vld [vmem:[%s2046_s5 + $0xa0] sm:$0xf]  ;;  %v268_v21 = vld [vmem:[%s2046_s5 + $0xa8] sm:$0xf] }
  0x23   : > { %v270_v22 = vld [vmem:[%s2046_s5 + $0xb0] sm:$0xf]  ;;  %267 = vst [vmem:[%s2050_s6 + $0x50] sm:$0xf] %v266_v20  ;;  %269 = vst [vmem:[%s2050_s6 + $0x54] sm:$0xf] %v268_v21 }
  0x24   : > { %271 = vst [vmem:[%s2050_s6 + $0x58] sm:$0xf] %v270_v22  ;;  %v272_v23 = vld [vmem:[%s2046_s5 + $0xb8] sm:$0xf]  ;;  %v274_v24 = vld [vmem:[%s2046_s5 + $0xc0] sm:$0xf] }
  0x25   : > { %v276_v25 = vld [vmem:[%s2046_s5 + $0xc8] sm:$0xf]  ;;  %273 = vst [vmem:[%s2050_s6 + $0x5c] sm:$0xf] %v272_v23  ;;  %275 = vst [vmem:[%s2050_s6 + $0x60] sm:$0xf] %v274_v24 }
  0x26   : > { %277 = vst [vmem:[%s2050_s6 + $0x64] sm:$0xf] %v276_v25  ;;  %v278_v26 = vld [vmem:[%s2046_s5 + $0xd0] sm:$0xf]  ;;  %v280_v27 = vld [vmem:[%s2046_s5 + $0xd8] sm:$0xf] }
  0x27   : > { %v282_v28 = vld [vmem:[%s2046_s5 + $0xe0] sm:$0xf]  ;;  %279 = vst [vmem:[%s2050_s6 + $0x68] sm:$0xf] %v278_v26  ;;  %281 = vst [vmem:[%s2050_s6 + $0x6c] sm:$0xf] %v280_v27 }
  0x28   : > { %283 = vst [vmem:[%s2050_s6 + $0x70] sm:$0xf] %v282_v28  ;;  %v284_v29 = vld [vmem:[%s2046_s5 + $0xe8] sm:$0xf]  ;;  %v286_v30 = vld [vmem:[%s2046_s5 + $0xf0] sm:$0xf] }
  0x29   : > { %v288_v31 = vld [vmem:[%s2046_s5 + $0xf8] sm:$0xf]  ;;  %285 = vst [vmem:[%s2050_s6 + $0x74] sm:$0xf] %v284_v29  ;;  %287 = vst [vmem:[%s2050_s6 + $0x78] sm:$0xf] %v286_v30 }
  0x2a   : > { %289 = vst [vmem:[%s2050_s6 + $0x7c] sm:$0xf] %v288_v31  ;;  %v290_v32 = vld [vmem:[%s2046_s5 + $0x100] sm:$0xf]  ;;  %v292_v33 = vld [vmem:[%s2046_s5 + $0x108] sm:$0xf] }
  0x2b   : > { %v294_v34 = vld [vmem:[%s2046_s5 + $0x110] sm:$0xf]  ;;  %291 = vst [vmem:[%s2050_s6 + $0x80] sm:$0xf] %v290_v32  ;;  %293 = vst [vmem:[%s2050_s6 + $0x84] sm:$0xf] %v292_v33 }
  0x2c   : > { %295 = vst [vmem:[%s2050_s6 + $0x88] sm:$0xf] %v294_v34  ;;  %v296_v35 = vld [vmem:[%s2046_s5 + $0x118] sm:$0xf]  ;;  %v298_v36 = vld [vmem:[%s2046_s5 + $0x120] sm:$0xf] }
  0x2d   : > { %v300_v37 = vld [vmem:[%s2046_s5 + $0x128] sm:$0xf]  ;;  %297 = vst [vmem:[%s2050_s6 + $0x8c] sm:$0xf] %v296_v35  ;;  %299 = vst [vmem:[%s2050_s6 + $0x90] sm:$0xf] %v298_v36 }
  0x2e   : > { %301 = vst [vmem:[%s2050_s6 + $0x94] sm:$0xf] %v300_v37  ;;  %v302_v38 = vld [vmem:[%s2046_s5 + $0x130] sm:$0xf]  ;;  %v304_v39 = vld [vmem:[%s2046_s5 + $0x138] sm:$0xf] }
  0x2f   : > { %v306_v40 = vld [vmem:[%s2046_s5 + $0x140] sm:$0xf]  ;;  %303 = vst [vmem:[%s2050_s6 + $0x98] sm:$0xf] %v302_v38  ;;  %305 = vst [vmem:[%s2050_s6 + $0x9c] sm:$0xf] %v304_v39 }
  0x30   : > { %307 = vst [vmem:[%s2050_s6 + $0xa0] sm:$0xf] %v306_v40  ;;  %v308_v41 = vld [vmem:[%s2046_s5 + $0x148] sm:$0xf]  ;;  %v310_v42 = vld [vmem:[%s2046_s5 + $0x150] sm:$0xf] }
  0x31   : > { %v312_v43 = vld [vmem:[%s2046_s5 + $0x158] sm:$0xf]  ;;  %309 = vst [vmem:[%s2050_s6 + $0xa4] sm:$0xf] %v308_v41  ;;  %311 = vst [vmem:[%s2050_s6 + $0xa8] sm:$0xf] %v310_v42 }
  0x32   : > { %313 = vst [vmem:[%s2050_s6 + $0xac] sm:$0xf] %v312_v43  ;;  %v314_v44 = vld [vmem:[%s2046_s5 + $0x160] sm:$0xf]  ;;  %v316_v45 = vld [vmem:[%s2046_s5 + $0x168] sm:$0xf] }
  0x33   : > { %v318_v46 = vld [vmem:[%s2046_s5 + $0x170] sm:$0xf]  ;;  %315 = vst [vmem:[%s2050_s6 + $0xb0] sm:$0xf] %v314_v44  ;;  %317 = vst [vmem:[%s2050_s6 + $0xb4] sm:$0xf] %v316_v45 }
  0x34   : > { %319 = vst [vmem:[%s2050_s6 + $0xb8] sm:$0xf] %v318_v46  ;;  %v320_v47 = vld [vmem:[%s2046_s5 + $0x178] sm:$0xf]  ;;  %v322_v48 = vld [vmem:[%s2046_s5 + $0x180] sm:$0xf] }
  0x35   : > { %v324_v49 = vld [vmem:[%s2046_s5 + $0x188] sm:$0xf]  ;;  %321 = vst [vmem:[%s2050_s6 + $0xbc] sm:$0xf] %v320_v47  ;;  %323 = vst [vmem:[%s2050_s6 + $0xc0] sm:$0xf] %v322_v48 }
  0x36   : > { %325 = vst [vmem:[%s2050_s6 + $0xc4] sm:$0xf] %v324_v49  ;;  %v326_v50 = vld [vmem:[%s2046_s5 + $0x190] sm:$0xf]  ;;  %v328_v51 = vld [vmem:[%s2046_s5 + $0x198] sm:$0xf] }
  0x37   : > { %v330_v52 = vld [vmem:[%s2046_s5 + $0x1a0] sm:$0xf]  ;;  %327 = vst [vmem:[%s2050_s6 + $0xc8] sm:$0xf] %v326_v50  ;;  %329 = vst [vmem:[%s2050_s6 + $0xcc] sm:$0xf] %v328_v51 }
  0x38   : > { %331 = vst [vmem:[%s2050_s6 + $0xd0] sm:$0xf] %v330_v52  ;;  %v332_v53 = vld [vmem:[%s2046_s5 + $0x1a8] sm:$0xf]  ;;  %v334_v54 = vld [vmem:[%s2046_s5 + $0x1b0] sm:$0xf] }
  0x39   : > { %v336_v55 = vld [vmem:[%s2046_s5 + $0x1b8] sm:$0xf]  ;;  %333 = vst [vmem:[%s2050_s6 + $0xd4] sm:$0xf] %v332_v53  ;;  %335 = vst [vmem:[%s2050_s6 + $0xd8] sm:$0xf] %v334_v54 }
  0x3a   : > { %337 = vst [vmem:[%s2050_s6 + $0xdc] sm:$0xf] %v336_v55  ;;  %v338_v56 = vld [vmem:[%s2046_s5 + $0x1c0] sm:$0xf]  ;;  %v340_v57 = vld [vmem:[%s2046_s5 + $0x1c8] sm:$0xf] }
  0x3b   : > { %v342_v58 = vld [vmem:[%s2046_s5 + $0x1d0] sm:$0xf]  ;;  %339 = vst [vmem:[%s2050_s6 + $0xe0] sm:$0xf] %v338_v56  ;;  %341 = vst [vmem:[%s2050_s6 + $0xe4] sm:$0xf] %v340_v57 }
  0x3c   : > { %343 = vst [vmem:[%s2050_s6 + $0xe8] sm:$0xf] %v342_v58  ;;  %v344_v59 = vld [vmem:[%s2046_s5 + $0x1d8] sm:$0xf]  ;;  %v346_v60 = vld [vmem:[%s2046_s5 + $0x1e0] sm:$0xf] }
  0x3d   : > { %v348_v61 = vld [vmem:[%s2046_s5 + $0x1e8] sm:$0xf]  ;;  %345 = vst [vmem:[%s2050_s6 + $0xec] sm:$0xf] %v344_v59  ;;  %347 = vst [vmem:[%s2050_s6 + $0xf0] sm:$0xf] %v346_v60 }
  0x3e   : > { %349 = vst [vmem:[%s2050_s6 + $0xf4] sm:$0xf] %v348_v61  ;;  %v350_v62 = vld [vmem:[%s2046_s5 + $0x1f0] sm:$0xf]  ;;  %v352_v63 = vld [vmem:[%s2046_s5 + $0x1f8] sm:$0xf] }
  0x3f   : > { %351 = vst [vmem:[%s2050_s6 + $0xf8] sm:$0xf] %v350_v62  ;;  %353 = vst [vmem:[%s2050_s6 + $0xfc] sm:$0xf] %v352_v63 }
  0x40 PF: > { %p1612_p8 = scmp.ge.s32.totalorder %s1971_s19, 1  ;;  %p515_p9 = scmp.lt.s32.totalorder %s1971_s19, 3 }
  0x42   : > { %p516_p10 = pnand %p1612_p8, %p515_p9 }
  0x43   : > { %s522_s7 = sand.u32 (!%p516_p10), 1, %s1955_s15   ;;  %v1887_v0 = vld [vmem:[%s2414_s0 + $0x4] ss:$16 sps:$4 sm:$0xff] (!%p516_p10)   ;;  %v1890_v1 = vld [vmem:[%s2414_s0 + $0xc] ss:$16 sps:$4 sm:$0xff] (!%p516_p10)   ;;  %p575_p11 = scmp.lt.s32.totalorder (!%p516_p10), %s1963_s17, 1 }
  0x44   : > { %519 = sbr.rel (%p516_p10) target bundleno = 395 (0x18b), region = 73  ;;  %s1613_s8 = sshll.u32 (!%p516_p10), %s522_s7, 8  ;;  %1099 = vmatprep.mubr.bf16.mxu0 (!%p516_p10), %v1887_v0  ;;  %1196 = vmatprep.mubr.bf16.mxu1 (!%p516_p10), %v1890_v1  ;;  %v1885_v32 = vld [vmem:[%s2414_s0] ss:$16 sps:$4 sm:$0xff] (!%p516_p10)   ;;  %v1888_v34 = vld [vmem:[%s2414_s0 + $0x8] ss:$16 sps:$4 sm:$0xff] (!%p516_p10)  }
  0x45   : > { %s2189_s13 = scalar_lea.vmem (!%p516_p10), [#allocation3], %s1613_s8  ;;  %v1891_v36 = vld [vmem:[%s2414_s0 + $0x24] ss:$16 sps:$4 sm:$0xff] (!%p516_p10)   ;;  %v1893_v37 = vld [vmem:[%s2414_s0 + $0x2c] ss:$16 sps:$4 sm:$0xff] (!%p516_p10)  }
  0x46   : > { %v1853_v2 = vld [vmem:[%s2189_s13 + $0x40] sm:$0xff] (!%p516_p10)   ;;  %v1857_v6 = vld [vmem:[%s2189_s13 + $0x48] sm:$0xff] (!%p516_p10)   ;;  %v1861_v10 = vld [vmem:[%s2189_s13 + $0x50] sm:$0xff] (!%p516_p10)  }
  0x47   : > { %v1854_v3 = vld [vmem:[%s2189_s13 + $0xc0] sm:$0xff] (!%p516_p10)   ;;  %1685 = vmatprep.subr.bf16.mxu0 (!%p516_p10), %v1853_v2  ;;  %v1858_v7 = vld [vmem:[%s2189_s13 + $0xc8] sm:$0xff] (!%p516_p10)   ;;  %v1862_v11 = vld [vmem:[%s2189_s13 + $0xd0] sm:$0xff] (!%p516_p10)  }
  0x48   : > { %v1855_v4 = vld [vmem:[%s2189_s13] sm:$0xff] (!%p516_p10)   ;;  %1749 = vmatprep.subr.bf16.mxu1 (!%p516_p10), %v1854_v3  ;;  %v1859_v8 = vld [vmem:[%s2189_s13 + $0x8] sm:$0xff] (!%p516_p10)   ;;  %v1863_v12 = vld [vmem:[%s2189_s13 + $0x10] sm:$0xff] (!%p516_p10)  }
  0x49   : > { %v1856_v5 = vld [vmem:[%s2189_s13 + $0x80] sm:$0xff] (!%p516_p10)   ;;  %1686 = vmatpush3.bf16.msra.mxu0 (!%p516_p10), %v1855_v4  ;;  %v1860_v9 = vld [vmem:[%s2189_s13 + $0x88] sm:$0xff] (!%p516_p10)   ;;  %v1864_v13 = vld [vmem:[%s2189_s13 + $0x90] sm:$0xff] (!%p516_p10)  }
  0x4a   : > { %1750 = vmatpush3.bf16.msra.mxu1 (!%p516_p10), %v1856_v5  ;;  %1687 = vmatprep.subr.bf16.mxu0 (!%p516_p10), %v1857_v6  ;;  %v1865_v14 = vld [vmem:[%s2189_s13 + $0x58] sm:$0xff] (!%p516_p10)   ;;  %v1869_v18 = vld [vmem:[%s2189_s13 + $0x60] sm:$0xff] (!%p516_p10)   ;;  %v1873_v22 = vld [vmem:[%s2189_s13 + $0x68] sm:$0xff] (!%p516_p10)  }
  0x4b   : > { %1751 = vmatprep.subr.bf16.mxu1 %v1858_v7  ;;  %v1866_v15 = vld [vmem:[%s2189_s13 + $0xd8] sm:$0xff]   ;;  %v1870_v19 = vld [vmem:[%s2189_s13 + $0xe0] sm:$0xff]   ;;  %v1874_v23 = vld [vmem:[%s2189_s13 + $0xe8] sm:$0xff]   ;;  %s576_s5 = scalar_select %p575_p11, %s1963_s17, 1 }
  0x4c   : > { %v1867_v16 = vld [vmem:[%s2189_s13 + $0x18] sm:$0xff]   ;;  %v1871_v20 = vld [vmem:[%s2189_s13 + $0x20] sm:$0xff]   ;;  %v1875_v24 = vld [vmem:[%s2189_s13 + $0x28] sm:$0xff]  }
  0x4d   : > { %1688 = vmatpush3.bf16.msra.mxu0 %v1859_v8  ;;  %v1868_v17 = vld [vmem:[%s2189_s13 + $0x98] sm:$0xff]   ;;  %v1872_v21 = vld [vmem:[%s2189_s13 + $0xa0] sm:$0xff]   ;;  %v1876_v25 = vld [vmem:[%s2189_s13 + $0xa8] sm:$0xff]   ;;  %s577_s9 = scalar_lea.vmem %s2416_s2, %s576_s5  ;;  %s580_s12 = scalar_lea.vmem %s2417_s3, %s576_s5 }
  0x4e   : > { %1752 = vmatpush3.bf16.msra.mxu1 %v1860_v9  ;;  %1689 = vmatprep.subr.bf16.mxu0 %v1861_v10  ;;  %v1877_v26 = vld [vmem:[%s2189_s13 + $0x70] sm:$0xff]   ;;  %v1881_v30 = vld [vmem:[%s2189_s13 + $0x78] sm:$0xff]  }
  0x4f   : > { %1753 = vmatprep.subr.bf16.mxu1 %v1862_v11  ;;  %v1878_v27 = vld [vmem:[%s2189_s13 + $0xf0] sm:$0xff]   ;;  %v1882_v31 = vld [vmem:[%s2189_s13 + $0xf8] sm:$0xff]  }
  0x50   : > { %v1879_v28 = vld [vmem:[%s2189_s13 + $0x30] sm:$0xff]   ;;  %v1883_v33 = vld [vmem:[%s2189_s13 + $0x38] sm:$0xff]  }
  0x51   : > { %1690 = vmatpush3.bf16.msra.mxu0 %v1863_v12  ;;  %v1880_v29 = vld [vmem:[%s2189_s13 + $0xb0] sm:$0xff]   ;;  %v1884_v35 = vld [vmem:[%s2189_s13 + $0xb8] sm:$0xff]   ;;  %s1614_s13 = sshll.u32 %s522_s7, 7  ;;  %s1682_s7 = sshll.u32 (%p2033_p6), %s1963_s17, 3 }
  0x52   : > { %1754 = vmatpush3.bf16.msra.mxu1 %v1864_v13  ;;  %1691 = vmatprep.subr.bf16.mxu0 %v1865_v14  ;;  %v1895_v38 = vld [vmem:[%s2414_s0 + $0x20] ss:$16 sps:$4 sm:$0xff]   ;;  %v1896_v39 = vld [vmem:[%s2414_s0 + $0x28] ss:$16 sps:$4 sm:$0xff]   ;;  %v1897_v40 = vld [vmem:[%s2414_s0 + $0x44] ss:$16 sps:$4 sm:$0xff]   ;;  %s1401_s22 = scalar_lea.vmem (%p2033_p6), %s2418_s4, %s1682_s7 }
  0x53   : > { %1755 = vmatprep.subr.bf16.mxu1 %v1866_v15  ;;  %v1899_v41 = vld [vmem:[%s2414_s0 + $0x4c] ss:$16 sps:$4 sm:$0xff]   ;;  %v1901_v42 = vld [vmem:[%s2414_s0 + $0x40] ss:$16 sps:$4 sm:$0xff]   ;;  %v1902_v43 = vld [vmem:[%s2414_s0 + $0x48] ss:$16 sps:$4 sm:$0xff]  }
  0x54   : > { %v1903_v44 = vld [vmem:[%s2414_s0 + $0x64] ss:$16 sps:$4 sm:$0xff]   ;;  %v1905_v45 = vld [vmem:[%s2414_s0 + $0x6c] ss:$16 sps:$4 sm:$0xff]   ;;  %v1907_v46 = vld [vmem:[%s2414_s0 + $0x60] ss:$16 sps:$4 sm:$0xff]  }
  0x55   : > { %1692 = vmatpush3.bf16.msra.mxu0 %v1867_v16  ;;  %v1908_v47 = vld [vmem:[%s2414_s0 + $0x68] ss:$16 sps:$4 sm:$0xff]   ;;  %v1909_v48 = vld [vmem:[%s2414_s0 + $0x84] ss:$16 sps:$4 sm:$0xff]   ;;  %v1911_v49 = vld [vmem:[%s2414_s0 + $0x8c] ss:$16 sps:$4 sm:$0xff]  }
  0x56   : > { %1756 = vmatpush3.bf16.msra.mxu1 %v1868_v17  ;;  %1693 = vmatprep.subr.bf16.mxu0 %v1869_v18  ;;  %v1913_v50 = vld [vmem:[%s2414_s0 + $0x80] ss:$16 sps:$4 sm:$0xff]   ;;  %v1914_v51 = vld [vmem:[%s2414_s0 + $0x88] ss:$16 sps:$4 sm:$0xff]   ;;  %v1915_v52 = vld [vmem:[%s2414_s0 + $0xa4] ss:$16 sps:$4 sm:$0xff]  }
  0x57   : > { %1757 = vmatprep.subr.bf16.mxu1 %v1870_v19  ;;  %v1917_v53 = vld [vmem:[%s2414_s0 + $0xac] ss:$16 sps:$4 sm:$0xff]   ;;  %v1919_v54 = vld [vmem:[%s2414_s0 + $0xa0] ss:$16 sps:$4 sm:$0xff]   ;;  %v1920_v55 = vld [vmem:[%s2414_s0 + $0xa8] ss:$16 sps:$4 sm:$0xff]  }
  0x58   : > { %v1921_v56 = vld [vmem:[%s2414_s0 + $0xc4] ss:$16 sps:$4 sm:$0xff]   ;;  %v1923_v57 = vld [vmem:[%s2414_s0 + $0xcc] ss:$16 sps:$4 sm:$0xff]   ;;  %v1925_v58 = vld [vmem:[%s2414_s0 + $0xc0] ss:$16 sps:$4 sm:$0xff]  }
  0x59   : > { %1694 = vmatpush3.bf16.msra.mxu0 %v1871_v20  ;;  %v1926_v59 = vld [vmem:[%s2414_s0 + $0xc8] ss:$16 sps:$4 sm:$0xff]   ;;  %v1927_v60 = vld [vmem:[%s2414_s0 + $0xe4] ss:$16 sps:$4 sm:$0xff]   ;;  %v1929_v61 = vld [vmem:[%s2414_s0 + $0xec] ss:$16 sps:$4 sm:$0xff]  }
  0x5a   : > { %1758 = vmatpush3.bf16.msra.mxu1 %v1872_v21  ;;  %1695 = vmatprep.subr.bf16.mxu0 %v1873_v22  ;;  %v1931_v62 = vld [vmem:[%s2414_s0 + $0xe0] ss:$16 sps:$4 sm:$0xff]   ;;  %v1932_v63 = vld [vmem:[%s2414_s0 + $0xe8] ss:$16 sps:$4 sm:$0xff]   ;;  %s2331_s15 = scalar_lea.vmem [#allocation4], %s1614_s13 }
  0x5b   : > { %1759 = vmatprep.subr.bf16.mxu1 %v1874_v23  ;;  %v2321_v9 = vld [vmem:[%s577_s9] ss:$0 sm:$0xff] }
  0x5c   : > { %v2323_v14 = vld [vmem:[%s580_s12] ss:$0 sm:$0xff] }
  0x5d   : > { %1696 = vmatpush3.bf16.msra.mxu0 %v1875_v24 }
  0x5e   : > { %1760 = vmatpush3.bf16.msra.mxu1 %v1876_v25  ;;  %1697 = vmatprep.subr.bf16.mxu0 %v1877_v26 }
  0x5f   : > { %1761 = vmatprep.subr.bf16.mxu1 %v1878_v27 }
  0x61   : > { %1698 = vmatpush3.bf16.msra.mxu0 %v1879_v28 }
  0x62   : > { %1762 = vmatpush3.bf16.msra.mxu1 %v1880_v29  ;;  %1699 = vmatprep.subr.bf16.mxu0 %v1881_v30 }
  0x63   : > { %1763 = vmatprep.subr.bf16.mxu1 %v1882_v31 }
  0x65   : > { %1700 = vmatpush3.bf16.msra.mxu0 %v1883_v33 }
  0x66   : > { %1764 = vmatpush3.bf16.msra.mxu1 %v1884_v35 }
  0x68   : > { %1100 = vmatmul.mubr.bf16.vlgmr.msra.gmra.mrb[0].mxu0 %v1885_v32 }
  0x69   : > { %1197 = vmatmul.mubr.bf16.vlgmr.msra.gmra.mrb[0].mxu1 %v1888_v34  ;;  %1107 = vmatprep.mubr.bf16.mxu0 %v1891_v36 }
  0x6a   : > { %1204 = vmatprep.mubr.bf16.mxu1 %v1893_v37 }
  0x70   : > { %1108 = vmatmul.mubr.bf16.gmra.mrb[4].mxu0 %v1895_v38 }
  0x71   : > { %1205 = vmatmul.mubr.bf16.gmra.mrb[4].mxu1 %v1896_v39  ;;  %1115 = vmatprep.mubr.bf16.mxu0 %v1897_v40 }
  0x72   : > { %1212 = vmatprep.mubr.bf16.mxu1 %v1899_v41 }
  0x78   : > { %1116 = vmatmul.mubr.bf16.gmra.mrb[8].mxu0 %v1901_v42 }
  0x79   : > { %1213 = vmatmul.mubr.bf16.gmra.mrb[8].mxu1 %v1902_v43  ;;  %1123 = vmatprep.mubr.bf16.mxu0 %v1903_v44 }
  0x7a   : > { %1220 = vmatprep.mubr.bf16.mxu1 %v1905_v45 }
  0x80   : > { %1124 = vmatmul.mubr.bf16.gmra.mrb[12].mxu0 %v1907_v46 }
  0x81   : > { %1221 = vmatmul.mubr.bf16.gmra.mrb[12].mxu1 %v1908_v47  ;;  %1131 = vmatprep.mubr.bf16.mxu0 %v1909_v48 }
  0x82   : > { %1228 = vmatprep.mubr.bf16.mxu1 %v1911_v49 }
  0x88   : > { %1132 = vmatmul.mubr.bf16.gmra.mrb[16].mxu0 %v1913_v50 }
  0x89   : > { %1229 = vmatmul.mubr.bf16.gmra.mrb[16].mxu1 %v1914_v51  ;;  %1139 = vmatprep.mubr.bf16.mxu0 %v1915_v52 }
  0x8a   : > { %1236 = vmatprep.mubr.bf16.mxu1 %v1917_v53 }
  0x90   : > { %1140 = vmatmul.mubr.bf16.gmra.mrb[20].mxu0 %v1919_v54 }
  0x91   : > { %1237 = vmatmul.mubr.bf16.gmra.mrb[20].mxu1 %v1920_v55  ;;  %1147 = vmatprep.mubr.bf16.mxu0 %v1921_v56 }
  0x92   : > { %1244 = vmatprep.mubr.bf16.mxu1 %v1923_v57 }
  0x98   : > { %1148 = vmatmul.mubr.bf16.gmra.mrb[24].mxu0 %v1925_v58 }
  0x99   : > { %1245 = vmatmul.mubr.bf16.gmra.mrb[24].mxu1 %v1926_v59  ;;  %1155 = vmatprep.mubr.bf16.mxu0 %v1927_v60 }
  0x9a   : > { %1252 = vmatprep.mubr.bf16.mxu1 %v1929_v61 }
  0xa0   : > { %1156 = vmatmul.mubr.bf16.gmra.mrb[28].mxu0 %v1931_v62 }
  0xa1   : > { %1253 = vmatmul.mubr.bf16.gmra.mrb[28].mxu1 %v1932_v63 }
 0x13b   : > { %v1701_v0 = vpop.f32.mrb[0].mxu0 }
 0x13c   : > { %v1765_v1 = vpop.f32.mrb[0].mxu1  ;;  %v1702_v2 = vpop.f32.mrb[1].mxu0 }
 0x13d   : > { %v1703_v3 = vadd.f32 %v1702_v2, %v1701_v0  ;;  %v1766_v4 = vpop.f32.mrb[1].mxu1  ;;  %v1704_v5 = vpop.f32.mrb[2].mxu0 }
 0x13e   : > { %v1767_v6 = vadd.f32 %v1766_v4, %v1765_v1  ;;  %v1768_v7 = vpop.f32.mrb[2].mxu1  ;;  %v1705_v8 = vpop.f32.mrb[3].mxu0 }
 0x13f   : > { %v1706_v10 = vadd.f32 %v1705_v8, %v1704_v5  ;;  %v1769_v11 = vpop.f32.mrb[3].mxu1 }
 0x140   : > { %v1199_v12 = vadd.f32 %v1767_v6, %v1703_v3  ;;  %v1770_v13 = vadd.f32 %v1769_v11, %v1768_v7 }
 0x142   : > { %v1319_v15 = vmul.f32 %v2321_v9, %v1199_v12  ;;  %v1202_v16 = vadd.f32 %v1770_v13, %v1706_v10 }
 0x143   : > { %v1707_v17 = vpop.f32.mrb[4].mxu0 }
 0x144   : > { %v1342_v18 = vadd.f32 %v2323_v14, %v1319_v15  ;;  %v1320_v19 = vmul.f32 %v2321_v9, %v1202_v16  ;;  %v1771_v20 = vpop.f32.mrb[4].mxu1  ;;  %v1708_v21 = vpop.f32.mrb[5].mxu0 }
 0x145   : > { %v1709_v22 = vadd.f32 %v1708_v21, %v1707_v17  ;;  %v1772_v23 = vpop.f32.mrb[5].mxu1  ;;  %v1710_v24 = vpop.f32.mrb[6].mxu0 }
 0x146   : > { %v1358_v25 = vmax.f32 %v1342_v18, 0.0  ;;  %v1343_v26 = vadd.f32 %v2323_v14, %v1320_v19  ;;  %v1773_v27 = vadd.f32 %v1772_v23, %v1771_v20  ;;  %v1774_v28 = vpop.f32.mrb[6].mxu1  ;;  %v1711_v29 = vpop.f32.mrb[7].mxu0 }
 0x147   : > { %v1712_v30 = vadd.f32 %v1711_v29, %v1710_v24  ;;  %v1775_v31 = vpop.f32.mrb[7].mxu1 }
 0x148   : > { %1374 = vst [vmem:[%s2331_s15] sm:$0xff] %v1358_v25  ;;  %v1359_v32 = vmax.f32 %v1343_v26, 0.0  ;;  %v1207_v33 = vadd.f32 %v1773_v27, %v1709_v22  ;;  %v1776_v34 = vadd.f32 %v1775_v31, %v1774_v28 }
 0x14a   : > { %1375 = vst [vmem:[%s2331_s15 + $0x8] sm:$0xff] %v1359_v32  ;;  %v1321_v35 = vmul.f32 %v2321_v9, %v1207_v33  ;;  %v1210_v36 = vadd.f32 %v1776_v34, %v1712_v30 }
 0x14b   : > { %v1713_v37 = vpop.f32.mrb[8].mxu0 }
 0x14c   : > { %v1344_v38 = vadd.f32 %v2323_v14, %v1321_v35  ;;  %v1322_v39 = vmul.f32 %v2321_v9, %v1210_v36  ;;  %v1777_v40 = vpop.f32.mrb[8].mxu1  ;;  %v1714_v41 = vpop.f32.mrb[9].mxu0 }
 0x14d   : > { %v1715_v42 = vadd.f32 %v1714_v41, %v1713_v37  ;;  %v1778_v43 = vpop.f32.mrb[9].mxu1  ;;  %v1716_v44 = vpop.f32.mrb[10].mxu0 }
 0x14e   : > { %v1360_v45 = vmax.f32 %v1344_v38, 0.0  ;;  %v1345_v46 = vadd.f32 %v2323_v14, %v1322_v39  ;;  %v1779_v47 = vadd.f32 %v1778_v43, %v1777_v40  ;;  %v1780_v48 = vpop.f32.mrb[10].mxu1  ;;  %v1717_v49 = vpop.f32.mrb[11].mxu0 }
 0x14f   : > { %v1718_v50 = vadd.f32 %v1717_v49, %v1716_v44  ;;  %v1781_v51 = vpop.f32.mrb[11].mxu1 }
 0x150   : > { %1376 = vst [vmem:[%s2331_s15 + $0x10] sm:$0xff] %v1360_v45  ;;  %v1361_v52 = vmax.f32 %v1345_v46, 0.0  ;;  %v1215_v53 = vadd.f32 %v1779_v47, %v1715_v42  ;;  %v1782_v54 = vadd.f32 %v1781_v51, %v1780_v48 }
 0x152   : > { %1377 = vst [vmem:[%s2331_s15 + $0x18] sm:$0xff] %v1361_v52  ;;  %v1323_v55 = vmul.f32 %v2321_v9, %v1215_v53  ;;  %v1218_v56 = vadd.f32 %v1782_v54, %v1718_v50 }
 0x153   : > { %v1719_v57 = vpop.f32.mrb[12].mxu0 }
 0x154   : > { %v1346_v58 = vadd.f32 %v2323_v14, %v1323_v55  ;;  %v1324_v59 = vmul.f32 %v2321_v9, %v1218_v56  ;;  %v1783_v60 = vpop.f32.mrb[12].mxu1  ;;  %v1720_v61 = vpop.f32.mrb[13].mxu0 }
 0x155   : > { %v1721_v62 = vadd.f32 %v1720_v61, %v1719_v57  ;;  %v1784_v63 = vpop.f32.mrb[13].mxu1  ;;  %v1722_v0 = vpop.f32.mrb[14].mxu0 }
 0x156   : > { %v1362_v1 = vmax.f32 %v1346_v58, 0.0  ;;  %v1347_v2 = vadd.f32 %v2323_v14, %v1324_v59  ;;  %v1785_v3 = vadd.f32 %v1784_v63, %v1783_v60  ;;  %v1786_v4 = vpop.f32.mrb[14].mxu1  ;;  %v1723_v5 = vpop.f32.mrb[15].mxu0 }
 0x157   : > { %v1724_v6 = vadd.f32 %v1723_v5, %v1722_v0  ;;  %v1787_v7 = vpop.f32.mrb[15].mxu1 }
 0x158   : > { %1378 = vst [vmem:[%s2331_s15 + $0x20] sm:$0xff] %v1362_v1  ;;  %v1363_v8 = vmax.f32 %v1347_v2, 0.0  ;;  %v1223_v10 = vadd.f32 %v1785_v3, %v1721_v62  ;;  %v1788_v11 = vadd.f32 %v1787_v7, %v1786_v4 }
 0x15a   : > { %1379 = vst [vmem:[%s2331_s15 + $0x28] sm:$0xff] %v1363_v8  ;;  %v1325_v12 = vmul.f32 %v2321_v9, %v1223_v10  ;;  %v1226_v13 = vadd.f32 %v1788_v11, %v1724_v6 }
 0x15b   : > { %v1725_v15 = vpop.f32.mrb[16].mxu0 }
 0x15c   : > { %v1348_v16 = vadd.f32 %v2323_v14, %v1325_v12  ;;  %v1326_v17 = vmul.f32 %v2321_v9, %v1226_v13  ;;  %v1789_v18 = vpop.f32.mrb[16].mxu1  ;;  %v1726_v19 = vpop.f32.mrb[17].mxu0 }
 0x15d   : > { %v1727_v20 = vadd.f32 %v1726_v19, %v1725_v15  ;;  %v1790_v21 = vpop.f32.mrb[17].mxu1  ;;  %v1728_v22 = vpop.f32.mrb[18].mxu0 }
 0x15e   : > { %v1364_v23 = vmax.f32 %v1348_v16, 0.0  ;;  %v1349_v24 = vadd.f32 %v2323_v14, %v1326_v17  ;;  %v1791_v25 = vadd.f32 %v1790_v21, %v1789_v18  ;;  %v1792_v26 = vpop.f32.mrb[18].mxu1  ;;  %v1729_v27 = vpop.f32.mrb[19].mxu0 }
 0x15f   : > { %v1730_v28 = vadd.f32 %v1729_v27, %v1728_v22  ;;  %v1793_v29 = vpop.f32.mrb[19].mxu1 }
 0x160   : > { %1380 = vst [vmem:[%s2331_s15 + $0x30] sm:$0xff] %v1364_v23  ;;  %v1365_v30 = vmax.f32 %v1349_v24, 0.0  ;;  %v1231_v31 = vadd.f32 %v1791_v25, %v1727_v20  ;;  %v1794_v32 = vadd.f32 %v1793_v29, %v1792_v26 }
 0x162   : > { %1381 = vst [vmem:[%s2331_s15 + $0x38] sm:$0xff] %v1365_v30  ;;  %v1327_v33 = vmul.f32 %v2321_v9, %v1231_v31  ;;  %v1234_v34 = vadd.f32 %v1794_v32, %v1730_v28 }
 0x163   : > { %v1731_v35 = vpop.f32.mrb[20].mxu0 }
 0x164   : > { %v1350_v36 = vadd.f32 %v2323_v14, %v1327_v33  ;;  %v1328_v37 = vmul.f32 %v2321_v9, %v1234_v34  ;;  %v1795_v38 = vpop.f32.mrb[20].mxu1  ;;  %v1732_v39 = vpop.f32.mrb[21].mxu0 }
 0x165   : > { %v1733_v40 = vadd.f32 %v1732_v39, %v1731_v35  ;;  %v1796_v41 = vpop.f32.mrb[21].mxu1  ;;  %v1734_v42 = vpop.f32.mrb[22].mxu0  ;;  %v1465_v39 = vld [vmem:[%s2331_s15 + $0x18] sm:$0xff] (%p2033_p6) }
 0x166   : > { %v1366_v43 = vmax.f32 %v1350_v36, 0.0  ;;  %v1351_v44 = vadd.f32 %v2323_v14, %v1328_v37  ;;  %v1797_v45 = vadd.f32 %v1796_v41, %v1795_v38  ;;  %v1798_v46 = vpop.f32.mrb[22].mxu1  ;;  %v1735_v47 = vpop.f32.mrb[23].mxu0  ;;  %v1461_v38 = vld [vmem:[%s2331_s15 + $0x8] sm:$0xff] (%p2033_p6)  ;;  %1466 = vst [vmem:[%s1401_s22 + $0x30] sm:$0xff] (%p2033_p6), %v1465_v39 }
 0x167   : > { %v1736_v48 = vadd.f32 %v1735_v47, %v1734_v42  ;;  %v1799_v49 = vpop.f32.mrb[23].mxu1  ;;  %v1469_v41 = vld [vmem:[%s2331_s15 + $0x28] sm:$0xff] (%p2033_p6)  ;;  %1462 = vst [vmem:[%s1401_s22 + $0x10] sm:$0xff] (%p2033_p6), %v1461_v38  ;;  %v1471_v42 = vld [vmem:[%s2331_s15 + $0x30] sm:$0xff] (%p2033_p6) }
 0x168   : > { %1382 = vst [vmem:[%s2331_s15 + $0x40] sm:$0xff] %v1366_v43  ;;  %v1367_v50 = vmax.f32 %v1351_v44, 0.0  ;;  %v1239_v51 = vadd.f32 %v1797_v45, %v1733_v40  ;;  %v1800_v52 = vadd.f32 %v1799_v49, %v1798_v46  ;;  %v1467_v40 = vld [vmem:[%s2331_s15 + $0x20] sm:$0xff] (%p2033_p6)  ;;  %1470 = vst [vmem:[%s1401_s22 + $0x50] sm:$0xff] (%p2033_p6), %v1469_v41 }
 0x169   : > { %1468 = vst [vmem:[%s1401_s22 + $0x40] sm:$0xff] (%p2033_p6), %v1467_v40  ;;  %v1473_v43 = vld [vmem:[%s2331_s15 + $0x38] sm:$0xff] (%p2033_p6)  ;;  %1472 = vst [vmem:[%s1401_s22 + $0x60] sm:$0xff] (%p2033_p6), %v1471_v42 }
 0x16a   : > { %1383 = vst [vmem:[%s2331_s15 + $0x48] sm:$0xff] %v1367_v50  ;;  %v1329_v53 = vmul.f32 %v2321_v9, %v1239_v51  ;;  %v1242_v54 = vadd.f32 %v1800_v52, %v1736_v48  ;;  %1474 = vst [vmem:[%s1401_s22 + $0x70] sm:$0xff] (%p2033_p6), %v1473_v43 }
 0x16b   : > { %v1737_v55 = vpop.f32.mrb[24].mxu0 }
 0x16c   : > { %v1352_v56 = vadd.f32 %v2323_v14, %v1329_v53  ;;  %v1330_v57 = vmul.f32 %v2321_v9, %v1242_v54  ;;  %v1801_v58 = vpop.f32.mrb[24].mxu1  ;;  %v1738_v59 = vpop.f32.mrb[25].mxu0 }
 0x16d   : > { %v1739_v60 = vadd.f32 %v1738_v59, %v1737_v55  ;;  %v1802_v61 = vpop.f32.mrb[25].mxu1  ;;  %v1740_v62 = vpop.f32.mrb[26].mxu0 }
 0x16e   : > { %v1368_v63 = vmax.f32 %v1352_v56, 0.0  ;;  %v1353_v0 = vadd.f32 %v2323_v14, %v1330_v57  ;;  %v1803_v1 = vadd.f32 %v1802_v61, %v1801_v58  ;;  %v1804_v2 = vpop.f32.mrb[26].mxu1  ;;  %v1741_v3 = vpop.f32.mrb[27].mxu0 }
 0x16f   : > { %v1742_v4 = vadd.f32 %v1741_v3, %v1740_v62  ;;  %v1805_v5 = vpop.f32.mrb[27].mxu1  ;;  %v1475_v44 = vld [vmem:[%s2331_s15 + $0x40] sm:$0xff] (%p2033_p6) }
 0x170   : > { %1384 = vst [vmem:[%s2331_s15 + $0x50] sm:$0xff] %v1368_v63  ;;  %v1369_v6 = vmax.f32 %v1353_v0, 0.0  ;;  %v1247_v7 = vadd.f32 %v1803_v1, %v1739_v60  ;;  %v1806_v8 = vadd.f32 %v1805_v5, %v1804_v2  ;;  %1476 = vst [vmem:[%s1401_s22 + $0x80] sm:$0xff] (%p2033_p6), %v1475_v44 }
 0x171   : > { %v1477_v45 = vld [vmem:[%s2331_s15 + $0x48] sm:$0xff] (%p2033_p6) }
 0x172   : > { %1385 = vst [vmem:[%s2331_s15 + $0x58] sm:$0xff] %v1369_v6  ;;  %v1331_v10 = vmul.f32 %v2321_v9, %v1247_v7  ;;  %v1250_v11 = vadd.f32 %v1806_v8, %v1742_v4  ;;  %1478 = vst [vmem:[%s1401_s22 + $0x90] sm:$0xff] (%p2033_p6), %v1477_v45 }
 0x173   : > { %v1743_v12 = vpop.f32.mrb[28].mxu0 }
 0x174   : > { %v1354_v13 = vadd.f32 %v2323_v14, %v1331_v10  ;;  %v1332_v15 = vmul.f32 %v2321_v9, %v1250_v11  ;;  %v1807_v16 = vpop.f32.mrb[28].mxu1  ;;  %v1744_v17 = vpop.f32.mrb[29].mxu0 }
 0x175   : > { %v1745_v18 = vadd.f32 %v1744_v17, %v1743_v12  ;;  %v1808_v19 = vpop.f32.mrb[29].mxu1  ;;  %v1746_v20 = vpop.f32.mrb[30].mxu0 }
 0x176   : > { %v1370_v21 = vmax.f32 %v1354_v13, 0.0  ;;  %v1355_v22 = vadd.f32 %v2323_v14, %v1332_v15  ;;  %v1809_v23 = vadd.f32 %v1808_v19, %v1807_v16  ;;  %v1810_v24 = vpop.f32.mrb[30].mxu1  ;;  %v1747_v25 = vpop.f32.mrb[31].mxu0 }
 0x177   : > { %v1748_v26 = vadd.f32 %v1747_v25, %v1746_v20  ;;  %v1811_v27 = vpop.f32.mrb[31].mxu1  ;;  %v1479_v46 = vld [vmem:[%s2331_s15 + $0x50] sm:$0xff] (%p2033_p6) }
 0x178   : > { %1386 = vst [vmem:[%s2331_s15 + $0x60] sm:$0xff] %v1370_v21  ;;  %v1371_v28 = vmax.f32 %v1355_v22, 0.0  ;;  %v1255_v29 = vadd.f32 %v1809_v23, %v1745_v18  ;;  %v1812_v30 = vadd.f32 %v1811_v27, %v1810_v24  ;;  %1480 = vst [vmem:[%s1401_s22 + $0xa0] sm:$0xff] (%p2033_p6), %v1479_v46 }
 0x179   : > { %v1481_v47 = vld [vmem:[%s2331_s15 + $0x58] sm:$0xff] (%p2033_p6) }
 0x17a   : > { %1387 = vst [vmem:[%s2331_s15 + $0x68] sm:$0xff] %v1371_v28  ;;  %v1333_v31 = vmul.f32 %v2321_v9, %v1255_v29  ;;  %v1258_v32 = vadd.f32 %v1812_v30, %v1748_v26  ;;  %1482 = vst [vmem:[%s1401_s22 + $0xb0] sm:$0xff] (%p2033_p6), %v1481_v47 }
 0x17c   : > { %v1356_v33 = vadd.f32 %v2323_v14, %v1333_v31  ;;  %v1334_v34 = vmul.f32 %v2321_v9, %v1258_v32  ;;  %1396 = sbr.rel (!%p2033_p6) target bundleno = 395 (0x18b), region = 89  ;;  %v1459_v9 = vld [vmem:[%s2331_s15] sm:$0xff] (%p2033_p6) }
 0x17d   : > { %1460 = vst [vmem:[%s1401_s22] sm:$0xff] (%p2033_p6), %v1459_v9 }
 0x17e   : > { %v1372_v35 = vmax.f32 %v1356_v33, 0.0  ;;  %v1357_v36 = vadd.f32 %v2323_v14, %v1334_v34  ;;  %v1463_v14 = vld [vmem:[%s2331_s15 + $0x10] sm:$0xff] (%p2033_p6) }
 0x17f   : > { %1464 = vst [vmem:[%s1401_s22 + $0x20] sm:$0xff] (%p2033_p6), %v1463_v14  ;;  %v1483_v48 = vld [vmem:[%s2331_s15 + $0x60] sm:$0xff] (%p2033_p6) }
 0x180   : > { %1388 = vst [vmem:[%s2331_s15 + $0x70] sm:$0xff] %v1372_v35  ;;  %v1373_v37 = vmax.f32 %v1357_v36, 0.0  ;;  %1484 = vst [vmem:[%s1401_s22 + $0xc0] sm:$0xff] (%p2033_p6), %v1483_v48 }
 0x181   : > { %v1485_v49 = vld [vmem:[%s2331_s15 + $0x68] sm:$0xff] (%p2033_p6) }
 0x182   : > { %1389 = vst [vmem:[%s2331_s15 + $0x78] sm:$0xff] %v1373_v37  ;;  %1486 = vst [vmem:[%s1401_s22 + $0xd0] sm:$0xff] (%p2033_p6), %v1485_v49 }
 0x187   : > { %v1487_v50 = vld [vmem:[%s2331_s15 + $0x70] sm:$0xff] }
 0x188   : > { %1488 = vst [vmem:[%s1401_s22 + $0xe0] sm:$0xff] %v1487_v50 }
 0x189   : > { %v1489_v51 = vld [vmem:[%s2331_s15 + $0x78] sm:$0xff] }
 0x18a   : > { %1490 = vst [vmem:[%s1401_s22 + $0xf0] sm:$0xff] %v1489_v51 }
 0x18b PF: > { %s14_s19 = sadd.s32 1, %s1971_s19   ;;  %s2420_s15 = smov %s1959_s16 }
 0x18c   : > { %p11_p12 = scmp.ge.s32.totalorder %s14_s19, 4   ;;  %s2421_s16 = smov %s2038_s25 }
 0x18d   : > { %s2422_s17 = smov %s1967_s18  ;;  %s2423_s18 = smov %s2425_s20 }
 0x18e   :  { %13 = sbr.rel (!%p11_p12) target bundleno = 3 (0x3), region = 167 }

// kernel: erfnet_forward.148
= control target key start
LH: loop header
LB: loop body
LE: loop exit
PB: predicated region body
PF: predicated region fallthrough
CT: control target
= control target key end

     0   :  { %s761_s1 = inlined_call_operand.vmem [shape: bf16[128,128], index: 1, kind: input, shape index: {}]   ;;  %s762_s0 = inlined_call_operand.vmem [shape: bf16[128,128], index: 0, kind: input, shape index: {}]   ;;  %s763_s2 = inlined_call_operand.vmem [shape: f32[1,128], index: 2, kind: input, shape index: {}]   ;;  %s764_s3 = inlined_call_operand.vmem [shape: f32[1,128], index: 3, kind: input, shape index: {}]   ;;  %s765_s4 = inlined_call_operand.vmem [shape: f32[128,128], index: 4, kind: input, shape index: {}]   ;;  %s766_s5 = inlined_call_operand.vmem [shape: f32[128,128], index: 5, kind: output, shape index: {}]  }
   0x1   :  { %v529_v0 = vld [vmem:[%s761_s1] sm:$0xff]   ;;  %v530_v1 = vld [vmem:[%s761_s1 + $0x8] sm:$0xff]   ;;  %v531_v2 = vld [vmem:[%s761_s1 + $0x10] sm:$0xff]  }
   0x2   :  { %481 = vmatprep.subr.bf16.mxu0 %v529_v0  ;;  %513 = vmatprep.subr.bf16.mxu1 %v529_v0  ;;  %v532_v3 = vld [vmem:[%s761_s1 + $0x18] sm:$0xff]   ;;  %v537_v4 = vld [vmem:[%s762_s0] sm:$0xff]   ;;  %v534_v7 = vld [vmem:[%s761_s1 + $0x28] sm:$0xff]  }
   0x3   :  { %482 = vmatpush3.bf16.msra.mxu0 %v529_v0  ;;  %521 = vmatpush3.bf16.msra.mxu1 %v529_v0  ;;  %v538_v5 = vld [vmem:[%s762_s0 + $0x20] sm:$0xff]   ;;  %v535_v8 = vld [vmem:[%s761_s1 + $0x30] sm:$0xff]   ;;  %v536_v9 = vld [vmem:[%s761_s1 + $0x38] sm:$0xff]  }
   0x4   :  { %483 = vmatprep.subr.bf16.mxu0 %v530_v1  ;;  %514 = vmatprep.subr.bf16.mxu1 %v530_v1  ;;  %v533_v6 = vld [vmem:[%s761_s1 + $0x20] sm:$0xff]   ;;  %v539_v10 = vld [vmem:[%s762_s0 + $0x8] sm:$0xff]   ;;  %v541_v12 = vld [vmem:[%s762_s0 + $0x10] sm:$0xff]  }
   0x5   :  { %497 = vmatprep.mubr.bf16.mxu0 %v537_v4  ;;  %505 = vmatprep.mubr.bf16.mxu1 %v538_v5  ;;  %v540_v11 = vld [vmem:[%s762_s0 + $0x28] sm:$0xff]   ;;  %v542_v13 = vld [vmem:[%s762_s0 + $0x30] sm:$0xff]   ;;  %v543_v14 = vld [vmem:[%s762_s0 + $0x18] sm:$0xff]  }
   0x6   :  { %v544_v15 = vld [vmem:[%s762_s0 + $0x38] sm:$0xff]   ;;  %v626_v16 = vld [vmem:[%s763_s2] ss:$0 sm:$0xff]  ;;  %v381_v24 = vld [vmem:[%s765_s4 + $0x10] sm:$0xff] }
   0x7   :  { %484 = vmatpush3.bf16.msra.mxu0 %v530_v1  ;;  %522 = vmatpush3.bf16.msra.mxu1 %v530_v1  ;;  %v631_v18 = vld [vmem:[%s764_s3] ss:$0 sm:$0xff]  ;;  %v389_v25 = vld [vmem:[%s765_s4 + $0x50] sm:$0xff]  ;;  %v382_v40 = vld [vmem:[%s765_s4 + $0x18] sm:$0xff] }
   0x8   :  { %485 = vmatprep.subr.bf16.mxu0 %v531_v2  ;;  %515 = vmatprep.subr.bf16.mxu1 %v531_v2  ;;  %v379_v32 = vld [vmem:[%s765_s4] sm:$0xff]  ;;  %v390_v41 = vld [vmem:[%s765_s4 + $0x58] sm:$0xff]  ;;  %v380_v48 = vld [vmem:[%s765_s4 + $0x8] sm:$0xff] }
   0x9   :  { %v387_v33 = vld [vmem:[%s765_s4 + $0x40] sm:$0xff]  ;;  %v388_v49 = vld [vmem:[%s765_s4 + $0x48] sm:$0xff] }
   0xb   :  { %486 = vmatpush3.bf16.msra.mxu0 %v531_v2  ;;  %523 = vmatpush3.bf16.msra.mxu1 %v531_v2 }
   0xc   :  { %487 = vmatprep.subr.bf16.mxu0 %v532_v3  ;;  %516 = vmatprep.subr.bf16.mxu1 %v532_v3 }
   0xf   :  { %488 = vmatpush3.bf16.msra.mxu0 %v532_v3  ;;  %524 = vmatpush3.bf16.msra.mxu1 %v532_v3 }
  0x10   :  { %489 = vmatprep.subr.bf16.mxu0 %v533_v6  ;;  %517 = vmatprep.subr.bf16.mxu1 %v533_v6 }
  0x13   :  { %490 = vmatpush3.bf16.msra.mxu0 %v533_v6  ;;  %525 = vmatpush3.bf16.msra.mxu1 %v533_v6 }
  0x14   :  { %491 = vmatprep.subr.bf16.mxu0 %v534_v7  ;;  %518 = vmatprep.subr.bf16.mxu1 %v534_v7 }
  0x17   :  { %492 = vmatpush3.bf16.msra.mxu0 %v534_v7  ;;  %526 = vmatpush3.bf16.msra.mxu1 %v534_v7 }
  0x18   :  { %493 = vmatprep.subr.bf16.mxu0 %v535_v8  ;;  %519 = vmatprep.subr.bf16.mxu1 %v535_v8 }
  0x1b   :  { %494 = vmatpush3.bf16.msra.mxu0 %v535_v8  ;;  %527 = vmatpush3.bf16.msra.mxu1 %v535_v8  ;;  %v385_v8 = vld [vmem:[%s765_s4 + $0x30] sm:$0xff] }
  0x1c   :  { %495 = vmatprep.subr.bf16.mxu0 %v536_v9  ;;  %520 = vmatprep.subr.bf16.mxu1 %v536_v9 }
  0x1f   :  { %496 = vmatpush3.bf16.msra.mxu0 %v536_v9  ;;  %528 = vmatpush3.bf16.msra.mxu1 %v536_v9  ;;  %v393_v9 = vld [vmem:[%s765_s4 + $0x70] sm:$0xff] }
  0x22   :  { %498 = vmatmul.mubr.bf16.vlgmr.msra.gmra.mrb[0].mxu0 %v539_v10  ;;  %506 = vmatmul.mubr.bf16.vlgmr.msra.gmra.mrb[0].mxu1 %v540_v11 }
  0x23   :  { %501 = vmatprep.mubr.bf16.mxu0 %v541_v12  ;;  %509 = vmatprep.mubr.bf16.mxu1 %v542_v13 }
  0x2a   :  { %502 = vmatmul.mubr.bf16.gmra.mrb[4].mxu0 %v543_v14  ;;  %510 = vmatmul.mubr.bf16.gmra.mrb[4].mxu1 %v544_v15 }
  0xf5   :  { %v499_v17 = vpop.f32.mrb[0].mxu0  ;;  %v507_v19 = vpop.f32.mrb[0].mxu1 }
  0xf6   :  { %v342_v20 = vmul.f32 %v499_v17, %v626_v16  ;;  %v350_v21 = vmul.f32 %v507_v19, %v626_v16  ;;  %v219_v22 = vpop.f32.mrb[1].mxu0  ;;  %v251_v23 = vpop.f32.mrb[1].mxu1  ;;  %v383_v17 = vld [vmem:[%s765_s4 + $0x20] sm:$0xff] }
  0xf7   :  { %v340_v26 = vmul.f32 %v626_v16, %v219_v22  ;;  %v348_v27 = vmul.f32 %v626_v16, %v251_v23  ;;  %v500_v28 = vpop.f32.mrb[2].mxu0  ;;  %v508_v29 = vpop.f32.mrb[2].mxu1  ;;  %v391_v19 = vld [vmem:[%s765_s4 + $0x60] sm:$0xff] }
  0xf8   :  { %v365_v30 = vadd.f32 %v631_v18, %v342_v20  ;;  %v373_v31 = vadd.f32 %v631_v18, %v350_v21  ;;  %v343_v34 = vmul.f32 %v500_v28, %v626_v16  ;;  %v351_v35 = vmul.f32 %v508_v29, %v626_v16  ;;  %v222_v36 = vpop.f32.mrb[3].mxu0  ;;  %v254_v37 = vpop.f32.mrb[3].mxu1 }
  0xf9   :  { %v363_v38 = vadd.f32 %v631_v18, %v340_v26  ;;  %v371_v39 = vadd.f32 %v631_v18, %v348_v27  ;;  %v341_v42 = vmul.f32 %v626_v16, %v222_v36  ;;  %v349_v43 = vmul.f32 %v626_v16, %v254_v37  ;;  %v386_v26 = vld [vmem:[%s765_s4 + $0x38] sm:$0xff] }
  0xfa   :  { %v397_v44 = vadd.f32 %v381_v24, %v365_v30  ;;  %v405_v45 = vadd.f32 %v389_v25, %v373_v31  ;;  %v366_v46 = vadd.f32 %v631_v18, %v343_v34  ;;  %v374_v47 = vadd.f32 %v631_v18, %v351_v35  ;;  %v394_v27 = vld [vmem:[%s765_s4 + $0x78] sm:$0xff]  ;;  %v384_v34 = vld [vmem:[%s765_s4 + $0x28] sm:$0xff] }
  0xfb   :  { %v395_v50 = vadd.f32 %v379_v32, %v363_v38  ;;  %v403_v51 = vadd.f32 %v387_v33, %v371_v39  ;;  %v364_v52 = vadd.f32 %v631_v18, %v341_v42  ;;  %v372_v53 = vadd.f32 %v631_v18, %v349_v43  ;;  %v392_v35 = vld [vmem:[%s765_s4 + $0x68] sm:$0xff] }
  0xfc   :  { %v413_v54 = vmax.f32 %v397_v44, 0.0  ;;  %v421_v55 = vmax.f32 %v405_v45, 0.0  ;;  %v398_v56 = vadd.f32 %v382_v40, %v366_v46  ;;  %v406_v57 = vadd.f32 %v390_v41, %v374_v47 }
  0xfd   :  { %v411_v58 = vmax.f32 %v395_v50, 0.0  ;;  %v419_v59 = vmax.f32 %v403_v51, 0.0  ;;  %v396_v60 = vadd.f32 %v380_v48, %v364_v52  ;;  %v404_v61 = vadd.f32 %v388_v49, %v372_v53  ;;  %v503_v62 = vpop.f32.mrb[4].mxu0  ;;  %v511_v63 = vpop.f32.mrb[4].mxu1 }
  0xfe   :  { %429 = vst [vmem:[%s766_s5 + $0x10] sm:$0xff] %v413_v54  ;;  %437 = vst [vmem:[%s766_s5 + $0x50] sm:$0xff] %v421_v55  ;;  %v414_v0 = vmax.f32 %v398_v56, 0.0  ;;  %v422_v1 = vmax.f32 %v406_v57, 0.0  ;;  %v346_v2 = vmul.f32 %v503_v62, %v626_v16  ;;  %v354_v3 = vmul.f32 %v511_v63, %v626_v16  ;;  %v235_v4 = vpop.f32.mrb[5].mxu0  ;;  %v267_v5 = vpop.f32.mrb[5].mxu1 }
  0xff   :  { %427 = vst [vmem:[%s766_s5] sm:$0xff] %v411_v58  ;;  %435 = vst [vmem:[%s766_s5 + $0x40] sm:$0xff] %v419_v59  ;;  %v412_v6 = vmax.f32 %v396_v60, 0.0  ;;  %v420_v7 = vmax.f32 %v404_v61, 0.0  ;;  %v344_v10 = vmul.f32 %v626_v16, %v235_v4  ;;  %v352_v11 = vmul.f32 %v626_v16, %v267_v5  ;;  %v504_v12 = vpop.f32.mrb[6].mxu0  ;;  %v512_v13 = vpop.f32.mrb[6].mxu1 }
 0x100   :  { %430 = vst [vmem:[%s766_s5 + $0x18] sm:$0xff] %v414_v0  ;;  %438 = vst [vmem:[%s766_s5 + $0x58] sm:$0xff] %v422_v1  ;;  %v369_v14 = vadd.f32 %v631_v18, %v346_v2  ;;  %v377_v15 = vadd.f32 %v631_v18, %v354_v3  ;;  %v347_v20 = vmul.f32 %v504_v12, %v626_v16  ;;  %v238_v22 = vpop.f32.mrb[7].mxu0  ;;  %v270_v23 = vpop.f32.mrb[7].mxu1 }
 0x101   :  { %v355_v21 = vmul.f32 %v512_v13, %v626_v16  ;;  %428 = vst [vmem:[%s766_s5 + $0x8] sm:$0xff] %v412_v6  ;;  %436 = vst [vmem:[%s766_s5 + $0x48] sm:$0xff] %v420_v7  ;;  %v367_v24 = vadd.f32 %v631_v18, %v344_v10  ;;  %v375_v25 = vadd.f32 %v631_v18, %v352_v11 }
 0x102   :  { %v345_v28 = vmul.f32 %v626_v16, %v238_v22  ;;  %v353_v29 = vmul.f32 %v626_v16, %v270_v23  ;;  %v401_v30 = vadd.f32 %v385_v8, %v369_v14  ;;  %v409_v31 = vadd.f32 %v393_v9, %v377_v15 }
 0x103   :  { %v370_v32 = vadd.f32 %v631_v18, %v347_v20  ;;  %v378_v33 = vadd.f32 %v631_v18, %v355_v21  ;;  %v399_v36 = vadd.f32 %v383_v17, %v367_v24  ;;  %v407_v37 = vadd.f32 %v391_v19, %v375_v25 }
 0x104   :  { %v368_v38 = vadd.f32 %v631_v18, %v345_v28  ;;  %v376_v16 = vadd.f32 %v631_v18, %v353_v29  ;;  %v417_v39 = vmax.f32 %v401_v30, 0.0  ;;  %v425_v40 = vmax.f32 %v409_v31, 0.0 }
 0x105   :  { %v402_v41 = vadd.f32 %v386_v26, %v370_v32  ;;  %v410_v42 = vadd.f32 %v394_v27, %v378_v33  ;;  %v415_v43 = vmax.f32 %v399_v36, 0.0  ;;  %v423_v44 = vmax.f32 %v407_v37, 0.0 }
 0x106   :  { %v400_v45 = vadd.f32 %v384_v34, %v368_v38  ;;  %v408_v46 = vadd.f32 %v392_v35, %v376_v16  ;;  %433 = vst [vmem:[%s766_s5 + $0x30] sm:$0xff] %v417_v39  ;;  %441 = vst [vmem:[%s766_s5 + $0x70] sm:$0xff] %v425_v40 }
 0x107   :  { %v418_v47 = vmax.f32 %v402_v41, 0.0  ;;  %v426_v48 = vmax.f32 %v410_v42, 0.0  ;;  %431 = vst [vmem:[%s766_s5 + $0x20] sm:$0xff] %v415_v43  ;;  %439 = vst [vmem:[%s766_s5 + $0x60] sm:$0xff] %v423_v44 }
 0x108   :  { %v416_v18 = vmax.f32 %v400_v45, 0.0  ;;  %v424_v49 = vmax.f32 %v408_v46, 0.0 }
 0x109   :  { %434 = vst [vmem:[%s766_s5 + $0x38] sm:$0xff] %v418_v47  ;;  %442 = vst [vmem:[%s766_s5 + $0x78] sm:$0xff] %v426_v48 }
 0x10a   :  { %432 = vst [vmem:[%s766_s5 + $0x28] sm:$0xff] %v416_v18  ;;  %440 = vst [vmem:[%s766_s5 + $0x68] sm:$0xff] %v424_v49 }

// kernel: erfnet_forward.153
= control target key start
LH: loop header
LB: loop body
LE: loop exit
PB: predicated region body
PF: predicated region fallthrough
CT: control target
= control target key end

     0   :  { %s621_s1 = inlined_call_operand.vmem [shape: bf16[128,128], index: 1, kind: input, shape index: {}]   ;;  %s622_s0 = inlined_call_operand.vmem [shape: bf16[128,128], index: 0, kind: input, shape index: {}]   ;;  %s623_s2 = inlined_call_operand.vmem [shape: f32[1,128], index: 2, kind: input, shape index: {}]   ;;  %s624_s3 = inlined_call_operand.vmem [shape: f32[1,128], index: 3, kind: input, shape index: {}]   ;;  %s625_s4 = inlined_call_operand.vmem [shape: f32[128,128], index: 4, kind: output, shape index: {}]  }
   0x1   :  { %v478_v0 = vld [vmem:[%s621_s1] sm:$0xff]   ;;  %v479_v1 = vld [vmem:[%s621_s1 + $0x8] sm:$0xff]   ;;  %v480_v2 = vld [vmem:[%s621_s1 + $0x10] sm:$0xff]  }
   0x2   :  { %430 = vmatprep.subr.bf16.mxu0 %v478_v0  ;;  %462 = vmatprep.subr.bf16.mxu1 %v478_v0  ;;  %v481_v3 = vld [vmem:[%s621_s1 + $0x18] sm:$0xff]   ;;  %v486_v4 = vld [vmem:[%s622_s0] sm:$0xff]   ;;  %v483_v7 = vld [vmem:[%s621_s1 + $0x28] sm:$0xff]  }
   0x3   :  { %431 = vmatpush3.bf16.msra.mxu0 %v478_v0  ;;  %470 = vmatpush3.bf16.msra.mxu1 %v478_v0  ;;  %v487_v5 = vld [vmem:[%s622_s0 + $0x20] sm:$0xff]   ;;  %v484_v8 = vld [vmem:[%s621_s1 + $0x30] sm:$0xff]   ;;  %v485_v9 = vld [vmem:[%s621_s1 + $0x38] sm:$0xff]  }
   0x4   :  { %432 = vmatprep.subr.bf16.mxu0 %v479_v1  ;;  %463 = vmatprep.subr.bf16.mxu1 %v479_v1  ;;  %v482_v6 = vld [vmem:[%s621_s1 + $0x20] sm:$0xff]   ;;  %v488_v10 = vld [vmem:[%s622_s0 + $0x8] sm:$0xff]   ;;  %v490_v12 = vld [vmem:[%s622_s0 + $0x10] sm:$0xff]  }
   0x5   :  { %446 = vmatprep.mubr.bf16.mxu0 %v486_v4  ;;  %454 = vmatprep.mubr.bf16.mxu1 %v487_v5  ;;  %v489_v11 = vld [vmem:[%s622_s0 + $0x28] sm:$0xff]   ;;  %v491_v13 = vld [vmem:[%s622_s0 + $0x30] sm:$0xff]   ;;  %v492_v14 = vld [vmem:[%s622_s0 + $0x18] sm:$0xff]  }
   0x6   :  { %v493_v15 = vld [vmem:[%s622_s0 + $0x38] sm:$0xff]   ;;  %v412_v16 = vld [vmem:[%s623_s2] ss:$0 sm:$0xff] }
   0x7   :  { %433 = vmatpush3.bf16.msra.mxu0 %v479_v1  ;;  %471 = vmatpush3.bf16.msra.mxu1 %v479_v1  ;;  %v413_v18 = vld [vmem:[%s624_s3] ss:$0 sm:$0xff] }
   0x8   :  { %434 = vmatprep.subr.bf16.mxu0 %v480_v2  ;;  %464 = vmatprep.subr.bf16.mxu1 %v480_v2 }
   0xb   :  { %435 = vmatpush3.bf16.msra.mxu0 %v480_v2  ;;  %472 = vmatpush3.bf16.msra.mxu1 %v480_v2 }
   0xc   :  { %436 = vmatprep.subr.bf16.mxu0 %v481_v3  ;;  %465 = vmatprep.subr.bf16.mxu1 %v481_v3 }
   0xf   :  { %437 = vmatpush3.bf16.msra.mxu0 %v481_v3  ;;  %473 = vmatpush3.bf16.msra.mxu1 %v481_v3 }
  0x10   :  { %438 = vmatprep.subr.bf16.mxu0 %v482_v6  ;;  %466 = vmatprep.subr.bf16.mxu1 %v482_v6 }
  0x13   :  { %439 = vmatpush3.bf16.msra.mxu0 %v482_v6  ;;  %474 = vmatpush3.bf16.msra.mxu1 %v482_v6 }
  0x14   :  { %440 = vmatprep.subr.bf16.mxu0 %v483_v7  ;;  %467 = vmatprep.subr.bf16.mxu1 %v483_v7 }
  0x17   :  { %441 = vmatpush3.bf16.msra.mxu0 %v483_v7  ;;  %475 = vmatpush3.bf16.msra.mxu1 %v483_v7 }
  0x18   :  { %442 = vmatprep.subr.bf16.mxu0 %v484_v8  ;;  %468 = vmatprep.subr.bf16.mxu1 %v484_v8 }
  0x1b   :  { %443 = vmatpush3.bf16.msra.mxu0 %v484_v8  ;;  %476 = vmatpush3.bf16.msra.mxu1 %v484_v8 }
  0x1c   :  { %444 = vmatprep.subr.bf16.mxu0 %v485_v9  ;;  %469 = vmatprep.subr.bf16.mxu1 %v485_v9 }
  0x1f   :  { %445 = vmatpush3.bf16.msra.mxu0 %v485_v9  ;;  %477 = vmatpush3.bf16.msra.mxu1 %v485_v9 }
  0x22   :  { %447 = vmatmul.mubr.bf16.vlgmr.msra.gmra.mrb[0].mxu0 %v488_v10  ;;  %455 = vmatmul.mubr.bf16.vlgmr.msra.gmra.mrb[0].mxu1 %v489_v11 }
  0x23   :  { %450 = vmatprep.mubr.bf16.mxu0 %v490_v12  ;;  %458 = vmatprep.mubr.bf16.mxu1 %v491_v13 }
  0x2a   :  { %451 = vmatmul.mubr.bf16.gmra.mrb[4].mxu0 %v492_v14  ;;  %459 = vmatmul.mubr.bf16.gmra.mrb[4].mxu1 %v493_v15 }
  0xf5   :  { %v448_v17 = vpop.f32.mrb[0].mxu0  ;;  %v456_v19 = vpop.f32.mrb[0].mxu1 }
  0xf6   :  { %v339_v20 = vmul.f32 %v448_v17, %v412_v16  ;;  %v347_v21 = vmul.f32 %v456_v19, %v412_v16  ;;  %v216_v22 = vpop.f32.mrb[1].mxu0  ;;  %v248_v23 = vpop.f32.mrb[1].mxu1 }
  0xf7   :  { %v337_v24 = vmul.f32 %v412_v16, %v216_v22  ;;  %v345_v25 = vmul.f32 %v412_v16, %v248_v23  ;;  %v449_v26 = vpop.f32.mrb[2].mxu0  ;;  %v457_v27 = vpop.f32.mrb[2].mxu1 }
  0xf8   :  { %v362_v28 = vadd.f32 %v413_v18, %v339_v20  ;;  %v370_v29 = vadd.f32 %v413_v18, %v347_v21  ;;  %v340_v30 = vmul.f32 %v449_v26, %v412_v16  ;;  %v348_v31 = vmul.f32 %v457_v27, %v412_v16  ;;  %v219_v32 = vpop.f32.mrb[3].mxu0  ;;  %v251_v33 = vpop.f32.mrb[3].mxu1 }
  0xf9   :  { %v360_v34 = vadd.f32 %v413_v18, %v337_v24  ;;  %v368_v35 = vadd.f32 %v413_v18, %v345_v25  ;;  %v338_v36 = vmul.f32 %v412_v16, %v219_v32  ;;  %v346_v37 = vmul.f32 %v412_v16, %v251_v33 }
  0xfa   :  { %378 = vst [vmem:[%s625_s4 + $0x10] sm:$0xff] %v362_v28  ;;  %386 = vst [vmem:[%s625_s4 + $0x50] sm:$0xff] %v370_v29  ;;  %v363_v38 = vadd.f32 %v413_v18, %v340_v30  ;;  %v371_v39 = vadd.f32 %v413_v18, %v348_v31 }
  0xfb   :  { %376 = vst [vmem:[%s625_s4] sm:$0xff] %v360_v34  ;;  %384 = vst [vmem:[%s625_s4 + $0x40] sm:$0xff] %v368_v35  ;;  %v361_v40 = vadd.f32 %v413_v18, %v338_v36  ;;  %v369_v41 = vadd.f32 %v413_v18, %v346_v37 }
  0xfc   :  { %379 = vst [vmem:[%s625_s4 + $0x18] sm:$0xff] %v363_v38  ;;  %387 = vst [vmem:[%s625_s4 + $0x58] sm:$0xff] %v371_v39 }
  0xfd   :  { %377 = vst [vmem:[%s625_s4 + $0x8] sm:$0xff] %v361_v40  ;;  %385 = vst [vmem:[%s625_s4 + $0x48] sm:$0xff] %v369_v41  ;;  %v452_v42 = vpop.f32.mrb[4].mxu0  ;;  %v460_v43 = vpop.f32.mrb[4].mxu1 }
  0xfe   :  { %v343_v44 = vmul.f32 %v452_v42, %v412_v16  ;;  %v351_v45 = vmul.f32 %v460_v43, %v412_v16  ;;  %v232_v46 = vpop.f32.mrb[5].mxu0  ;;  %v264_v47 = vpop.f32.mrb[5].mxu1 }
  0xff   :  { %v341_v48 = vmul.f32 %v412_v16, %v232_v46  ;;  %v349_v49 = vmul.f32 %v412_v16, %v264_v47  ;;  %v453_v50 = vpop.f32.mrb[6].mxu0  ;;  %v461_v51 = vpop.f32.mrb[6].mxu1 }
 0x100   :  { %v366_v52 = vadd.f32 %v413_v18, %v343_v44  ;;  %v374_v53 = vadd.f32 %v413_v18, %v351_v45  ;;  %v344_v54 = vmul.f32 %v453_v50, %v412_v16  ;;  %v352_v55 = vmul.f32 %v461_v51, %v412_v16  ;;  %v235_v56 = vpop.f32.mrb[7].mxu0  ;;  %v267_v57 = vpop.f32.mrb[7].mxu1 }
 0x101   :  { %v364_v58 = vadd.f32 %v413_v18, %v341_v48  ;;  %v372_v59 = vadd.f32 %v413_v18, %v349_v49  ;;  %v342_v60 = vmul.f32 %v412_v16, %v235_v56  ;;  %v350_v61 = vmul.f32 %v412_v16, %v267_v57 }
 0x102   :  { %382 = vst [vmem:[%s625_s4 + $0x30] sm:$0xff] %v366_v52  ;;  %390 = vst [vmem:[%s625_s4 + $0x70] sm:$0xff] %v374_v53  ;;  %v367_v62 = vadd.f32 %v413_v18, %v344_v54  ;;  %v375_v63 = vadd.f32 %v413_v18, %v352_v55 }
 0x103   :  { %380 = vst [vmem:[%s625_s4 + $0x20] sm:$0xff] %v364_v58  ;;  %388 = vst [vmem:[%s625_s4 + $0x60] sm:$0xff] %v372_v59  ;;  %v365_v0 = vadd.f32 %v413_v18, %v342_v60  ;;  %v373_v1 = vadd.f32 %v413_v18, %v350_v61 }
 0x104   :  { %383 = vst [vmem:[%s625_s4 + $0x38] sm:$0xff] %v367_v62  ;;  %391 = vst [vmem:[%s625_s4 + $0x78] sm:$0xff] %v375_v63 }
 0x105   :  { %381 = vst [vmem:[%s625_s4 + $0x28] sm:$0xff] %v365_v0  ;;  %389 = vst [vmem:[%s625_s4 + $0x68] sm:$0xff] %v373_v1 }

</bundles_post_ra>
